<compile_context>
chip_gen: v6e
topology: v6e:2x2x1
jax: 0.10.0
libtpu: 0.0.40
codegen_flags: <defaults>
</compile_context>

<pallas_src>
import jax
import jax.numpy as jnp
from jax.experimental import pallas as pl
from jax.experimental.pallas import tpu as pltpu


def _linear_add_relu_kernel(m_ref, bias_ref, x_ref, other_ref, o_ref):
    # m_ref:     (384, 384) f32, block-diagonal kron(I_128, W^T); VMEM-resident
    #            (constant index_map -> DMA'd once per core).
    # bias_ref:  (1, 384)   f32, bias tiled per pixel: bias_ref[0, l] = b[l % 3].
    # x_ref, other_ref, o_ref: (TR, 384) f32 tiles of the flat interleaved stream.
    y = jnp.dot(
        x_ref[...],
        m_ref[...],
        preferred_element_type=jnp.float32,
        precision=jax.lax.Precision.HIGHEST,  # keep full f32 accuracy on the MXU
    )
    y = y + bias_ref[...] + other_ref[...]
    o_ref[...] = jnp.maximum(y, 0.0).astype(o_ref.dtype)


def linear_add_relu(x, weight, bias, other, *, tile_rows=512):
    """relu(x @ weight.T + bias + other) over the last (feature) dim.

    x:      (..., 3) float32, feature-last (as torch.nn.Linear consumes it)
    weight: (3, 3) torch-style (out_features, in_features)
    bias:   (3,)
    other:  broadcastable to the output shape (same shape in the module's use)
    """
    f32 = jnp.float32
    c_in = x.shape[-1]
    c_out = weight.shape[0]
    out_shape = x.shape[:-1] + (c_out,)

    # ---- flat, channel-interleaved views (pure reshapes of contiguous data) ----
    x_flat = x.astype(f32).reshape(-1)                                   # (F,)
    # broadcast_to is a no-op when `other` already has the output shape (the
    # module's usage).
    # TODO(synk): for a genuinely tiny `other` (per-channel / scalar), fold it
    # into the bias row instead of materializing a full-size array.
    other_flat = jnp.broadcast_to(other, out_shape).astype(f32).reshape(-1)
    total = x_flat.shape[0]

    LANES = 128 * c_in  # 384: every 384-wide row starts at a pixel boundary
    rows = pl.cdiv(total, LANES)
    total_pad = rows * LANES
    if total_pad != total:
        # TODO(synk): only hit when N % 128 != 0; costs one pad copy per operand.
        x_flat = jnp.pad(x_flat, (0, total_pad - total))
        other_flat = jnp.pad(other_flat, (0, total_pad - total))
    x2d = x_flat.reshape(rows, LANES)
    other2d = other_flat.reshape(rows, LANES)

    # ---- small constants: block-diagonal mix matrix + tiled bias row ----
    # out_row = x_row @ M applies out[c] = sum_k W[c, k] * x[k] to every pixel
    # of the interleaved row.
    m = jnp.kron(jnp.eye(LANES // c_in, dtype=f32), weight.astype(f32).T)  # (384, 384)
    bias_row = jnp.tile(bias.astype(f32), LANES // c_out).reshape(1, LANES)

    # ---- row tiling: sublane-dense, big steps, grid >= 2 when possible ----
    tr = max(8, (int(tile_rows) // 8) * 8)
    if rows < 2 * tr:
        tr = ((rows // 2) // 8) * 8 if rows >= 16 else rows  # full-dim block ok
    tr = min(tr, rows)
    n_blocks = pl.cdiv(rows, tr)

    out2d = pl.pallas_call(
        _linear_add_relu_kernel,
        out_shape=jax.ShapeDtypeStruct((rows, LANES), f32),
        grid=(n_blocks,),
        in_specs=[
            pl.BlockSpec((LANES, LANES), lambda i: (0, 0)),  # M (resident)
            pl.BlockSpec((1, LANES), lambda i: (0, 0)),      # bias row (resident)
            pl.BlockSpec((tr, LANES), lambda i: (i, 0)),     # x tile
            pl.BlockSpec((tr, LANES), lambda i: (i, 0)),     # other tile
        ],
        out_specs=pl.BlockSpec((tr, LANES), lambda i: (i, 0)),
        compiler_params=pltpu.CompilerParams(
            dimension_semantics=("parallel",),
        ),
    )(m, bias_row, x2d, other2d)

    out_flat = out2d.reshape(-1)
    if total_pad != total:
        out_flat = out_flat[:total]
    return out_flat.reshape(out_shape).astype(x.dtype)


if __name__ == "__main__":
    key = jax.random.PRNGKey(0)
    k_x, k_o, k_w, k_b = jax.random.split(key, 4)

    # Small shapes consistent with Linear(3, 3): feature dim (last) = 3.
    B, H, W, C = 1, 64, 64, 3
    x = jax.random.normal(k_x, (B, H, W, C), dtype=jnp.float32)
    other = jax.random.normal(k_o, (B, H, W, C), dtype=jnp.float32)

    # Deterministic parameter init (torch Linear default: U(-1/sqrt(in), 1/sqrt(in)))
    bound = 1.0 / jnp.sqrt(jnp.float32(C))
    weight = jax.random.uniform(k_w, (C, C), jnp.float32, -bound, bound)  # (out, in)
    bias = jax.random.uniform(k_b, (C,), jnp.float32, -bound, bound)

    out = linear_add_relu(x, weight, bias, other)
    out = jax.block_until_ready(out)

    # Reference in plain, exact f32 elementwise math (no XLA dot -> no
    # default-precision bf16 surprises in the reference itself).
    ref_lin = (x[..., 0:1] * weight[:, 0]
               + x[..., 1:2] * weight[:, 1]
               + x[..., 2:3] * weight[:, 2]
               + bias)
    ref = jnp.maximum(ref_lin + other, 0.0)

    assert out.shape == ref.shape
    max_err = float(jnp.max(jnp.abs(out - ref)))
    assert jnp.allclose(out, ref, atol=1e-5, rtol=1e-5), max_err

    print("KERNEL_OK")
</pallas_src>

<mosaic_0001>
module attributes {stable_mosaic.version = 11 : i64} {
  func.func @_linear_add_relu_kernel(%arg0: i32, %arg1: memref<384x384xf32, #tpu.memory_space<vmem>>, %arg2: memref<1x384xf32, #tpu.memory_space<vmem>>, %arg3: memref<16x384xf32, #tpu.memory_space<vmem>>, %arg4: memref<16x384xf32, #tpu.memory_space<vmem>>, %arg5: memref<16x384xf32, #tpu.memory_space<vmem>>) attributes {dimension_semantics = [#tpu.dimension_semantics<parallel>], iteration_bounds = array<i64: 2>, scalar_prefetch = 0 : i64, scratch_operands = 0 : i64, tpu.core_type = #tpu.core_type<tc>, window_params = [{pipeline_mode = #tpu.pipeline_mode<synchronous>, transform_indices = @transform_0, window_bounds = array<i64: 384, 384>}, {pipeline_mode = #tpu.pipeline_mode<synchronous>, transform_indices = @transform_1, window_bounds = array<i64: 1, 384>}, {transform_indices = @transform_2, window_bounds = array<i64: 16, 384>}, {transform_indices = @transform_3, window_bounds = array<i64: 16, 384>}, {transform_indices = @transform_4, window_bounds = array<i64: 16, 384>}]} {
    %c0 = arith.constant 0 : index
    %c0_0 = arith.constant 0 : index
    %0 = vector.load %arg3[%c0, %c0_0] : memref<16x384xf32, #tpu.memory_space<vmem>>, vector<16x384xf32>
    %c0_1 = arith.constant 0 : index
    %c0_2 = arith.constant 0 : index
    %1 = vector.load %arg1[%c0_1, %c0_2] : memref<384x384xf32, #tpu.memory_space<vmem>>, vector<384x384xf32>
    %cst = arith.constant dense<0.000000e+00> : vector<16x384xf32>
    %2 = tpu.matmul %0, %1, %cst {dimension_numbers = #tpu.dot_dimension_numbers<[1], [0], [0], [1], [0, 0, 1, 1], [], []>, precision = #tpu.contract_precision<fp32>} : vector<16x384xf32>, vector<384x384xf32>, vector<16x384xf32> -> vector<16x384xf32>
    %c0_3 = arith.constant 0 : index
    %c0_4 = arith.constant 0 : index
    %3 = vector.load %arg2[%c0_3, %c0_4] : memref<1x384xf32, #tpu.memory_space<vmem>>, vector<1x384xf32>
    %4 = vector.broadcast %3 : vector<1x384xf32> to vector<16x384xf32>
    %5 = arith.addf %2, %4 : vector<16x384xf32>
    %c0_5 = arith.constant 0 : index
    %c0_6 = arith.constant 0 : index
    %6 = vector.load %arg4[%c0_5, %c0_6] : memref<16x384xf32, #tpu.memory_space<vmem>>, vector<16x384xf32>
    %7 = arith.addf %5, %6 : vector<16x384xf32>
    %cst_7 = arith.constant 0.000000e+00 : f32
    %8 = vector.broadcast %cst_7 : f32 to vector<16x384xf32>
    %9 = arith.maximumf %7, %8 : vector<16x384xf32>
    %c0_8 = arith.constant 0 : index
    %c0_9 = arith.constant 0 : index
    %10 = vector.load %arg5[%c0_8, %c0_9] : memref<16x384xf32, #tpu.memory_space<vmem>>, vector<16x384xf32>
    tpu.vector_store %arg5[%c0_8, %c0_9], %9 {strides = array<i32>} : memref<16x384xf32, #tpu.memory_space<vmem>>, vector<16x384xf32>,
    return
  }
  func.func @transform_0(%arg0: i32) -> (i32, i32) {
    %c0_i32 = arith.constant 0 : i32
    %c0_i32_0 = arith.constant 0 : i32
    %c0_i32_1 = arith.constant 0 : i32
    return %c0_i32, %c0_i32_0 : i32, i32
  }
  func.func @transform_1(%arg0: i32) -> (i32, i32) {
    %c0_i32 = arith.constant 0 : i32
    %c0_i32_0 = arith.constant 0 : i32
    %c0_i32_1 = arith.constant 0 : i32
    return %c0_i32, %c0_i32_0 : i32, i32
  }
  func.func @transform_2(%arg0: i32) -> (i32, i32) {
    %c0_i32 = arith.constant 0 : i32
    %c0_i32_0 = arith.constant 0 : i32
    return %arg0, %c0_i32 : i32, i32
  }
  func.func @transform_3(%arg0: i32) -> (i32, i32) {
    %c0_i32 = arith.constant 0 : i32
    %c0_i32_0 = arith.constant 0 : i32
    return %arg0, %c0_i32 : i32, i32
  }
  func.func @transform_4(%arg0: i32) -> (i32, i32) {
    %c0_i32 = arith.constant 0 : i32
    %c0_i32_0 = arith.constant 0 : i32
    return %arg0, %c0_i32 : i32, i32
  }
}

</mosaic_0001>

<bundles_post_ra>
// kernel: tpu_custom_call.1
= control target key start
LH: loop header
LB: loop body
LE: loop exit
PB: predicated region body
PF: predicated region fallthrough
CT: control target
= control target key end

     0   :  { %9 = vsyncpa [#allocation3], 0  ;;  %s8444_s0 = inlined_call_operand.hbm [shape: f32[384,384], index: 0, kind: input, shape index: {}]   ;;  %s8445_s1 = inlined_call_operand.hbm [shape: f32[1,384], index: 1, kind: input, shape index: {}]   ;;  %s8446_s2 = inlined_call_operand.hbm [shape: f32[32,384], index: 2, kind: input, shape index: {}]   ;;  %s8447_s3 = inlined_call_operand.hbm [shape: f32[32,384], index: 3, kind: input, shape index: {}]   ;;  %s8448_s4 = inlined_call_operand.hbm [shape: f32[32,384], index: 4, kind: output, shape index: {}]  }
   0x1   :  { %10 = vsyncpa [#allocation6], 0 }
   0x2   :  { %11 = vsyncpa [#allocation4], 0 }
   0x3   :  { %13 = vsyncpa [#allocation4 + $0x1], 0  ;;  %s5318_s15 = smov 0   ;;  %s5320_s16 = smov 0  }
   0x4   :  { %s5322_s17 = smov 0   ;;  %s5324_s18 = smov 0  }
   0x5 LB: > { %s5339_s19 = sadd.s32 4294967295, %s5281_s18   ;;  %s4453_s20 = sadd.s32 4294967294, %s5281_s18   ;;  %s5281_s18 = sphi %s5324_s18, %s9467_s18   ;;  %s5277_s17 = sphi %s5322_s17, %s9466_s17   ;;  %s5273_s16 = sphi %s5320_s16, %s9465_s16   ;;  %s5269_s15 = sphi %s5318_s15, %s9464_s15  }
   0x6   : > { %s5343_s21 = sadd.s32 1, %s5281_s18   ;;  %s68_s22 = sadd.s32 1, %s5277_s17 }
   0x7   : > { %s65_s23 = ssub.s32 %s5281_s18, %s5343_s21  ;;  %p75_p0 = scmp.ne.s32.totalorder %s5277_s17, %s5273_s16 }
   0x8   : > { %p66_p1 = scmp.eq.s32.totalorder %s65_s23, 0  ;;  %p76_p2 = scmp.eq.s32.totalorder %s5281_s18, 0 }
   0x9   : > { %p81_p3 = scmp.ne.s32.totalorder %s5273_s16, %s5269_s15  ;;  %p8454_p4 = scmp.eq.s32.totalorder %s5339_s19, 0 }
   0xa   : > { %s5355_s24 = scalar_select %p66_p1, %s5277_s17, %s68_s22  }
   0xb   : > { %p5357_p5 = por %p76_p2, %p75_p0  ;;  %p5363_p6 = por %p8454_p4, %p81_p3 }
   0xc   : > { %8823 = sst [smem:[#allocation14_spill]] %s5355_s24  ;;  %p131_p7 = scmp.eq.s32.totalorder %s5339_s19, 1 }
   0xd   : > { %s8825_s26 = scalar_select %p5363_p6, 1, 0 }
   0xe   : > { %p137_p8 = scmp.eq.s32.totalorder %s4453_s20, 1  ;;  %p4454_p9 = scmp.ge.s32.totalorder %s5281_s18, 1 }
   0xf   : > { %p144_p10 = scmp.lt.s32.totalorder %s5281_s18, 3  ;;  %p5370_p11 = por %p131_p7, %p75_p0 }
  0x10   : > { %p5374_p12 = por %p137_p8, %p81_p3  ;;  %s5283_s30 = smov [#allocation2]  }
  0x11   : > { %s8826_s27 = scalar_select %p5370_p11, 1, 0 }
  0x12   : > { %s8827_s28 = scalar_select %p5374_p12, 1, 0 }
  0x13   : > { %p5378_p13 = pnand %p4454_p9, %p144_p10  ;;  %s156_s5 = sshll.u32 %s5283_s30, 4  ;;  %s157_s5 = int_to_ptr.vmem [resolvable:$true] %s156_s5 }
  0x14   : > { %p5058_p3 = scmp.lt.s32.totalorder %s5281_s18, 2  ;;  %s181_s7 = sand.u32 1, %s5281_s18  }
  0x15   : > { %s8828_s29 = scalar_select %p5378_p13, 1, 0 }
  0x16   : > { %p5038_p1 = pneg %p5378_p13  ;;  %s5112_s8 = scalar_lea.vmem %s157_s5, 18432 }
  0x17   : > { %p5113_p8 = scmp.ne.s32.totalorder %s157_s5, %s5112_s8  ;;  %p5120_p12 = scmp.lt.s32.totalorder %s157_s5, %s157_s5 }
  0x18   : > { %p5386_p2 = pnand %p5038_p1, %p8454_p4  ;;  %p5121_p11 = scmp.lt.s32.totalorder %s5112_s8, %s5112_s8 }
  0x1a   : > { %p8455_p7 = pneg %p5386_p2  ;;  %p5122_p6 = por %p5121_p11, %p5120_p12 }
  0x1c   : > { %p5115_p9 = pnand %p5113_p8, %p8455_p7 }
  0x1e   : > { %p5116_p10 = pneg %p5115_p9 }
  0x20   : > { %p5123_p1 = pnand %p5122_p6, %p5116_p10 }
  0x22   : > { %5126 = shalt.err (!%p5123_p1)
}
  0x23   : > { %s8452_s9 = smov 384   ;;  %s5285_s10 = smov 24  }
  0x24   : > { %5041 = dma.hbm_to_vmem [thread:$0]  (!%p5386_p2), %s8444_s0, 18432, %s157_s5, [#allocation3], %s8452_s9, %s8452_s9, %s5285_s10  }
  0x25   : > { %p5410_p6 = pnand %p5058_p3, %p5357_p5  ;;  %s183_s14 = sand.u32 1, %s5277_s17  }
  0x26   : > { %s5415_s20 = smul.u32 48, %s183_s14  ;;  %s5286_s23 = smov [#allocation5]  }
  0x27   : > { %s8451_s22 = smul.u32 768, %s5281_s18  ;;  %s170_s30 = sshll.u32 %s5286_s23, 4  ;;  %s5428_s30 = int_to_ptr.vmem [resolvable:$true] %s170_s30 }
  0x28   : > { %s185_s25 = scalar_lea.vmem [#allocation7], %s5415_s20  ;;  %s5430_s12 = scalar_lea.sflag [#allocation3], %s181_s7 }
  0x29   : > { %s5423_s5 = scalar_lea.hbm %s8446_s2, %s8451_s22  ;;  %s193_s11 = sshll.u32 %s185_s25, 4  ;;  %s5426_s11 = int_to_ptr.vmem [resolvable:$true] %s193_s11 }
  0x2a   : > { %s5127_s14 = scalar_lea.hbm %s5423_s5, 768  ;;  %p5129_p11 = pneg %p5410_p6 }
  0x2b   : > { %p5128_p5 = scmp.ne.s32.totalorder %s5423_s5, %s5127_s14  ;;  %s5132_s8 = scalar_lea.hbm %s8446_s2, 1536 }
  0x2c   : > { %p5133_p8 = scmp.lt.s32.totalorder %s5423_s5, %s8446_s2  ;;  %p5134_p9 = scmp.lt.s32.totalorder %s5132_s8, %s5127_s14 }
  0x2d   : > { %p5130_p12 = pnand %p5129_p11, %p5128_p5 }
  0x2e   : > { %p5135_p10 = por %p5134_p9, %p5133_p8 }
  0x2f   : > { %p5131_p3 = pneg %p5130_p12 }
  0x31   : > { %p5136_p1 = pnand %p5135_p10, %p5131_p3 }
  0x33   : > { %5139 = shalt.err (!%p5136_p1)
}
  0x34   : > { %s5140_s7 = scalar_lea.vmem %s5426_s11, 768  ;;  %s5287_s24 = smov [#allocation7]  }
  0x35   : > { %p5141_p0 = scmp.ne.s32.totalorder %s5426_s11, %s5140_s7  ;;  %s5145_s23 = sshll.u32 %s5287_s24, 4  ;;  %s5146_s23 = int_to_ptr.vmem [resolvable:$false] %s5145_s23 }
  0x36   : > { %s5147_s9 = scalar_lea.vmem %s5146_s23, 1536  ;;  %p5148_p4 = scmp.lt.s32.totalorder %s5426_s11, %s5146_s23 }
  0x37   : > { %p5143_p5 = pnand %p5141_p0, %p5129_p11  ;;  %p5149_p7 = scmp.lt.s32.totalorder %s5147_s9, %s5140_s7 }
  0x39   : > { %p5144_p12 = pneg %p5143_p5  ;;  %p5150_p13 = por %p5149_p7, %p5148_p4 }
  0x3b   : > { %p5151_p8 = pnand %p5150_p13, %p5144_p12 }
  0x3d   : > { %5154 = shalt.err (!%p5151_p8)
}
  0x3e   : > { %s8831_s22 = smov 384   ;;  %s5166_s14 = scalar_lea.vmem %s5428_s30, 48 }
  0x3f   : > { %5048 = dma.hbm_to_vmem [thread:$0]  (!%p5410_p6), %s5423_s5, 768, %s5426_s11, %s5430_s12, %s8831_s22, %s8831_s22, %s5285_s10  }
  0x40   : > { %p5167_p0 = scmp.ne.s32.totalorder %s5428_s30, %s5166_s14  ;;  %p8832_p4 = pneg %p5386_p2 }
  0x41   : > { %s5173_s9 = scalar_lea.vmem %s5428_s30, 64  ;;  %p5174_p3 = scmp.lt.s32.totalorder %s5428_s30, %s5428_s30 }
  0x42   : > { %p5169_p13 = pnand %p5167_p0, %p8832_p4  ;;  %p5175_p9 = scmp.lt.s32.totalorder %s5173_s9, %s5166_s14 }
  0x44   : > { %p5170_p7 = pneg %p5169_p13  ;;  %p5176_p10 = por %p5175_p9, %p5174_p3 }
  0x46   : > { %p5177_p1 = pnand %p5176_p10, %p5170_p7 }
  0x48   : > { %5180 = shalt.err (!%p5177_p1)
}
  0x49   : > { %5044 = dma.hbm_to_vmem [thread:$0]  (!%p5386_p2), %s8445_s1, 48, %s5428_s30, [#allocation6]  }
  0x4a   : > { %s8833_s5 = smul.u32 768, %s5281_s18  ;;  %s207_s23 = scalar_lea.vmem [#allocation8], %s5415_s20 }
  0x4b   : > { %s215_s14 = sshll.u32 %s207_s23, 4  ;;  %s5186_s8 = scalar_lea.hbm %s8447_s3, 1536  ;;  %s216_s14 = int_to_ptr.vmem [resolvable:$true] %s215_s14 }
  0x4c   : > { %s5479_s24 = scalar_lea.hbm %s8447_s3, %s8833_s5 }
  0x4d   : > { %s5181_s6 = scalar_lea.hbm %s5479_s24, 768  ;;  %p5187_p2 = scmp.lt.s32.totalorder %s5479_s24, %s8447_s3 }
  0x4e   : > { %p5182_p5 = scmp.ne.s32.totalorder %s5479_s24, %s5181_s6  ;;  %p5188_p0 = scmp.lt.s32.totalorder %s5186_s8, %s5181_s6 }
  0x50   : > { %p5184_p12 = pnand %p5182_p5, %p5129_p11  ;;  %p5189_p4 = por %p5188_p0, %p5187_p2 }
  0x52   : > { %p5185_p8 = pneg %p5184_p12 }
  0x54   : > { %p5190_p13 = pnand %p5189_p4, %p5185_p8 }
  0x56   : > { %5193 = shalt.err (!%p5190_p13)
}
  0x57   : > { %s5194_s20 = scalar_lea.vmem %s216_s14, 768  ;;  %s5288_s5 = smov [#allocation8]  }
  0x58   : > { %p5195_p7 = scmp.ne.s32.totalorder %s216_s14, %s5194_s20  ;;  %s5199_s7 = sshll.u32 %s5288_s5, 4  ;;  %s5200_s7 = int_to_ptr.vmem [resolvable:$false] %s5199_s7 }
  0x59   : > { %s5201_s23 = scalar_lea.vmem %s5200_s7, 1536  ;;  %p5202_p10 = scmp.lt.s32.totalorder %s216_s14, %s5200_s7 }
  0x5a   : > { %p5197_p3 = pnand %p5195_p7, %p5129_p11  ;;  %p5203_p1 = scmp.lt.s32.totalorder %s5201_s23, %s5194_s20 }
  0x5c   : > { %p5198_p9 = pneg %p5197_p3  ;;  %p5204_p5 = por %p5203_p1, %p5202_p10 }
  0x5e   : > { %p5205_p12 = pnand %p5204_p5, %p5198_p9 }
  0x60   : > { %5208 = shalt.err (!%p5205_p12)
}
  0x61   : > { %5051 = dma.hbm_to_vmem [thread:$0]  (!%p5410_p6), %s5479_s24, 768, %s216_s14, %s5430_s12, %s8831_s22, %s8831_s22, %s5285_s10  }
  0x62   : > { %p8834_p11 = scmp.ne.s32.totalorder %s8828_s29, 0 }
  0x64   : > { %227 = sbr.rel (%p8834_p11) target bundleno = 884 (0x374), region = 36 }
  0x69   : > { %p8835_p8 = scmp.eq.s32.totalorder %s5339_s19, 0 }
  0x6b   : > { %5252 = dma.done.wait (%p8835_p8), [#allocation3], 18432   ;;  %p8836_p2 = pmov %p8835_p8 }
  0x6d   : > { %5254 = vsyncadd (%p8836_p2), [#allocation3], 4294948864  ;;  %p8837_p0 = pmov %p8836_p2 }
  0x6f   : > { %5256 = dma.done.wait (%p8837_p0), [#allocation6], 48   ;;  %p8838_p4 = pmov %p8837_p0 }
  0x70   : > { %s237_s10 = sand.u32 1, %s5339_s19   ;;  %s239_s13 = sand.u32 1, %s5273_s16  }
  0x71   : > { %5258 = vsyncadd (%p8838_p4), [#allocation6], 4294967248  ;;  %s5518_s29 = smul.u32 48, %s239_s13  ;;  %s238_s12 = scalar_lea.sflag [#allocation3], %s237_s10 }
  0x72   : > { %p8839_p6 = scmp.ne.s32.totalorder %s8825_s26, 0 }
  0x73   : > { %s5521_s22 = scalar_lea.vmem [#allocation7], %s5518_s29 }
  0x74   : > { %5260 = dma.done.wait (%p8839_p6), %s238_s12, 1536  }
  0x75   : > { %5262 = vsyncadd (%p8839_p6), %s238_s12, 4294965760  ;;  %v335_v0 = vld [vmem:[#allocation2 + $0x170] sm:$0xff]  ;;  %v334_v1 = vld [vmem:[#allocation2 + $0x168] sm:$0xff]  ;;  %s8344_s26 = scalar_lea.vmem [#allocation8], %s5518_s29  ;;  %s8364_s24 = scalar_lea.vmem [#allocation9], %s5518_s29 }
  0x76   : > { %v332_v2 = vld [vmem:[#allocation2 + $0x158] sm:$0xff]  ;;  %v5527_v3 = vand.u32 4294901760, %v335_v0  ;;  %v5529_v4 = vand.u32 4294901760, %v334_v1  ;;  %v331_v6 = vld [vmem:[#allocation2 + $0x150] sm:$0xff]  ;;  %v329_v7 = vld [vmem:[#allocation2 + $0x140] sm:$0xff]  ;;  %s4341_s14 = sshll.u32 %s8364_s24, 4  ;;  %s8392_s14 = int_to_ptr.vmem [resolvable:$true] %s4341_s14 }
  0x77   : > { %v5531_v5 = vand.u32 4294901760, %v332_v2  ;;  %v328_v8 = vld [vmem:[#allocation2 + $0x138] sm:$0xff]  ;;  %v5533_v9 = vand.u32 4294901760, %v331_v6  ;;  %v5535_v10 = vand.u32 4294901760, %v329_v7  ;;  %v326_v12 = vld [vmem:[#allocation2 + $0x128] sm:$0xff]  ;;  %v325_v13 = vld [vmem:[#allocation2 + $0x120] sm:$0xff] }
  0x78   : > { %v5537_v11 = vand.u32 4294901760, %v328_v8  ;;  %v323_v14 = vld [vmem:[#allocation2 + $0x110] sm:$0xff]  ;;  %451 = vmatprep.subr.mxu0 %v5527_v3  ;;  %v5540_v15 = vand.u32 4294901760, %v326_v12  ;;  %v5542_v16 = vand.u32 4294901760, %v325_v13  ;;  %v5547_v18 = vsub.f32 %v335_v0, %v5527_v3  ;;  %v5549_v19 = vld [vmem:[#allocation2 + $0x108] sm:$0xff]  ;;  %v5551_v20 = vld [vmem:[#allocation2 + $0xf8] sm:$0xff] }
  0x79   : > { %v5544_v17 = vand.u32 4294901760, %v323_v14  ;;  %v5553_v21 = vld [vmem:[#allocation2 + $0xf0] sm:$0xff]  ;;  %453 = vmatpush1.msra.mxu0 %v5529_v4  ;;  %v5557_v22 = vand.u32 4294901760, %v5549_v19  ;;  %v5560_v23 = vsub.f32 %v334_v1, %v5529_v4  ;;  %v5563_v24 = vand.u32 4294901760, %v5551_v20  ;;  %v5568_v26 = vld [vmem:[#allocation2 + $0xe0] sm:$0xff]  ;;  %v5570_v27 = vld [vmem:[#allocation2 + $0xd8] sm:$0xff] }
  0x7a   : > { %v5566_v25 = vsub.f32 %v332_v2, %v5531_v5  ;;  %v5572_v28 = vld [vmem:[#allocation2 + $0xc8] sm:$0xff]  ;;  %455 = vmatprep.subr.mxu0 %v5531_v5  ;;  %v8470_v29 = vand.u32 4294901760, %v5547_v18  ;;  %v5577_v30 = vand.u32 4294901760, %v5553_v21  ;;  %v5580_v31 = vsub.f32 %v331_v6, %v5533_v9  ;;  %v5594_v37 = vld [vmem:[#allocation2 + $0xc0] sm:$0xff]  ;;  %v5618_v46 = vld [vmem:[#allocation2 + $0xb0] sm:$0xff]  ;;  %s5023_s6 = smul.u32 768, %s5339_s19 }
  0x7b   : > { %8840 = vst [vmem:[#allocation15_spill] sm:$0xff] %v5563_v24  ;;  %v5583_v32 = vand.u32 4294901760, %v5568_v26  ;;  %457 = vmatpush1.msra.mxu0 %v5533_v9  ;;  %v8468_v33 = vand.u32 4294901760, %v5560_v23  ;;  %v5589_v35 = vsub.f32 %v329_v7, %v5535_v10  ;;  %v5592_v36 = vand.u32 4294901760, %v5570_v27  ;;  %v5628_v51 = vld [vmem:[#allocation2 + $0xa8] sm:$0xff]  ;;  %v5635_v56 = vld [vmem:[#allocation2 + $0x98] sm:$0xff] }
  0x7c   : > { %8841 = vst [vmem:[#allocation16_spill] sm:$0xff] %v5577_v30  ;;  %v8467_v34 = vand.u32 4294901760, %v5566_v25  ;;  %459 = vmatprep.subr.mxu0 %v5535_v10  ;;  %v614_v38 = vsub.f32 %v5547_v18, %v8470_v29  ;;  %v8465_v39 = vand.u32 4294901760, %v5580_v31  ;;  %v5602_v40 = vsub.f32 %v328_v8, %v5537_v11  ;;  %v5647_v61 = vld [vmem:[#allocation2 + $0x90] sm:$0xff]  ;;  %v5659_v2 = vld [vmem:[#allocation2 + $0x80] sm:$0xff]  ;;  %s8397_s8 = scalar_lea.hbm %s8448_s4, %s5023_s6  ;;  %s8403_s25 = scalar_lea.sflag [#allocation4], %s239_s13 }
  0x7d   : > { %8842 = vst [vmem:[#allocation17_spill] sm:$0xff] %v5583_v32  ;;  %8843 = vst [vmem:[#allocation18_spill] sm:$0xff] %v5592_v36  ;;  %v5605_v41 = vand.u32 4294901760, %v5572_v28  ;;  %461 = vmatpush1.msra.mxu0 %v5537_v11  ;;  %v620_v42 = vsub.f32 %v5560_v23, %v8468_v33  ;;  %v8463_v44 = vand.u32 4294901760, %v5589_v35  ;;  %v5616_v45 = vsub.f32 %v326_v12, %v5540_v15  ;;  %s5209_s19 = scalar_lea.vmem %s8392_s14, 768  ;;  %p9460_p7 = scmp.ne.s32.totalorder %s8826_s27, 0 }
  0x7e   : > { %v626_v43 = vsub.f32 %v5566_v25, %v8467_v34  ;;  %463 = vmatprep.subr.mxu0 %v5540_v15  ;;  %v615_v47 = vand.u32 4294901760, %v614_v38  ;;  %v632_v48 = vsub.f32 %v5580_v31, %v8465_v39  ;;  %v8462_v49 = vand.u32 4294901760, %v5602_v40  ;;  %v5750_v39 = vld [vmem:[#allocation2 + $0x38] sm:$0xff]  ;;  %v5760_v34 = vld [vmem:[#allocation2 + $0x30] sm:$0xff]  ;;  %p5210_p13 = scmp.ne.s32.totalorder %s8392_s14, %s5209_s19  ;;  %s5290_s11 = smov [#allocation9]  }
  0x7f   : > { %8844 = vst [vmem:[#allocation19_spill] sm:$0xff] %v5605_v41  ;;  %v5626_v50 = vand.u32 4294901760, %v5594_v37  ;;  %465 = vmatpush1.msra.mxu0 %v5542_v16  ;;  %v621_v52 = vand.u32 4294901760, %v620_v42  ;;  %v638_v54 = vsub.f32 %v5589_v35, %v8463_v44  ;;  %v8460_v55 = vand.u32 4294901760, %v5616_v45  ;;  %s5213_s20 = sshll.u32 %s5290_s11, 4  ;;  %s5214_s20 = int_to_ptr.vmem [resolvable:$false] %s5213_s20 }
  0x80   : > { %v627_v53 = vand.u32 4294901760, %v626_v43  ;;  %467 = vmatprep.subr.mxu0 %v5544_v17  ;;  %616 = vmatprep.subr.mxu1 %v615_v47  ;;  %v633_v57 = vand.u32 4294901760, %v632_v48  ;;  %v644_v58 = vsub.f32 %v5602_v40, %v8462_v49  ;;  %v5642_v59 = vsub.f32 %v325_v13, %v5542_v16  ;;  %v5670_v13 = vld [vmem:[#allocation2 + $0x78] sm:$0xff]  ;;  %v5737_v49 = vld [vmem:[#allocation2 + $0x48] sm:$0xff]  ;;  %p5211_p3 = pnand %p5210_p13, %p9460_p7  ;;  %s5215_s5 = scalar_lea.vmem %s5214_s20, 1536 }
  0x81   : > { %8845 = vst [vmem:[#allocation20_spill] sm:$0xff] %v5626_v50  ;;  %v5645_v60 = vand.u32 4294901760, %v5618_v46  ;;  %469 = vmatpush1.msra.mxu0 %v5557_v22  ;;  %622 = vmatpush1.msra.mxu1 %v621_v52  ;;  %v639_v62 = vand.u32 4294901760, %v638_v54  ;;  %v650_v63 = vsub.f32 %v5616_v45, %v8460_v55  ;;  %v5654_v0 = vsub.f32 %v323_v14, %v5544_v17  ;;  %p5216_p10 = scmp.lt.s32.totalorder %s8392_s14, %s5214_s20  ;;  %p5217_p1 = scmp.lt.s32.totalorder %s5215_s5, %s5209_s19 }
  0x82   : > { %v5657_v1 = vand.u32 4294901760, %v5628_v51  ;;  %471 = vmatprep.subr.mxu0 %v5563_v24  ;;  %628 = vmatprep.subr.mxu1 %v627_v53  ;;  %v645_v6 = vand.u32 4294901760, %v644_v58  ;;  %v8458_v7 = vand.u32 4294901760, %v5642_v59  ;;  %v5665_v8 = vsub.f32 %v5549_v19, %v5557_v22  ;;  %p5212_p9 = pneg %p5211_p3 }
  0x83   : > { %8846 = vst [vmem:[#allocation21_spill] sm:$0xff] %v5645_v60  ;;  %v5668_v12 = vand.u32 4294901760, %v5635_v56  ;;  %473 = vmatpush1.msra.mxu0 %v5577_v30  ;;  %634 = vmatpush1.msra.mxu1 %v633_v57  ;;  %v651_v14 = vand.u32 4294901760, %v650_v63  ;;  %v8457_v38 = vand.u32 4294901760, %v5654_v0  ;;  %v5676_v42 = vsub.f32 %v5551_v20, %v5563_v24  ;;  %v5693_v20 = vld [vmem:[#allocation2 + $0x68] sm:$0xff]  ;;  %p5218_p5 = por %p5217_p1, %p5216_p10 }
  0x84   : > { %8847 = vst [vmem:[#allocation22_spill] sm:$0xff] %v5657_v1  ;;  %v5679_v43 = vand.u32 4294901760, %v5647_v61  ;;  %475 = vmatprep.subr.mxu0 %v5583_v32  ;;  %640 = vmatprep.subr.mxu1 %v639_v62  ;;  %v656_v19 = vsub.f32 %v5642_v59, %v8458_v7  ;;  %v8459_v47 = vand.u32 4294901760, %v5665_v8  ;;  %v5688_v48 = vsub.f32 %v5553_v21, %v5577_v30 }
  0x85   : > { %8848 = vst [vmem:[#allocation23_spill] sm:$0xff] %v5668_v12  ;;  %v5691_v52 = vand.u32 4294901760, %v5659_v2  ;;  %477 = vmatpush1.msra.mxu0 %v5592_v36  ;;  %646 = vmatpush1.msra.mxu1 %v645_v6  ;;  %v662_v53 = vsub.f32 %v5654_v0, %v8457_v38  ;;  %v8461_v54 = vand.u32 4294901760, %v5676_v42  ;;  %v5702_v57 = vsub.f32 %v5568_v26, %v5583_v32  ;;  %v5716_v38 = vld [vmem:[#allocation2 + $0x60] sm:$0xff]  ;;  %p5219_p12 = pnand %p5218_p5, %p5212_p9 }
  0x86   : > { %8849 = vst [vmem:[#allocation24_spill] sm:$0xff] %v5679_v43  ;;  %v5705_v21 = vand.u32 4294901760, %v5670_v13  ;;  %479 = vmatprep.subr.mxu0 %v5605_v41  ;;  %652 = vmatprep.subr.mxu1 %v651_v14  ;;  %v657_v58 = vand.u32 4294901760, %v656_v19  ;;  %v668_v62 = vsub.f32 %v5665_v8, %v8459_v47  ;;  %v8464_v63 = vand.u32 4294901760, %v5688_v48  ;;  %v5726_v47 = vld [vmem:[#allocation2 + $0x50] sm:$0xff] }
  0x87   : > { %8850 = vst [vmem:[#allocation25_spill] sm:$0xff] %v5691_v52  ;;  %v5714_v6 = vsub.f32 %v5570_v27, %v5592_v36  ;;  %481 = vmatpush1.msra.mxu0 %v5626_v50  ;;  %v663_v26 = vand.u32 4294901760, %v662_v53  ;;  %v674_v14 = vsub.f32 %v5676_v42, %v8461_v54  ;;  %v8466_v19 = vand.u32 4294901760, %v5702_v57  ;;  %v5840_v36 = vld [vmem:[#allocation2 + $0x2f0] sm:$0xff] }
  0x88   : > { %8851 = vst [vmem:[#allocation26_spill] sm:$0xff] %v5705_v21  ;;  %v5724_v7 = vand.u32 4294901760, %v5693_v20  ;;  %658 = vmatpush1.msra.mxu1 %v657_v58  ;;  %483 = vmatprep.subr.mxu0 %v5645_v60  ;;  %v669_v27 = vand.u32 4294901760, %v668_v62  ;;  %v680_v55 = vsub.f32 %v5688_v48, %v8464_v63  ;;  %v5735_v54 = vsub.f32 %v5572_v28, %v5605_v41 }
  0x89   : > { %v8469_v53 = vand.u32 4294901760, %v5714_v6  ;;  %664 = vmatprep.subr.mxu1 %v663_v26  ;;  %485 = vmatpush1.msra.mxu0 %v5657_v1  ;;  %v675_v44 = vand.u32 4294901760, %v674_v14  ;;  %v686_v58 = vsub.f32 %v5702_v57, %v8466_v19  ;;  %v5744_v62 = vand.u32 4294901760, %v5716_v38 }
  0x8a   : > { %8852 = vst [vmem:[#allocation27_spill] sm:$0xff] %v5724_v7  ;;  %v5748_v63 = vsub.f32 %v5594_v37, %v5626_v50  ;;  %670 = vmatpush1.msra.mxu1 %v669_v27  ;;  %487 = vmatprep.subr.mxu0 %v5668_v12  ;;  %v681_v28 = vand.u32 4294901760, %v680_v55  ;;  %v8473_v14 = vand.u32 4294901760, %v5735_v54  ;;  %v5758_v19 = vand.u32 4294901760, %v5726_v47 }
  0x8b   : > { %8853 = vst [vmem:[#allocation28_spill] sm:$0xff] %v5744_v62  ;;  %v692_v26 = vsub.f32 %v5714_v6, %v8469_v53  ;;  %676 = vmatprep.subr.mxu1 %v675_v44  ;;  %489 = vmatpush1.msra.mxu0 %v5679_v43  ;;  %v687_v37 = vand.u32 4294901760, %v686_v58  ;;  %v5766_v55 = vsub.f32 %v5618_v46, %v5645_v60  ;;  %v5769_v33 = vand.u32 4294901760, %v5737_v49  ;;  %v5771_v53 = vld [vmem:[#allocation2 + $0x20] sm:$0xff] }
  0x8c   : > { %8854 = vst [vmem:[#allocation29_spill] sm:$0xff] %v5758_v19  ;;  %v8476_v27 = vand.u32 4294901760, %v5748_v63  ;;  %682 = vmatpush1.msra.mxu1 %v681_v28  ;;  %491 = vmatprep.subr.mxu0 %v5691_v52  ;;  %v698_v44 = vsub.f32 %v5735_v54, %v8473_v14  ;;  %v5779_v58 = vsub.f32 %v5628_v51, %v5657_v1  ;;  %v5782_v46 = vand.u32 4294901760, %v5750_v39  ;;  %v5796_v51 = vld [vmem:[#allocation2 + $0x18] sm:$0xff] }
  0x8d   : > { %8855 = vst [vmem:[#allocation30_spill] sm:$0xff] %v5769_v33  ;;  %v693_v29 = vand.u32 4294901760, %v692_v26  ;;  %688 = vmatprep.subr.mxu1 %v687_v37  ;;  %493 = vmatpush1.msra.mxu0 %v5705_v21  ;;  %v5791_v60 = vsub.f32 %v5635_v56, %v5668_v12  ;;  %v5794_v14 = vand.u32 4294901760, %v5760_v34  ;;  %v5805_v26 = vand.u32 4294901760, %v5771_v53  ;;  %v5807_v56 = vld [vmem:[#allocation2 + $0x8] sm:$0xff] }
  0x8e   : > { %8856 = vst [vmem:[#allocation31_spill] sm:$0xff] %v5782_v46  ;;  %v704_v28 = vsub.f32 %v5748_v63, %v8476_v27  ;;  %495 = vmatprep.subr.mxu0 %v5724_v7  ;;  %v699_v37 = vand.u32 4294901760, %v698_v44  ;;  %v5802_v27 = vsub.f32 %v5647_v61, %v5679_v43  ;;  %v8860_v50 = vand.u32 4294901760, %v5766_v55  ;;  %v5830_v44 = vld [vmem:[#allocation2] sm:$0xff] }
  0x8f   : > { %8857 = vst [vmem:[#allocation32_spill] sm:$0xff] %v5794_v14  ;;  %694 = vmatpush1.msra.mxu1 %v693_v29  ;;  %8859 = vst [vmem:[#allocation34_spill] sm:$0xff] %v5805_v26  ;;  %497 = vmatpush1.msra.mxu0 %v5744_v62  ;;  %v5816_v1 = vsub.f32 %v5659_v2, %v5691_v52  ;;  %v8862_v61 = vand.u32 4294901760, %v5779_v58  ;;  %v5838_v41 = vand.u32 4294901760, %v5807_v56  ;;  %v5858_v24 = vand.u32 4294901760, %v5830_v44 }
  0x90   : > { %8858 = vst [vmem:[#allocation33_spill] sm:$0xff] %v5802_v27  ;;  %v705_v12 = vand.u32 4294901760, %v704_v28  ;;  %v710_v29 = vsub.f32 %v5766_v55, %v8860_v50  ;;  %700 = vmatprep.subr.mxu1 %v699_v37  ;;  %499 = vmatprep.subr.mxu0 %v5758_v19  ;;  %v5824_v28 = vand.u32 4294901760, %v5796_v51  ;;  %v5828_v50 = vsub.f32 %v5670_v13, %v5705_v21 }
  0x91   : > { %8861 = vst [vmem:[#allocation35_spill] sm:$0xff] %v5816_v1  ;;  %v716_v43 = vsub.f32 %v5779_v58, %v8862_v61  ;;  %501 = vmatpush1.msra.mxu0 %v5769_v33  ;;  %v8865_v37 = vand.u32 4294901760, %v5791_v60  ;;  %8866 = vst [vmem:[#allocation38_spill] sm:$0xff] %v5838_v41  ;;  %v8867_v13 = vand.u32 4294901760, %v5802_v27  ;;  %v5849_v21 = vsub.f32 %v5693_v20, %v5724_v7 }
  0x92   : > { %8863 = vst [vmem:[#allocation36_spill] sm:$0xff] %v5824_v28  ;;  %8864 = vst [vmem:[#allocation37_spill] sm:$0xff] %v5828_v50  ;;  %706 = vmatpush1.msra.mxu1 %v705_v12  ;;  %v711_v2 = vand.u32 4294901760, %v710_v29  ;;  %503 = vmatprep.subr.mxu0 %v5782_v46  ;;  %v5864_v29 = vld [vmem:[#allocation2 + $0x2d8] sm:$0xff] }
  0x93   : > { %v722_v52 = vsub.f32 %v5791_v60, %v8865_v37  ;;  %v717_v32 = vand.u32 4294901760, %v716_v43  ;;  %v728_v12 = vsub.f32 %v5802_v27, %v8867_v13  ;;  %8868 = vst [vmem:[#allocation39_spill] sm:$0xff] %v5849_v21  ;;  %v5851_v37 = vld [vmem:[#allocation2 + $0x2e8] sm:$0xff]  ;;  %505 = vmatpush1.msra.mxu0 %v5794_v14  ;;  %v8869_v43 = vand.u32 4294901760, %v5816_v1  ;;  %8870 = vst [vmem:[#allocation40_spill] sm:$0xff] %v5858_v24 }
  0x94   : > { %712 = vmatprep.subr.mxu1 %v711_v2  ;;  %v5862_v13 = vsub.f32 %v5716_v38, %v5744_v62  ;;  %507 = vmatprep.subr.mxu0 %v5805_v26  ;;  %v5883_v62 = vand.u32 4294901760, %v5851_v37 }
  0x95   : > { %v723_v61 = vand.u32 4294901760, %v722_v52  ;;  %v734_v30 = vsub.f32 %v5816_v1, %v8869_v43  ;;  %718 = vmatpush1.msra.mxu1 %v717_v32  ;;  %v729_v20 = vand.u32 4294901760, %v728_v12  ;;  %v8872_v52 = vand.u32 4294901760, %v5828_v50  ;;  %v5874_v1 = vld [vmem:[#allocation2 + $0x2d0] sm:$0xff]  ;;  %509 = vmatpush1.msra.mxu0 %v5824_v28 }
  0x96   : > { %8871 = vst [vmem:[#allocation41_spill] sm:$0xff] %v5862_v13  ;;  %v5872_v43 = vand.u32 4294901760, %v5840_v36  ;;  %v5880_v12 = vsub.f32 %v5726_v47, %v5758_v19  ;;  %8875 = vst [vmem:[#allocation44_spill] sm:$0xff] %v5883_v62  ;;  %511 = vmatprep.subr.mxu0 %v5838_v41  ;;  %v5893_v32 = vsub.f32 %v5737_v49, %v5769_v33  ;;  %v5896_v47 = vand.u32 4294901760, %v5864_v29  ;;  %v5910_v49 = vld [vmem:[#allocation2 + $0x2b8] sm:$0xff] }
  0x97   : > { %v740_v2 = vsub.f32 %v5828_v50, %v8872_v52  ;;  %724 = vmatprep.subr.mxu1 %v723_v61  ;;  %v735_v38 = vand.u32 4294901760, %v734_v30  ;;  %v5885_v52 = vld [vmem:[#allocation2 + $0x2c0] sm:$0xff]  ;;  %v8876_v61 = vand.u32 4294901760, %v5849_v21  ;;  %513 = vmatpush1.msra.mxu0 %v5858_v24  ;;  %v8879_v19 = vand.u32 4294901760, %v5862_v13 }
  0x98   : > { %8873 = vst [vmem:[#allocation42_spill] sm:$0xff] %v5872_v43  ;;  %8874 = vst [vmem:[#allocation43_spill] sm:$0xff] %v5880_v12  ;;  %730 = vmatpush1.msra.mxu1 %v729_v20  ;;  %v5905_v50 = vsub.f32 %v5750_v39, %v5782_v46  ;;  %515 = vmatprep.subr.mxu0 %v5872_v43  ;;  %v5921_v39 = vld [vmem:[#allocation2 + $0x2a8] sm:$0xff] }
  0x99   : > { %v741_v7 = vand.u32 4294901760, %v740_v2  ;;  %v746_v30 = vsub.f32 %v5849_v21, %v8876_v61  ;;  %8877 = vst [vmem:[#allocation45_spill] sm:$0xff] %v5893_v32  ;;  %8878 = vst [vmem:[#allocation46_spill] sm:$0xff] %v5896_v47  ;;  %736 = vmatprep.subr.mxu1 %v735_v38  ;;  %v752_v20 = vsub.f32 %v5862_v13, %v8879_v19  ;;  %v5908_v61 = vand.u32 4294901760, %v5874_v1 }
  0x9a   : > { %8880 = vst [vmem:[#allocation47_spill] sm:$0xff] %v5905_v50  ;;  %v8519_v38 = vand.u32 4294901760, %v5893_v32  ;;  %v5916_v19 = vsub.f32 %v5760_v34, %v5794_v14  ;;  %v5919_v2 = vand.u32 4294901760, %v5885_v52  ;;  %v8884_v13 = vand.u32 4294901760, %v5880_v12  ;;  %517 = vmatpush2.msra.mxu0 %v5883_v62 }
  0x9b   : > { %8881 = vst [vmem:[#allocation48_spill] sm:$0xff] %v5908_v61  ;;  %742 = vmatpush1.msra.mxu1 %v741_v7  ;;  %v747_v33 = vand.u32 4294901760, %v746_v30  ;;  %v753_v46 = vand.u32 4294901760, %v752_v20  ;;  %v5930_v30 = vsub.f32 %v5771_v53, %v5805_v26  ;;  %519 = vmatprep.subr.mxu0 %v5896_v47  ;;  %v5938_v14 = vand.u32 4294901760, %v5910_v49  ;;  %v5944_v7 = vld [vmem:[#allocation2 + $0x2a0] sm:$0xff] }
  0x9c   : > { %8882 = vst [vmem:[#allocation49_spill] sm:$0xff] %v5916_v19  ;;  %8883 = vst [vmem:[#allocation50_spill] sm:$0xff] %v5919_v2  ;;  %v758_v21 = vsub.f32 %v5880_v12, %v8884_v13  ;;  %v764_v34 = vsub.f32 %v5893_v32, %v8519_v38  ;;  %v5942_v13 = vsub.f32 %v5796_v51, %v5824_v28  ;;  %521 = vmatpush2.msra.mxu0 %v5908_v61  ;;  %v5954_v32 = vld [vmem:[#allocation2 + $0x290] sm:$0xff] }
  0x9d   : > { %8885 = vst [vmem:[#allocation51_spill] sm:$0xff] %v5930_v30  ;;  %748 = vmatprep.subr.mxu1 %v747_v33  ;;  %8886 = vst [vmem:[#allocation52_spill] sm:$0xff] %v5938_v14  ;;  %v8888_v33 = vand.u32 4294901760, %v5905_v50  ;;  %v5952_v20 = vand.u32 4294901760, %v5921_v39  ;;  %v8890_v51 = vand.u32 4294901760, %v5916_v19  ;;  %523 = vmatprep.subr.mxu0 %v5919_v2 }
  0x9e   : > { %8887 = vst [vmem:[#allocation53_spill] sm:$0xff] %v5942_v13  ;;  %754 = vmatpush1.msra.mxu1 %v753_v46  ;;  %v759_v53 = vand.u32 4294901760, %v758_v21  ;;  %v765_v12 = vand.u32 4294901760, %v764_v34  ;;  %v5963_v46 = vsub.f32 %v5807_v56, %v5838_v41  ;;  %525 = vmatpush2.msra.mxu0 %v5938_v14  ;;  %v5976_v21 = vsub.f32 %v5830_v44, %v5858_v24  ;;  %v5999_v24 = vld [vmem:[#allocation2 + $0x260] sm:$0xff] }
  0x9f   : > { %v770_v26 = vsub.f32 %v5905_v50, %v8888_v33  ;;  %8889 = vst [vmem:[#allocation54_spill] sm:$0xff] %v5952_v20  ;;  %v776_v28 = vsub.f32 %v5916_v19, %v8890_v51  ;;  %v5965_v33 = vld [vmem:[#allocation2 + $0x288] sm:$0xff]  ;;  %v8892_v50 = vand.u32 4294901760, %v5930_v30  ;;  %v5972_v51 = vand.u32 4294901760, %v5944_v7  ;;  %v5978_v19 = vld [vmem:[#allocation2 + $0x278] sm:$0xff]  ;;  %527 = vmatprep.subr.mxu0 %v5952_v20 }
  0xa0   : > { %8891 = vst [vmem:[#allocation55_spill] sm:$0xff] %v5963_v46  ;;  %760 = vmatprep.subr.mxu1 %v759_v53  ;;  %8894 = vst [vmem:[#allocation57_spill] sm:$0xff] %v5976_v21  ;;  %v8895_v53 = vand.u32 4294901760, %v5942_v13  ;;  %v5986_v41 = vand.u32 4294901760, %v5954_v32 }
  0xa1   : > { %v771_v38 = vand.u32 4294901760, %v770_v26  ;;  %v782_v34 = vsub.f32 %v5930_v30, %v8892_v50  ;;  %8893 = vst [vmem:[#allocation56_spill] sm:$0xff] %v5972_v51  ;;  %766 = vmatpush1.msra.mxu1 %v765_v12  ;;  %v777_v56 = vand.u32 4294901760, %v776_v28  ;;  %v5988_v30 = vld [vmem:[#allocation2 + $0x270] sm:$0xff]  ;;  %529 = vmatpush2.msra.mxu0 %v5972_v51  ;;  %v8542_v12 = vand.u32 4294901760, %v5976_v21 }
  0xa2   : > { %v788_v26 = vsub.f32 %v5942_v13, %v8895_v53  ;;  %8896 = vst [vmem:[#allocation58_spill] sm:$0xff] %v5986_v41  ;;  %v5994_v28 = vsub.f32 %v5840_v36, %v5872_v43  ;;  %v5997_v53 = vand.u32 4294901760, %v5965_v33  ;;  %v8899_v13 = vand.u32 4294901760, %v5963_v46  ;;  %531 = vmatprep.subr.mxu0 %v5986_v41 }
  0xa3   : > { %772 = vmatprep.subr.mxu1 %v771_v38  ;;  %v783_v44 = vand.u32 4294901760, %v782_v34  ;;  %v6007_v34 = vsub.f32 %v5851_v37, %v5883_v62  ;;  %v6010_v36 = vand.u32 4294901760, %v5978_v19  ;;  %v800_v43 = vsub.f32 %v5976_v21, %v8542_v12  ;;  %v6024_v37 = vld [vmem:[#allocation2 + $0x258] sm:$0xff] }
  0xa4   : > { %8897 = vst [vmem:[#allocation59_spill] sm:$0xff] %v5994_v28  ;;  %8898 = vst [vmem:[#allocation60_spill] sm:$0xff] %v5997_v53  ;;  %778 = vmatpush1.msra.mxu1 %v777_v56  ;;  %v789_v50 = vand.u32 4294901760, %v788_v26  ;;  %v794_v38 = vsub.f32 %v5963_v46, %v8899_v13  ;;  %533 = vmatpush2.msra.mxu0 %v5997_v53  ;;  %v6019_v13 = vsub.f32 %v5864_v29, %v5896_v47  ;;  %v6035_v29 = vld [vmem:[#allocation2 + $0x248] sm:$0xff] }
  0xa5   : > { %8900 = vst [vmem:[#allocation61_spill] sm:$0xff] %v6007_v34  ;;  %8901 = vst [vmem:[#allocation62_spill] sm:$0xff] %v6010_v36  ;;  %784 = vmatprep.subr.mxu1 %v783_v44  ;;  %v6022_v26 = vand.u32 4294901760, %v5988_v30  ;;  %v8553_v44 = vand.u32 4294901760, %v6007_v34  ;;  %535 = vmatprep.subr.mxu0 %v6010_v36  ;;  %v6030_v12 = vsub.f32 %v5874_v1, %v5908_v61  ;;  %v6033_v56 = vand.u32 4294901760, %v5999_v24 }
  0xa6   : > { %8902 = vst [vmem:[#allocation63_spill] sm:$0xff] %v6019_v13  ;;  %790 = vmatpush1.msra.mxu1 %v789_v50  ;;  %v795_v62 = vand.u32 4294901760, %v794_v38  ;;  %v801_v47 = vand.u32 4294901760, %v800_v43  ;;  %v8906_v21 = vand.u32 4294901760, %v5994_v28  ;;  %v6044_v38 = vsub.f32 %v5885_v52, %v5919_v2  ;;  %v6058_v50 = vld [vmem:[#allocation2 + $0x240] sm:$0xff] }
  0xa7   : > { %8903 = vst [vmem:[#allocation64_spill] sm:$0xff] %v6022_v26  ;;  %8904 = vst [vmem:[#allocation65_spill] sm:$0xff] %v6030_v12  ;;  %537 = vmatpush2.msra.mxu0 %v6022_v26  ;;  %v812_v1 = vsub.f32 %v6007_v34, %v8553_v44  ;;  %v6052_v43 = vand.u32 4294901760, %v6024_v37  ;;  %v6065_v61 = vand.u32 4294901760, %v6035_v29  ;;  %v6067_v34 = vld [vmem:[#allocation2 + $0x230] sm:$0xff]  ;;  %v8912_v27 = vand.u32 4294901760, %v6030_v12 }
  0xa8   : > { %8905 = vst [vmem:[#allocation66_spill] sm:$0xff] %v6033_v56  ;;  %v806_v46 = vsub.f32 %v5994_v28, %v8906_v21  ;;  %8907 = vst [vmem:[#allocation67_spill] sm:$0xff] %v6044_v38  ;;  %796 = vmatprep.subr.mxu1 %v795_v62  ;;  %539 = vmatprep.subr.mxu0 %v6033_v56  ;;  %v6056_v21 = vsub.f32 %v5910_v49, %v5938_v14  ;;  %v8910_v62 = vand.u32 4294901760, %v6019_v13 }
  0xa9   : > { %8908 = vst [vmem:[#allocation68_spill] sm:$0xff] %v6052_v43  ;;  %802 = vmatpush1.msra.mxu1 %v801_v47  ;;  %8911 = vst [vmem:[#allocation70_spill] sm:$0xff] %v6065_v61  ;;  %v813_v28 = vand.u32 4294901760, %v812_v1  ;;  %v824_v49 = vsub.f32 %v6030_v12, %v8912_v27  ;;  %541 = vmatpush2.msra.mxu0 %v6052_v43  ;;  %v8914_v14 = vand.u32 4294901760, %v6044_v38  ;;  %v6085_v27 = vand.u32 4294901760, %v6058_v50  ;;  %v6091_v12 = vld [vmem:[#allocation2 + $0x218] sm:$0xff] }
  0xaa   : > { %8909 = vst [vmem:[#allocation69_spill] sm:$0xff] %v6056_v21  ;;  %v807_v52 = vand.u32 4294901760, %v806_v46  ;;  %v818_v2 = vsub.f32 %v6019_v13, %v8910_v62  ;;  %v6076_v46 = vsub.f32 %v5921_v39, %v5952_v20  ;;  %v6078_v62 = vld [vmem:[#allocation2 + $0x228] sm:$0xff]  ;;  %543 = vmatprep.subr.mxu0 %v6065_v61  ;;  %v6089_v47 = vsub.f32 %v5944_v7, %v5972_v51 }
  0xab   : > { %v830_v1 = vsub.f32 %v6044_v38, %v8914_v14  ;;  %8915 = vst [vmem:[#allocation72_spill] sm:$0xff] %v6085_v27  ;;  %v825_v39 = vand.u32 4294901760, %v824_v49  ;;  %v6098_v14 = vand.u32 4294901760, %v6067_v34  ;;  %v6100_v38 = vld [vmem:[#allocation2 + $0x210] sm:$0xff]  ;;  %545 = vmatpush2.msra.mxu0 %v6085_v27  ;;  %v6109_v49 = vand.u32 4294901760, %v6078_v62 }
  0xac   : > { %8913 = vst [vmem:[#allocation71_spill] sm:$0xff] %v6076_v46  ;;  %808 = vmatprep.subr.mxu1 %v807_v52  ;;  %v819_v44 = vand.u32 4294901760, %v818_v2  ;;  %8916 = vst [vmem:[#allocation73_spill] sm:$0xff] %v6089_v47  ;;  %v8917_v52 = vand.u32 4294901760, %v6056_v21  ;;  %v8576_v7 = vand.u32 4294901760, %v6089_v47  ;;  %v8921_v51 = vand.u32 4294901760, %v6076_v46 }
  0xad   : > { %814 = vmatpush2.msra.mxu1 %v813_v28  ;;  %8918 = vst [vmem:[#allocation74_spill] sm:$0xff] %v6098_v14  ;;  %v831_v13 = vand.u32 4294901760, %v830_v1  ;;  %v6106_v28 = vsub.f32 %v5954_v32, %v5986_v41  ;;  %8920 = vst [vmem:[#allocation76_spill] sm:$0xff] %v6109_v49  ;;  %547 = vmatprep.subr.mxu0 %v6098_v14  ;;  %v6119_v1 = vsub.f32 %v5965_v33, %v5997_v53  ;;  %v6136_v33 = vld [vmem:[#allocation2 + $0x1f8] sm:$0xff] }
  0xae   : > { %v836_v2 = vsub.f32 %v6056_v21, %v8917_v52  ;;  %820 = vmatprep.subr.mxu1 %v819_v44  ;;  %v6111_v52 = vld [vmem:[#allocation2 + $0x200] sm:$0xff]  ;;  %v842_v44 = vsub.f32 %v6076_v46, %v8921_v51  ;;  %v6122_v32 = vand.u32 4294901760, %v6091_v12  ;;  %v848_v41 = vsub.f32 %v6089_v47, %v8576_v7  ;;  %549 = vmatpush2.msra.mxu0 %v6109_v49 }
  0xaf   : > { %8919 = vst [vmem:[#allocation75_spill] sm:$0xff] %v6106_v28  ;;  %826 = vmatpush2.msra.mxu1 %v825_v39  ;;  %8922 = vst [vmem:[#allocation77_spill] sm:$0xff] %v6119_v1  ;;  %v6131_v51 = vsub.f32 %v5978_v19, %v6010_v36  ;;  %v6142_v7 = vsub.f32 %v5988_v30, %v6022_v26  ;;  %v6145_v39 = vand.u32 4294901760, %v6111_v52  ;;  %v6147_v19 = vld [vmem:[#allocation2 + $0x1e8] sm:$0xff]  ;;  %v8928_v47 = vand.u32 4294901760, %v6106_v28 }
  0xb0   : > { %v837_v20 = vand.u32 4294901760, %v836_v2  ;;  %8923 = vst [vmem:[#allocation78_spill] sm:$0xff] %v6122_v32  ;;  %832 = vmatprep.subr.mxu1 %v831_v13  ;;  %v6134_v2 = vand.u32 4294901760, %v6100_v38  ;;  %v843_v53 = vand.u32 4294901760, %v842_v44  ;;  %v8587_v13 = vand.u32 4294901760, %v6119_v1  ;;  %551 = vmatprep.subr.mxu0 %v6122_v32 }
  0xb1   : > { %8924 = vst [vmem:[#allocation79_spill] sm:$0xff] %v6131_v51  ;;  %8926 = vst [vmem:[#allocation81_spill] sm:$0xff] %v6142_v7  ;;  %v849_v36 = vand.u32 4294901760, %v848_v41  ;;  %v854_v46 = vsub.f32 %v6106_v28, %v8928_v47  ;;  %v6156_v44 = vsub.f32 %v5999_v24, %v6033_v56  ;;  %v6164_v41 = vand.u32 4294901760, %v6136_v33 }
  0xb2   : > { %8925 = vst [vmem:[#allocation80_spill] sm:$0xff] %v6134_v2  ;;  %838 = vmatpush2.msra.mxu1 %v837_v20  ;;  %8927 = vst [vmem:[#allocation82_spill] sm:$0xff] %v6145_v39  ;;  %553 = vmatpush2.msra.mxu0 %v6134_v2  ;;  %v860_v30 = vsub.f32 %v6119_v1, %v8587_v13  ;;  %v6168_v47 = vsub.f32 %v6024_v37, %v6052_v43  ;;  %v6170_v20 = vld [vmem:[#allocation2 + $0x1e0] sm:$0xff]  ;;  %v6177_v26 = vand.u32 4294901760, %v6147_v19  ;;  %v6179_v1 = vld [vmem:[#allocation2 + $0x1d0] sm:$0xff] }
  0xb3   : > { %8929 = vst [vmem:[#allocation83_spill] sm:$0xff] %v6156_v44  ;;  %844 = vmatprep.subr.mxu1 %v843_v53  ;;  %555 = vmatprep.subr.mxu0 %v6145_v39  ;;  %8930 = vst [vmem:[#allocation84_spill] sm:$0xff] %v6164_v41  ;;  %v855_v24 = vand.u32 4294901760, %v854_v46  ;;  %v8932_v53 = vand.u32 4294901760, %v6131_v51  ;;  %v8934_v21 = vand.u32 4294901760, %v6142_v7  ;;  %v6188_v46 = vsub.f32 %v6035_v29, %v6065_v61 }
  0xb4   : > { %8931 = vst [vmem:[#allocation85_spill] sm:$0xff] %v6168_v47  ;;  %850 = vmatpush2.msra.mxu1 %v849_v36  ;;  %8933 = vst [vmem:[#allocation86_spill] sm:$0xff] %v6177_v26  ;;  %v861_v28 = vand.u32 4294901760, %v860_v30  ;;  %557 = vmatpush2.msra.mxu0 %v6164_v41  ;;  %v8936_v43 = vand.u32 4294901760, %v6156_v44  ;;  %v6201_v36 = vsub.f32 %v6058_v50, %v6085_v27 }
  0xb5   : > { %v866_v56 = vsub.f32 %v6131_v51, %v8932_v53  ;;  %v872_v37 = vsub.f32 %v6142_v7, %v8934_v21  ;;  %8935 = vst [vmem:[#allocation87_spill] sm:$0xff] %v6188_v46  ;;  %v6190_v53 = vld [vmem:[#allocation2 + $0x1c8] sm:$0xff]  ;;  %856 = vmatprep.subr.mxu1 %v855_v24  ;;  %559 = vmatprep.subr.mxu0 %v6177_v26  ;;  %v6197_v21 = vand.u32 4294901760, %v6170_v20  ;;  %v6203_v7 = vld [vmem:[#allocation2 + $0x1b8] sm:$0xff]  ;;  %v8939_v24 = vand.u32 4294901760, %v6168_v47 }
  0xb6   : > { %v878_v30 = vsub.f32 %v6156_v44, %v8936_v43  ;;  %8938 = vst [vmem:[#allocation89_spill] sm:$0xff] %v6201_v36  ;;  %862 = vmatpush2.msra.mxu1 %v861_v28  ;;  %v6210_v43 = vand.u32 4294901760, %v6179_v1  ;;  %v6212_v44 = vld [vmem:[#allocation2 + $0x1b0] sm:$0xff]  ;;  %v8610_v50 = vand.u32 4294901760, %v6201_v36  ;;  %v6218_v28 = vsub.f32 %v6067_v34, %v6098_v14 }
  0xb7   : > { %v867_v13 = vand.u32 4294901760, %v866_v56  ;;  %8937 = vst [vmem:[#allocation88_spill] sm:$0xff] %v6197_v21  ;;  %v873_v29 = vand.u32 4294901760, %v872_v37  ;;  %v884_v56 = vsub.f32 %v6168_v47, %v8939_v24  ;;  %561 = vmatpush2.msra.mxu0 %v6197_v21  ;;  %v6221_v37 = vand.u32 4294901760, %v6190_v53  ;;  %v6223_v24 = vld [vmem:[#allocation2 + $0x1a0] sm:$0xff] }
  0xb8   : > { %8940 = vst [vmem:[#allocation90_spill] sm:$0xff] %v6210_v43  ;;  %v879_v51 = vand.u32 4294901760, %v878_v30  ;;  %8941 = vst [vmem:[#allocation91_spill] sm:$0xff] %v6218_v28  ;;  %v8942_v27 = vand.u32 4294901760, %v6188_v46  ;;  %563 = vmatprep.subr.mxu0 %v6210_v43  ;;  %v6231_v30 = vsub.f32 %v6078_v62, %v6109_v49  ;;  %v6234_v34 = vand.u32 4294901760, %v6203_v7  ;;  %v6248_v62 = vld [vmem:[#allocation2 + $0x198] sm:$0xff] }
  0xb9   : > { %868 = vmatprep.subr.mxu1 %v867_v13  ;;  %v885_v61 = vand.u32 4294901760, %v884_v56  ;;  %v896_v14 = vsub.f32 %v6201_v36, %v8610_v50  ;;  %565 = vmatpush2.msra.mxu0 %v6221_v37  ;;  %v6246_v56 = vand.u32 4294901760, %v6212_v44  ;;  %v6254_v50 = vsub.f32 %v6100_v38, %v6134_v2  ;;  %v6282_v2 = vld [vmem:[#allocation2 + $0x180] sm:$0xff] }
  0xba   : > { %874 = vmatpush2.msra.mxu1 %v873_v29  ;;  %v890_v13 = vsub.f32 %v6188_v46, %v8942_v27  ;;  %8943 = vst [vmem:[#allocation92_spill] sm:$0xff] %v6231_v30  ;;  %8944 = vst [vmem:[#allocation93_spill] sm:$0xff] %v6234_v34  ;;  %v6243_v27 = vsub.f32 %v6091_v12, %v6122_v32  ;;  %567 = vmatprep.subr.mxu0 %v6234_v34  ;;  %v6257_v29 = vand.u32 4294901760, %v6223_v24  ;;  %v6259_v12 = vld [vmem:[#allocation2 + $0x188] sm:$0xff] }
  0xbb   : > { %880 = vmatprep.subr.mxu1 %v879_v51  ;;  %8946 = vst [vmem:[#allocation95_spill] sm:$0xff] %v6246_v56  ;;  %v8619_v51 = vand.u32 4294901760, %v6231_v30  ;;  %8947 = vst [vmem:[#allocation96_spill] sm:$0xff] %v6254_v50  ;;  %v897_v32 = vand.u32 4294901760, %v896_v14  ;;  %v8949_v36 = vand.u32 4294901760, %v6218_v28  ;;  %569 = vmatpush2.msra.mxu0 %v6246_v56  ;;  %v8953_v47 = vand.u32 4294901760, %v6254_v50 }
  0xbc   : > { %8945 = vst [vmem:[#allocation94_spill] sm:$0xff] %v6243_v27  ;;  %886 = vmatpush2.msra.mxu1 %v885_v61  ;;  %v891_v49 = vand.u32 4294901760, %v890_v13  ;;  %8948 = vst [vmem:[#allocation97_spill] sm:$0xff] %v6257_v29  ;;  %v6268_v13 = vsub.f32 %v6111_v52, %v6145_v39  ;;  %571 = vmatprep.subr.mxu0 %v6257_v29  ;;  %v6280_v61 = vsub.f32 %v6136_v33, %v6164_v41 }
  0xbd   : > { %v902_v46 = vsub.f32 %v6218_v28, %v8949_v36  ;;  %v908_v38 = vsub.f32 %v6231_v30, %v8619_v51  ;;  %v6276_v36 = vand.u32 4294901760, %v6248_v62  ;;  %v8952_v52 = vand.u32 4294901760, %v6243_v27  ;;  %v284_v30 = vld [vmem:[%s5521_s22 + $0x8] sm:$0xff] }
  0xbe   : > { %8950 = vst [vmem:[#allocation98_spill] sm:$0xff] %v6268_v13  ;;  %892 = vmatprep.subr.mxu1 %v891_v49  ;;  %8951 = vst [vmem:[#allocation99_spill] sm:$0xff] %v6280_v61  ;;  %v6289_v39 = vand.u32 4294901760, %v6259_v12  ;;  %v920_v33 = vsub.f32 %v6254_v50, %v8953_v47  ;;  %v8955_v41 = vand.u32 4294901760, %v6268_v13  ;;  %v6311_v47 = vsub.f32 %v6170_v20, %v6197_v21 }
  0xbf   : > { %898 = vmatpush2.msra.mxu1 %v897_v32  ;;  %v903_v49 = vand.u32 4294901760, %v902_v46  ;;  %v914_v51 = vsub.f32 %v6243_v27, %v8952_v52  ;;  %v909_v28 = vand.u32 4294901760, %v908_v38  ;;  %573 = vmatpush2.msra.mxu0 %v6276_v36  ;;  %v6299_v46 = vsub.f32 %v6147_v19, %v6177_v26  ;;  %v283_v52 = vld [vmem:[%s5521_s22] sm:$0xff] }
  0xc0   : > { %v926_v27 = vsub.f32 %v6268_v13, %v8955_v41  ;;  %575 = vmatprep.subr.mxu0 %v6289_v39  ;;  %v6307_v38 = vand.u32 4294901760, %v6282_v2  ;;  %v921_v32 = vand.u32 4294901760, %v920_v33  ;;  %v8956_v19 = vand.u32 4294901760, %v6280_v61 }
  0xc1   : > { %8954 = vst [vmem:[#allocation100_spill] sm:$0xff] %v6299_v46  ;;  %904 = vmatprep.subr.mxu1 %v903_v49  ;;  %v915_v14 = vand.u32 4294901760, %v914_v51  ;;  %v8639_v51 = vand.u32 4294901760, %v6299_v46  ;;  %v6317_v26 = vand.u32 4294901760, %v284_v30  ;;  %v8638_v13 = vand.u32 4294901760, %v6311_v47 }
  0xc2   : > { %910 = vmatpush2.msra.mxu1 %v909_v28  ;;  %v932_v49 = vsub.f32 %v6280_v61, %v8956_v19  ;;  %v927_v41 = vand.u32 4294901760, %v926_v27  ;;  %577 = vmatpush2.msra.mxu0 %v6307_v38  ;;  %v6323_v20 = vsub.f32 %v6179_v1, %v6210_v43  ;;  %v6325_v28 = vand.u32 4294901760, %v283_v52 }
  0xc3   : > { %8957 = vst [vmem:[#allocation101_spill] sm:$0xff] %v6317_v26  ;;  %916 = vmatprep.subr.mxu1 %v915_v14  ;;  %v938_v19 = vsub.f32 %v6299_v46, %v8639_v51  ;;  %v6331_v21 = vsub.f32 %v284_v30, %v6317_v26  ;;  %1014 = vmatprep.subr.mxu0 %v5547_v18 }
  0xc4   : > { %8958 = vst [vmem:[#allocation102_spill] sm:$0xff] %v6325_v28  ;;  %922 = vmatpush2.msra.mxu1 %v921_v32  ;;  %v933_v33 = vand.u32 4294901760, %v932_v49  ;;  %v6336_v27 = vsub.f32 %v6190_v53, %v6221_v37  ;;  %v944_v1 = vsub.f32 %v6311_v47, %v8638_v13  ;;  %v8642_v14 = vand.u32 4294901760, %v6323_v20  ;;  %996 = vmatprep.mubr.f32.mxu1 %v6317_v26 }
  0xc5   : > { %8959 = vst [vmem:[#allocation103_spill] sm:$0xff] %v6331_v21  ;;  %928 = vmatprep.subr.mxu1 %v927_v41  ;;  %v6343_v32 = vsub.f32 %v283_v52, %v6325_v28  ;;  %v6347_v30 = vsub.f32 %v6203_v7, %v6234_v34  ;;  %v939_v49 = vand.u32 4294901760, %v938_v19  ;;  %v6351_v53 = vand.u32 4294901760, %v6331_v21 }
  0xc6   : > { %934 = vmatpush2.msra.mxu1 %v933_v33  ;;  %v8647_v41 = vand.u32 4294901760, %v6336_v27  ;;  %v6356_v13 = vsub.f32 %v6212_v44, %v6246_v56  ;;  %v945_v51 = vand.u32 4294901760, %v944_v1  ;;  %v950_v52 = vsub.f32 %v6323_v20, %v8642_v14 }
  0xc7   : > { %8960 = vst [vmem:[#allocation104_spill] sm:$0xff] %v6343_v32  ;;  %8961 = vst [vmem:[#allocation105_spill] sm:$0xff] %v6347_v30  ;;  %v6362_v7 = vand.u32 4294901760, %v6343_v32  ;;  %v8654_v33 = vand.u32 4294901760, %v6347_v30  ;;  %940 = vmatprep.subr.mxu1 %v939_v49  ;;  %v581_v19 = vsub.f32 %v6331_v21, %v6351_v53  ;;  %v6373_v1 = vsub.f32 %v6223_v24, %v6257_v29 }
  0xc8   : > { %8962 = vst [vmem:[#allocation106_spill] sm:$0xff] %v6351_v53  ;;  %v956_v26 = vsub.f32 %v6336_v27, %v8647_v41  ;;  %946 = vmatpush2.msra.mxu1 %v945_v51  ;;  %v951_v14 = vand.u32 4294901760, %v950_v52  ;;  %v6382_v53 = vsub.f32 %v6248_v62, %v6276_v36  ;;  %v8965_v34 = vand.u32 4294901760, %v6356_v13 }
  0xc9   : > { %8963 = vst [vmem:[#allocation107_spill] sm:$0xff] %v6362_v7  ;;  %v587_v56 = vsub.f32 %v6343_v32, %v6362_v7  ;;  %v962_v49 = vsub.f32 %v6347_v30, %v8654_v33  ;;  %v6384_v41 = vand.u32 4294901760, %v581_v19  ;;  %v8658_v51 = vand.u32 4294901760, %v6373_v1 }
  0xca   : > { %v957_v44 = vand.u32 4294901760, %v956_v26  ;;  %v968_v24 = vsub.f32 %v6356_v13, %v8965_v34  ;;  %952 = vmatprep.subr.mxu1 %v951_v14  ;;  %v8657_v29 = vand.u32 4294901760, %v6382_v53  ;;  %v6395_v33 = vsub.f32 %v6259_v12, %v6289_v39 }
  0xcb   : > { %8964 = vst [vmem:[#allocation108_spill] sm:$0xff] %v6384_v41  ;;  %v6390_v52 = vand.u32 4294901760, %v587_v56  ;;  %v963_v7 = vand.u32 4294901760, %v962_v49  ;;  %583 = vmatprep.mubr.f32.mxu0 %v6384_v41  ;;  %v974_v34 = vsub.f32 %v6373_v1, %v8658_v51  ;;  %v6403_v62 = vsub.f32 %v6282_v2, %v6307_v38  ;;  %v8979_v51 = vld [vmem:[#allocation21_spill] sm:$0xff]  ;;  %v8981_v41 = vld [vmem:[#allocation22_spill] sm:$0xff] }
  0xcc   : > { %958 = vmatpush2.msra.mxu1 %v957_v44  ;;  %v969_v26 = vand.u32 4294901760, %v968_v24  ;;  %v980_v56 = vsub.f32 %v6382_v53, %v8657_v29  ;;  %v8656_v12 = vand.u32 4294901760, %v6395_v33  ;;  %v8978_v29 = vld [vmem:[#allocation43_spill] sm:$0xff] }
  0xcd   : > { %8966 = vst [vmem:[#allocation109_spill] sm:$0xff] %v6390_v52  ;;  %589 = vmatmul.mubr.f32.vlgmr.msra.gmra.mxu0 %v6390_v52  ;;  %964 = vmatprep.subr.mxu1 %v963_v7  ;;  %v975_v14 = vand.u32 4294901760, %v974_v34  ;;  %v8655_v19 = vand.u32 4294901760, %v6403_v62  ;;  %v8968_v34 = vld [vmem:[#allocation33_spill] sm:$0xff] }
  0xce   : > { %1017 = vmatpush1.msra.mxu0 %v5560_v23  ;;  %970 = vmatpush2.msra.mxu1 %v969_v26  ;;  %v981_v44 = vand.u32 4294901760, %v980_v56  ;;  %v986_v2 = vsub.f32 %v6395_v33, %v8656_v12  ;;  %v8967_v26 = vld [vmem:[#allocation15_spill] sm:$0xff]  ;;  %v8969_v56 = vld [vmem:[#allocation16_spill] sm:$0xff]  ;;  %v8980_v52 = vld [vmem:[#allocation45_spill] sm:$0xff] }
  0xcf   : > { %1020 = vmatprep.subr.mxu0 %v5566_v25  ;;  %976 = vmatprep.subr.mxu1 %v975_v14  ;;  %v992_v7 = vsub.f32 %v6403_v62, %v8655_v19  ;;  %v8970_v14 = vld [vmem:[#allocation35_spill] sm:$0xff]  ;;  %v8976_v19 = vld [vmem:[#allocation41_spill] sm:$0xff]  ;;  %v8977_v12 = vld [vmem:[#allocation20_spill] sm:$0xff] }
  0xd0   : > { %1023 = vmatpush1.msra.mxu0 %v5580_v31  ;;  %982 = vmatpush2.msra.mxu1 %v981_v44  ;;  %v987_v49 = vand.u32 4294901760, %v986_v2  ;;  %v8971_v44 = vld [vmem:[#allocation17_spill] sm:$0xff] }
  0xd1   : > { %1026 = vmatprep.subr.mxu0 %v5589_v35  ;;  %v993_v24 = vand.u32 4294901760, %v992_v7  ;;  %v8972_v2 = vld [vmem:[#allocation37_spill] sm:$0xff]  ;;  %v8973_v7 = vld [vmem:[#allocation18_spill] sm:$0xff] }
  0xd2   : > { %1029 = vmatpush1.msra.mxu0 %v5602_v40  ;;  %988 = vmatprep.subr.mxu1 %v987_v49  ;;  %v8974_v49 = vld [vmem:[#allocation39_spill] sm:$0xff] }
  0xd3   : > { %1032 = vmatprep.subr.mxu0 %v5616_v45  ;;  %994 = vmatpush2.msra.mxu1 %v993_v24  ;;  %v8975_v24 = vld [vmem:[#allocation19_spill] sm:$0xff] }
  0xd4   : > { %1035 = vmatpush1.msra.mxu0 %v5642_v59  ;;  %998 = vmatmul.mubr.f32.vlgmr.msra.gmra.mxu1 %v6325_v28  ;;  %v8982_v28 = vld [vmem:[#allocation47_spill] sm:$0xff] }
  0xd5   : > { %1038 = vmatprep.subr.mxu0 %v5654_v0  ;;  %1226 = vmatprep.subr.mxu1 %v5527_v3 }
  0xd6   : > { %1041 = vmatpush1.msra.mxu0 %v5665_v8  ;;  %1228 = vmatpush1.msra.mxu1 %v5529_v4 }
  0xd7   : > { %1044 = vmatprep.subr.mxu0 %v5676_v42  ;;  %1230 = vmatprep.subr.mxu1 %v5531_v5 }
  0xd8   : > { %1047 = vmatpush1.msra.mxu0 %v5688_v48  ;;  %1232 = vmatpush1.msra.mxu1 %v5533_v9 }
  0xd9   : > { %1050 = vmatprep.subr.mxu0 %v5702_v57  ;;  %1234 = vmatprep.subr.mxu1 %v5535_v10 }
  0xda   : > { %1053 = vmatpush1.msra.mxu0 %v5714_v6  ;;  %1236 = vmatpush1.msra.mxu1 %v5537_v11 }
  0xdb   : > { %1056 = vmatprep.subr.mxu0 %v5735_v54  ;;  %1238 = vmatprep.subr.mxu1 %v5540_v15 }
  0xdc   : > { %1059 = vmatpush1.msra.mxu0 %v5748_v63  ;;  %1240 = vmatpush1.msra.mxu1 %v5542_v16 }
  0xdd   : > { %1062 = vmatprep.subr.mxu0 %v5766_v55  ;;  %1242 = vmatprep.subr.mxu1 %v5544_v17 }
  0xde   : > { %1065 = vmatpush1.msra.mxu0 %v5779_v58  ;;  %1244 = vmatpush1.msra.mxu1 %v5557_v22 }
  0xdf   : > { %1068 = vmatprep.subr.mxu0 %v5791_v60  ;;  %1246 = vmatprep.subr.mxu1 %v8967_v26 }
  0xe0   : > { %1071 = vmatpush1.msra.mxu0 %v8968_v34  ;;  %1248 = vmatpush1.msra.mxu1 %v8969_v56 }
  0xe1   : > { %1074 = vmatprep.subr.mxu0 %v8970_v14  ;;  %1250 = vmatprep.subr.mxu1 %v8971_v44  ;;  %v9007_v44 = vld [vmem:[#allocation38_spill] sm:$0xff] }
  0xe2   : > { %1077 = vmatpush1.msra.mxu0 %v8972_v2  ;;  %1252 = vmatpush1.msra.mxu1 %v8973_v7  ;;  %v8983_v2 = vld [vmem:[#allocation23_spill] sm:$0xff]  ;;  %v8984_v7 = vld [vmem:[#allocation49_spill] sm:$0xff]  ;;  %v9017_v14 = vld [vmem:[#allocation46_spill] sm:$0xff] }
  0xe3   : > { %1080 = vmatprep.subr.mxu0 %v8974_v49  ;;  %1254 = vmatprep.subr.mxu1 %v8975_v24  ;;  %v8985_v49 = vld [vmem:[#allocation24_spill] sm:$0xff]  ;;  %v8986_v24 = vld [vmem:[#allocation51_spill] sm:$0xff] }
  0xe4   : > { %1083 = vmatpush1.msra.mxu0 %v8976_v19  ;;  %1256 = vmatpush1.msra.mxu1 %v8977_v12  ;;  %v8987_v19 = vld [vmem:[#allocation25_spill] sm:$0xff] }
  0xe5   : > { %1086 = vmatprep.subr.mxu0 %v8978_v29  ;;  %1258 = vmatprep.subr.mxu1 %v8979_v51  ;;  %v8988_v12 = vld [vmem:[#allocation53_spill] sm:$0xff]  ;;  %v8989_v51 = vld [vmem:[#allocation26_spill] sm:$0xff] }
  0xe6   : > { %1089 = vmatpush1.msra.mxu0 %v8980_v52  ;;  %1260 = vmatpush1.msra.mxu1 %v8981_v41  ;;  %v8990_v52 = vld [vmem:[#allocation55_spill] sm:$0xff] }
  0xe7   : > { %1092 = vmatprep.subr.mxu0 %v8982_v28  ;;  %1262 = vmatprep.subr.mxu1 %v8983_v2  ;;  %v8991_v41 = vld [vmem:[#allocation27_spill] sm:$0xff]  ;;  %v8992_v28 = vld [vmem:[#allocation57_spill] sm:$0xff]  ;;  %v8993_v2 = vld [vmem:[#allocation28_spill] sm:$0xff] }
  0xe8   : > { %1095 = vmatpush1.msra.mxu0 %v8984_v7  ;;  %1264 = vmatpush1.msra.mxu1 %v8985_v49  ;;  %v8994_v7 = vld [vmem:[#allocation59_spill] sm:$0xff]  ;;  %v8995_v49 = vld [vmem:[#allocation29_spill] sm:$0xff] }
  0xe9   : > { %1098 = vmatprep.subr.mxu0 %v8986_v24  ;;  %1266 = vmatprep.subr.mxu1 %v8987_v19  ;;  %v8996_v24 = vld [vmem:[#allocation61_spill] sm:$0xff]  ;;  %v8997_v19 = vld [vmem:[#allocation30_spill] sm:$0xff] }
  0xea   : > { %1101 = vmatpush1.msra.mxu0 %v8988_v12  ;;  %1268 = vmatpush1.msra.mxu1 %v8989_v51  ;;  %v8998_v12 = vld [vmem:[#allocation63_spill] sm:$0xff] }
  0xeb   : > { %1104 = vmatprep.subr.mxu0 %v8990_v52  ;;  %1270 = vmatprep.subr.mxu1 %v8991_v41  ;;  %v8999_v51 = vld [vmem:[#allocation31_spill] sm:$0xff]  ;;  %v9000_v52 = vld [vmem:[#allocation65_spill] sm:$0xff]  ;;  %v9001_v41 = vld [vmem:[#allocation32_spill] sm:$0xff] }
  0xec   : > { %1107 = vmatpush1.msra.mxu0 %v8992_v28  ;;  %1272 = vmatpush1.msra.mxu1 %v8993_v2  ;;  %v9002_v28 = vld [vmem:[#allocation67_spill] sm:$0xff]  ;;  %v9003_v2 = vld [vmem:[#allocation34_spill] sm:$0xff] }
  0xed   : > { %1110 = vmatprep.subr.mxu0 %v8994_v7  ;;  %1274 = vmatprep.subr.mxu1 %v8995_v49  ;;  %v287_v29 = vld [vmem:[%s5521_s22 + $0x20] sm:$0xff]  ;;  %v9005_v49 = vld [vmem:[#allocation36_spill] sm:$0xff] }
  0xee   : > { %1113 = vmatpush2.msra.mxu0 %v8996_v24  ;;  %1276 = vmatpush1.msra.mxu1 %v8997_v19  ;;  %v9004_v7 = vld [vmem:[#allocation69_spill] sm:$0xff]  ;;  %v9006_v24 = vld [vmem:[#allocation71_spill] sm:$0xff]  ;;  %v286_v19 = vld [vmem:[%s5521_s22 + $0x18] sm:$0xff] }
  0xef   : > { %1116 = vmatprep.subr.mxu0 %v8998_v12  ;;  %1278 = vmatprep.subr.mxu1 %v8999_v51  ;;  %v9008_v12 = vld [vmem:[#allocation73_spill] sm:$0xff]  ;;  %v6490_v51 = vand.u32 4294901760, %v287_v29 }
  0xf0   : > { %1119 = vmatpush2.msra.mxu0 %v9000_v52  ;;  %1280 = vmatpush1.msra.mxu1 %v9001_v41  ;;  %v9010_v52 = vld [vmem:[#allocation40_spill] sm:$0xff]  ;;  %v9011_v41 = vld [vmem:[#allocation75_spill] sm:$0xff] }
  0xf1   : > { %1122 = vmatprep.subr.mxu0 %v9002_v28  ;;  %1282 = vmatprep.subr.mxu1 %v9003_v2  ;;  %9009 = vst [vmem:[#allocation15_spill] sm:$0xff] %v6490_v51  ;;  %v9012_v28 = vld [vmem:[#allocation42_spill] sm:$0xff]  ;;  %v9013_v2 = vld [vmem:[#allocation77_spill] sm:$0xff] }
  0xf2   : > { %1125 = vmatpush2.msra.mxu0 %v9004_v7  ;;  %1284 = vmatpush1.msra.mxu1 %v9005_v49  ;;  %v6496_v7 = vand.u32 4294901760, %v286_v19  ;;  %v9015_v49 = vld [vmem:[#allocation44_spill] sm:$0xff] }
  0xf3   : > { %1128 = vmatprep.subr.mxu0 %v9006_v24  ;;  %1286 = vmatprep.subr.mxu1 %v9007_v44  ;;  %v9016_v24 = vld [vmem:[#allocation79_spill] sm:$0xff]  ;;  %v9018_v44 = vld [vmem:[#allocation81_spill] sm:$0xff] }
  0xf4   : > { %1131 = vmatpush2.msra.mxu0 %v9008_v12  ;;  %1288 = vmatpush1.msra.mxu1 %v9010_v52  ;;  %9014 = vst [vmem:[#allocation33_spill] sm:$0xff] %v6496_v7  ;;  %v6503_v12 = vsub.f32 %v287_v29, %v6490_v51  ;;  %v9020_v52 = vld [vmem:[#allocation48_spill] sm:$0xff]  ;;  %v6510_v56 = vsub.f32 %v286_v19, %v6496_v7 }
  0xf5   : > { %1134 = vmatprep.subr.mxu0 %v9011_v41  ;;  %1290 = vmatprep.subr.mxu1 %v9012_v28  ;;  %v9021_v41 = vld [vmem:[#allocation83_spill] sm:$0xff]  ;;  %v9022_v28 = vld [vmem:[#allocation50_spill] sm:$0xff] }
  0xf6   : > { %1137 = vmatpush2.msra.mxu0 %v9013_v2  ;;  %1292 = vmatpush2.msra.mxu1 %v9015_v49  ;;  %9019 = vst [vmem:[#allocation110_spill] sm:$0xff] %v6503_v12  ;;  %v9023_v2 = vld [vmem:[#allocation85_spill] sm:$0xff]  ;;  %9024 = vst [vmem:[#allocation111_spill] sm:$0xff] %v6510_v56  ;;  %v9025_v49 = vld [vmem:[#allocation52_spill] sm:$0xff]  ;;  %v6517_v29 = vand.u32 4294901760, %v6503_v12  ;;  %v6524_v19 = vand.u32 4294901760, %v6510_v56 }
  0xf7   : > { %1140 = vmatprep.subr.mxu0 %v9016_v24  ;;  %1294 = vmatprep.subr.mxu1 %v9017_v14  ;;  %v9026_v24 = vld [vmem:[#allocation87_spill] sm:$0xff]  ;;  %v9027_v14 = vld [vmem:[#allocation54_spill] sm:$0xff] }
  0xf8   : > { %1143 = vmatpush2.msra.mxu0 %v9018_v44  ;;  %1296 = vmatpush2.msra.mxu1 %v9020_v52  ;;  %v9028_v44 = vld [vmem:[#allocation89_spill] sm:$0xff]  ;;  %9029 = vst [vmem:[#allocation112_spill] sm:$0xff] %v6517_v29  ;;  %v9030_v52 = vld [vmem:[#allocation56_spill] sm:$0xff]  ;;  %9034 = vst [vmem:[#allocation113_spill] sm:$0xff] %v6524_v19 }
  0xf9   : > { %1146 = vmatprep.subr.mxu0 %v9021_v41  ;;  %1298 = vmatprep.subr.mxu1 %v9022_v28  ;;  %v9031_v41 = vld [vmem:[#allocation91_spill] sm:$0xff]  ;;  %v9032_v28 = vld [vmem:[#allocation58_spill] sm:$0xff] }
  0xfa   : > { %1149 = vmatpush2.msra.mxu0 %v9023_v2  ;;  %1300 = vmatpush2.msra.mxu1 %v9025_v49  ;;  %v9033_v2 = vld [vmem:[#allocation92_spill] sm:$0xff] }
  0xfb   : > { %1152 = vmatprep.subr.mxu0 %v9026_v24  ;;  %1302 = vmatprep.subr.mxu1 %v9027_v14  ;;  %v9035_v49 = vld [vmem:[#allocation60_spill] sm:$0xff]  ;;  %v9036_v24 = vld [vmem:[#allocation94_spill] sm:$0xff] }
  0xfc   : > { %1155 = vmatpush2.msra.mxu0 %v9028_v44  ;;  %1304 = vmatpush2.msra.mxu1 %v9030_v52  ;;  %v9037_v14 = vld [vmem:[#allocation62_spill] sm:$0xff]  ;;  %v597_v52 = vsub.f32 %v6503_v12, %v6517_v29  ;;  %v9038_v44 = vld [vmem:[#allocation64_spill] sm:$0xff] }
  0xfd   : > { %1158 = vmatprep.subr.mxu0 %v9031_v41  ;;  %1306 = vmatprep.subr.mxu1 %v9032_v28  ;;  %v9039_v41 = vld [vmem:[#allocation98_spill] sm:$0xff] }
  0xfe   : > { %1161 = vmatpush2.msra.mxu0 %v9033_v2  ;;  %1308 = vmatpush2.msra.mxu1 %v9035_v49  ;;  %v9040_v28 = vld [vmem:[#allocation66_spill] sm:$0xff]  ;;  %v603_v49 = vsub.f32 %v6510_v56, %v6524_v19  ;;  %v9041_v2 = vld [vmem:[#allocation68_spill] sm:$0xff] }
  0xff   : > { %1164 = vmatprep.subr.mxu0 %v9036_v24  ;;  %1310 = vmatprep.subr.mxu1 %v9037_v14  ;;  %v9042_v14 = vld [vmem:[#allocation70_spill] sm:$0xff] }
 0x100   : > { %1167 = vmatpush2.msra.mxu0 %v6254_v50  ;;  %1312 = vmatpush2.msra.mxu1 %v9038_v44  ;;  %v6542_v50 = vand.u32 4294901760, %v597_v52  ;;  %v9044_v44 = vld [vmem:[#allocation72_spill] sm:$0xff] }
 0x101   : > { %1170 = vmatprep.subr.mxu0 %v9039_v41  ;;  %1314 = vmatprep.subr.mxu1 %v9040_v28  ;;  %v9045_v28 = vld [vmem:[#allocation74_spill] sm:$0xff]  ;;  %v9047_v41 = vld [vmem:[#allocation76_spill] sm:$0xff] }
 0x102   : > { %1173 = vmatpush2.msra.mxu0 %v6280_v61  ;;  %1316 = vmatpush2.msra.mxu1 %v9041_v2  ;;  %9043 = vst [vmem:[#allocation94_spill] sm:$0xff] %v6542_v50  ;;  %v6548_v61 = vand.u32 4294901760, %v603_v49  ;;  %v9049_v52 = vld [vmem:[#allocation80_spill] sm:$0xff] }
 0x103   : > { %1176 = vmatprep.subr.mxu0 %v6299_v46  ;;  %1318 = vmatprep.subr.mxu1 %v9042_v14  ;;  %v9048_v46 = vld [vmem:[#allocation78_spill] sm:$0xff]  ;;  %v9051_v49 = vld [vmem:[#allocation84_spill] sm:$0xff] }
 0x104   : > { %1179 = vmatpush2.msra.mxu0 %v6311_v47  ;;  %1320 = vmatpush2.msra.mxu1 %v9044_v44  ;;  %9046 = vst [vmem:[#allocation68_spill] sm:$0xff] %v6548_v61 }
 0x105   : > { %1182 = vmatprep.subr.mxu0 %v6323_v20  ;;  %1322 = vmatprep.subr.mxu1 %v9045_v28  ;;  %v9050_v28 = vld [vmem:[#allocation82_spill] sm:$0xff] }
 0x106   : > { %1185 = vmatpush2.msra.mxu0 %v6336_v27  ;;  %1324 = vmatpush2.msra.mxu1 %v9047_v41 }
 0x107   : > { %1188 = vmatprep.subr.mxu0 %v6347_v30  ;;  %1326 = vmatprep.subr.mxu1 %v9048_v46  ;;  %v9052_v30 = vld [vmem:[#allocation86_spill] sm:$0xff] }
 0x108   : > { %599 = vmatprep.mubr.f32.mxu0 %v6542_v50  ;;  %1191 = vmatpush2.msra.mxu0 %v6356_v13  ;;  %v9053_v50 = vld [vmem:[#allocation88_spill] sm:$0xff] }
 0x109   : > { %1328 = vmatpush2.msra.mxu1 %v9049_v52  ;;  %605 = vmatmul.mubr.f32.gmra.mxu0 %v6548_v61  ;;  %v9054_v61 = vand.u32 4294901760, %v5547_v18  ;;  %v9060_v18 = vld [vmem:[#allocation97_spill] sm:$0xff] }
 0x10a   : > { %1194 = vmatprep.subr.mxu0 %v6373_v1  ;;  %1330 = vmatprep.subr.mxu1 %v9050_v28 }
 0x10b   : > { %1197 = vmatpush2.msra.mxu0 %v6382_v53  ;;  %1332 = vmatpush2.msra.mxu1 %v9051_v49  ;;  %v9055_v49 = vand.u32 4294901760, %v5560_v23  ;;  %v9061_v23 = vand.u32 4294901760, %v5589_v35  ;;  %v9066_v35 = vld [vmem:[#allocation107_spill] sm:$0xff] }
 0x10c   : > { %1200 = vmatprep.subr.mxu0 %v6395_v33  ;;  %1334 = vmatprep.subr.mxu1 %v9052_v30  ;;  %v9056_v30 = vld [vmem:[#allocation93_spill] sm:$0xff] }
 0x10d   : > { %1203 = vmatpush2.msra.mxu0 %v6403_v62  ;;  %1206 = vmatprep.mubr.f32.mxu0 %v6331_v21  ;;  %v9057_v21 = vand.u32 4294901760, %v5566_v25  ;;  %v9062_v25 = vand.u32 4294901760, %v5602_v40  ;;  %v9068_v40 = vand.u32 4294901760, %v5665_v8  ;;  %v9079_v8 = vld [vmem:[#allocation16_spill] sm:$0xff] }
 0x10e   : > { %1336 = vmatpush2.msra.mxu1 %v9053_v50  ;;  %1209 = vmatmul.mubr.f32.vlgmr.msra.gmra.mxu0 %v6343_v32  ;;  %v9058_v32 = vand.u32 4294901760, %v5580_v31  ;;  %v9063_v31 = vand.u32 4294901760, %v5616_v45  ;;  %v9069_v45 = vand.u32 4294901760, %v5676_v42 }
 0x10f   : > { %1338 = vmatprep.subr.mxu1 %v6210_v43  ;;  %1381 = vmatprep.subr.mxu0 %v9054_v61  ;;  %v9059_v43 = vld [vmem:[#allocation95_spill] sm:$0xff]  ;;  %v9065_v61 = vand.u32 4294901760, %v5642_v59  ;;  %v9070_v59 = vand.u32 4294901760, %v5688_v48  ;;  %v9082_v48 = vld [vmem:[#allocation17_spill] sm:$0xff] }
 0x110   : > { %1340 = vmatpush2.msra.mxu1 %v6221_v37  ;;  %1385 = vmatpush1.msra.mxu0 %v9055_v49  ;;  %v9094_v49 = vld [vmem:[#allocation21_spill] sm:$0xff] }
 0x111   : > { %1004 = vmatprep.mubr.f32.mxu1 %v6490_v51  ;;  %1342 = vmatprep.subr.mxu1 %v9056_v30 }
 0x112   : > { %1389 = vmatprep.subr.mxu0 %v9057_v21  ;;  %1006 = vmatmul.mubr.f32.gmra.mxu1 %v6496_v7  ;;  %v9064_v21 = vld [vmem:[#allocation106_spill] sm:$0xff] }
 0x113   : > { %1393 = vmatpush1.msra.mxu0 %v9058_v32  ;;  %1344 = vmatpush2.msra.mxu1 %v9059_v43  ;;  %v9067_v32 = vand.u32 4294901760, %v5654_v0  ;;  %v9074_v0 = vand.u32 4294901760, %v5748_v63  ;;  %v9088_v63 = vld [vmem:[#allocation19_spill] sm:$0xff] }
 0x114   : > { %1216 = vmatprep.mubr.f32.mxu0 %v6503_v12  ;;  %1346 = vmatprep.subr.mxu1 %v9060_v18 }
 0x115   : > { %1397 = vmatprep.subr.mxu0 %v9061_v23  ;;  %1219 = vmatmul.mubr.f32.gmra.mxu0 %v6510_v56  ;;  %v9095_v23 = vld [vmem:[#allocation45_spill] sm:$0xff] }
 0x116   : > { %1348 = vmatpush2.msra.mxu1 %v6276_v36  ;;  %1401 = vmatpush1.msra.mxu0 %v9062_v25  ;;  %v9096_v25 = vand.u32 4294901760, %v9095_v23  ;;  %v9127_v23 = vld [vmem:[#allocation32_spill] sm:$0xff] }
 0x117   : > { %1350 = vmatprep.subr.mxu1 %v6289_v39  ;;  %1405 = vmatprep.subr.mxu0 %v9063_v31  ;;  %v9097_v31 = vld [vmem:[#allocation22_spill] sm:$0xff] }
 0x118   : > { %1352 = vmatpush2.msra.mxu1 %v6307_v38  ;;  %1356 = vmatprep.mubr.f32.mxu1 %v9064_v21  ;;  %v397_v21 = vld [vmem:[#allocation2 + $0x360] sm:$0xff] }
 0x119   : > { %1409 = vmatpush1.msra.mxu0 %v9065_v61  ;;  %1360 = vmatmul.mubr.f32.vlgmr.msra.gmra.mxu1 %v9066_v35  ;;  %v9098_v61 = vld [vmem:[#allocation47_spill] sm:$0xff] }
 0x11a   : > { %1413 = vmatprep.subr.mxu0 %v9067_v32  ;;  %1652 = vmatprep.subr.mxu1 %v5527_v3  ;;  %v9071_v3 = vand.u32 4294901760, %v5702_v57  ;;  %v9085_v57 = vld [vmem:[#allocation18_spill] sm:$0xff]  ;;  %v9099_v32 = vand.u32 4294901760, %v9098_v61 }
 0x11b   : > { %1417 = vmatpush1.msra.mxu0 %v9068_v40  ;;  %1654 = vmatpush1.msra.mxu1 %v5529_v4  ;;  %v9072_v4 = vand.u32 4294901760, %v5714_v6  ;;  %v9089_v6 = vld [vmem:[#allocation41_spill] sm:$0xff]  ;;  %v9100_v40 = vld [vmem:[#allocation23_spill] sm:$0xff]  ;;  %v9130_v61 = vld [vmem:[#allocation34_spill] sm:$0xff] }
 0x11c   : > { %1421 = vmatprep.subr.mxu0 %v9069_v45  ;;  %1656 = vmatprep.subr.mxu1 %v5531_v5  ;;  %v9073_v5 = vand.u32 4294901760, %v5735_v54  ;;  %v9101_v45 = vld [vmem:[#allocation49_spill] sm:$0xff] }
 0x11d   : > { %1368 = vmatprep.mubr.f32.mxu1 %v6517_v29  ;;  %1425 = vmatpush1.msra.mxu0 %v9070_v59  ;;  %v9102_v59 = vand.u32 4294901760, %v9101_v45  ;;  %v9133_v45 = vld [vmem:[#allocation36_spill] sm:$0xff] }
 0x11e   : > { %1658 = vmatpush1.msra.mxu1 %v5533_v9  ;;  %1429 = vmatprep.subr.mxu0 %v9071_v3  ;;  %v9075_v9 = vand.u32 4294901760, %v5766_v55  ;;  %v9090_v55 = vand.u32 4294901760, %v9089_v6  ;;  %v9103_v3 = vld [vmem:[#allocation24_spill] sm:$0xff]  ;;  %v9121_v6 = vld [vmem:[#allocation30_spill] sm:$0xff] }
 0x11f   : > { %1372 = vmatmul.mubr.f32.gmra.mxu1 %v6524_v19  ;;  %1660 = vmatprep.subr.mxu1 %v5535_v10  ;;  %v9076_v10 = vand.u32 4294901760, %v5779_v58  ;;  %v9091_v58 = vld [vmem:[#allocation20_spill] sm:$0xff] }
 0x120   : > { %1433 = vmatpush1.msra.mxu0 %v9072_v4  ;;  %1662 = vmatpush1.msra.mxu1 %v5537_v11  ;;  %v9077_v11 = vand.u32 4294901760, %v5791_v60  ;;  %v9104_v4 = vld [vmem:[#allocation51_spill] sm:$0xff] }
 0x121   : > { %1437 = vmatprep.subr.mxu0 %v9073_v5  ;;  %1664 = vmatprep.subr.mxu1 %v5540_v15  ;;  %v9078_v15 = vand.u32 4294901760, %v8968_v34  ;;  %v9105_v5 = vand.u32 4294901760, %v9104_v4  ;;  %v9136_v4 = vld [vmem:[#allocation38_spill] sm:$0xff] }
 0x122   : > { %1441 = vmatpush1.msra.mxu0 %v9074_v0  ;;  %1666 = vmatpush1.msra.mxu1 %v5542_v16  ;;  %v9080_v16 = vld [vmem:[#allocation35_spill] sm:$0xff]  ;;  %v9106_v0 = vld [vmem:[#allocation25_spill] sm:$0xff] }
 0x123   : > { %1445 = vmatprep.subr.mxu0 %v9075_v9  ;;  %1668 = vmatprep.subr.mxu1 %v5544_v17  ;;  %v9081_v42 = vand.u32 4294901760, %v9080_v16  ;;  %v9083_v17 = vld [vmem:[#allocation37_spill] sm:$0xff]  ;;  %v9112_v16 = vld [vmem:[#allocation27_spill] sm:$0xff] }
 0x124   : > { %1449 = vmatpush1.msra.mxu0 %v9076_v10  ;;  %1670 = vmatpush1.msra.mxu1 %v5557_v22  ;;  %v9084_v54 = vand.u32 4294901760, %v9083_v17  ;;  %v9086_v22 = vld [vmem:[#allocation39_spill] sm:$0xff]  ;;  %v9107_v9 = vld [vmem:[#allocation53_spill] sm:$0xff]  ;;  %v9115_v17 = vld [vmem:[#allocation28_spill] sm:$0xff] }
 0x125   : > { %1453 = vmatprep.subr.mxu0 %v9077_v11  ;;  %1672 = vmatprep.subr.mxu1 %v8967_v26  ;;  %v9087_v60 = vand.u32 4294901760, %v9086_v22  ;;  %v9092_v26 = vld [vmem:[#allocation43_spill] sm:$0xff]  ;;  %v9108_v10 = vand.u32 4294901760, %v9107_v9  ;;  %v9109_v11 = vld [vmem:[#allocation26_spill] sm:$0xff]  ;;  %v9118_v22 = vld [vmem:[#allocation29_spill] sm:$0xff] }
 0x126   : > { %1457 = vmatpush1.msra.mxu0 %v9078_v15  ;;  %1674 = vmatpush1.msra.mxu1 %v9079_v8  ;;  %v9093_v34 = vand.u32 4294901760, %v9092_v26  ;;  %v9110_v15 = vld [vmem:[#allocation55_spill] sm:$0xff]  ;;  %v9139_v9 = vld [vmem:[#allocation40_spill] sm:$0xff] }
 0x127   : > { %1461 = vmatprep.subr.mxu0 %v9081_v42  ;;  %1676 = vmatprep.subr.mxu1 %v9082_v48  ;;  %v9111_v8 = vand.u32 4294901760, %v9110_v15  ;;  %v9113_v42 = vld [vmem:[#allocation57_spill] sm:$0xff]  ;;  %v9124_v26 = vld [vmem:[#allocation31_spill] sm:$0xff]  ;;  %v9142_v15 = vld [vmem:[#allocation42_spill] sm:$0xff] }
 0x128   : > { %1465 = vmatpush1.msra.mxu0 %v9084_v54  ;;  %1678 = vmatpush1.msra.mxu1 %v9085_v57  ;;  %v9114_v48 = vand.u32 4294901760, %v9113_v42  ;;  %v9116_v54 = vld [vmem:[#allocation59_spill] sm:$0xff]  ;;  %v9145_v42 = vld [vmem:[#allocation44_spill] sm:$0xff] }
 0x129   : > { %1469 = vmatprep.subr.mxu0 %v9087_v60  ;;  %1680 = vmatprep.subr.mxu1 %v9088_v63  ;;  %v9117_v57 = vand.u32 4294901760, %v9116_v54  ;;  %v9119_v60 = vld [vmem:[#allocation61_spill] sm:$0xff]  ;;  %v9148_v54 = vld [vmem:[#allocation46_spill] sm:$0xff] }
 0x12a   : > { %1473 = vmatpush1.msra.mxu0 %v9090_v55  ;;  %1682 = vmatpush1.msra.mxu1 %v9091_v58  ;;  %v9120_v63 = vand.u32 4294901760, %v9119_v60  ;;  %v9122_v55 = vld [vmem:[#allocation63_spill] sm:$0xff]  ;;  %v9151_v60 = vld [vmem:[#allocation48_spill] sm:$0xff] }
 0x12b   : > { %1477 = vmatprep.subr.mxu0 %v9093_v34  ;;  %1684 = vmatprep.subr.mxu1 %v9094_v49  ;;  %v9123_v58 = vand.u32 4294901760, %v9122_v55  ;;  %v9125_v34 = vld [vmem:[#allocation65_spill] sm:$0xff]  ;;  %v9154_v55 = vld [vmem:[#allocation50_spill] sm:$0xff] }
 0x12c   : > { %1481 = vmatpush1.msra.mxu0 %v9096_v25  ;;  %1686 = vmatpush1.msra.mxu1 %v9097_v31  ;;  %v9126_v49 = vand.u32 4294901760, %v9125_v34  ;;  %v9128_v25 = vld [vmem:[#allocation67_spill] sm:$0xff]  ;;  %v9157_v34 = vld [vmem:[#allocation52_spill] sm:$0xff] }
 0x12d   : > { %1485 = vmatprep.subr.mxu0 %v9099_v32  ;;  %1688 = vmatprep.subr.mxu1 %v9100_v40  ;;  %v9129_v31 = vand.u32 4294901760, %v9128_v25  ;;  %v9131_v32 = vld [vmem:[#allocation69_spill] sm:$0xff] }
 0x12e   : > { %1489 = vmatpush1.msra.mxu0 %v9102_v59  ;;  %1690 = vmatpush1.msra.mxu1 %v9103_v3  ;;  %v9132_v40 = vand.u32 4294901760, %v9131_v32  ;;  %v9134_v59 = vld [vmem:[#allocation71_spill] sm:$0xff]  ;;  %v431_v25 = vld [vmem:[#allocation2 + $0x470] sm:$0xff] }
 0x12f   : > { %1493 = vmatprep.subr.mxu0 %v9105_v5  ;;  %1692 = vmatprep.subr.mxu1 %v9106_v0  ;;  %v9135_v3 = vand.u32 4294901760, %v9134_v59  ;;  %v9137_v5 = vld [vmem:[#allocation73_spill] sm:$0xff] }
 0x130   : > { %1497 = vmatpush1.msra.mxu0 %v9108_v10  ;;  %1694 = vmatpush1.msra.mxu1 %v9109_v11  ;;  %v9138_v0 = vand.u32 4294901760, %v9137_v5  ;;  %v9140_v10 = vld [vmem:[#allocation75_spill] sm:$0xff]  ;;  %v9167_v5 = vld [vmem:[#allocation92_spill] sm:$0xff] }
 0x131   : > { %1501 = vmatprep.subr.mxu0 %v9111_v8  ;;  %1696 = vmatprep.subr.mxu1 %v9112_v16  ;;  %v9141_v11 = vand.u32 4294901760, %v9140_v10  ;;  %v9143_v8 = vld [vmem:[#allocation77_spill] sm:$0xff]  ;;  %v9169_v10 = vld [vmem:[#allocation60_spill] sm:$0xff] }
 0x132   : > { %1505 = vmatpush1.msra.mxu0 %v9114_v48  ;;  %1698 = vmatpush1.msra.mxu1 %v9115_v17  ;;  %v9144_v16 = vand.u32 4294901760, %v9143_v8  ;;  %v9146_v48 = vld [vmem:[#allocation79_spill] sm:$0xff]  ;;  %v9172_v8 = vld [vmem:[#allocation96_spill] sm:$0xff] }
 0x133   : > { %1509 = vmatprep.subr.mxu0 %v9117_v57  ;;  %1700 = vmatprep.subr.mxu1 %v9118_v22  ;;  %v9147_v17 = vand.u32 4294901760, %v9146_v48  ;;  %v9149_v57 = vld [vmem:[#allocation81_spill] sm:$0xff] }
 0x134   : > { %1513 = vmatpush2.msra.mxu0 %v9120_v63  ;;  %1702 = vmatpush1.msra.mxu1 %v9121_v6  ;;  %v9150_v22 = vand.u32 4294901760, %v9149_v57  ;;  %v9152_v63 = vld [vmem:[#allocation83_spill] sm:$0xff]  ;;  %v428_v48 = vld [vmem:[#allocation2 + $0x458] sm:$0xff] }
 0x135   : > { %1517 = vmatprep.subr.mxu0 %v9123_v58  ;;  %1704 = vmatprep.subr.mxu1 %v9124_v26  ;;  %v9153_v6 = vand.u32 4294901760, %v9152_v63  ;;  %v9155_v58 = vld [vmem:[#allocation85_spill] sm:$0xff] }
 0x136   : > { %1521 = vmatpush2.msra.mxu0 %v9126_v49  ;;  %1706 = vmatpush1.msra.mxu1 %v9127_v23  ;;  %v9156_v26 = vand.u32 4294901760, %v9155_v58  ;;  %v9158_v49 = vld [vmem:[#allocation87_spill] sm:$0xff] }
 0x137   : > { %1525 = vmatprep.subr.mxu0 %v9129_v31  ;;  %1708 = vmatprep.subr.mxu1 %v9130_v61  ;;  %v9159_v23 = vand.u32 4294901760, %v9158_v49  ;;  %v9160_v31 = vld [vmem:[#allocation54_spill] sm:$0xff]  ;;  %v9161_v61 = vld [vmem:[#allocation89_spill] sm:$0xff]  ;;  %v9182_v49 = vand.u32 4294901760, %v6311_v47 }
 0x138   : > { %1529 = vmatpush2.msra.mxu0 %v9132_v40  ;;  %1710 = vmatpush1.msra.mxu1 %v9133_v45  ;;  %v9162_v32 = vand.u32 4294901760, %v9161_v61  ;;  %v9163_v40 = vld [vmem:[#allocation56_spill] sm:$0xff]  ;;  %v9164_v45 = vld [vmem:[#allocation91_spill] sm:$0xff] }
 0x139   : > { %1533 = vmatprep.subr.mxu0 %v9135_v3  ;;  %1712 = vmatprep.subr.mxu1 %v9136_v4  ;;  %v9165_v59 = vand.u32 4294901760, %v9164_v45  ;;  %v430_v3 = vld [vmem:[#allocation2 + $0x468] sm:$0xff]  ;;  %v9166_v4 = vld [vmem:[#allocation58_spill] sm:$0xff] }
 0x13a   : > { %1537 = vmatpush2.msra.mxu0 %v9138_v0  ;;  %1714 = vmatpush1.msra.mxu1 %v9139_v9  ;;  %v9168_v0 = vand.u32 4294901760, %v9167_v5  ;;  %v6724_v9 = vand.u32 4294901760, %v431_v25  ;;  %v422_v61 = vld [vmem:[#allocation2 + $0x428] sm:$0xff]  ;;  %v419_v5 = vld [vmem:[#allocation2 + $0x410] sm:$0xff] }
 0x13b   : > { %1541 = vmatprep.subr.mxu0 %v9141_v11  ;;  %1716 = vmatprep.subr.mxu1 %v9142_v15  ;;  %v9170_v11 = vand.u32 4294901760, %v9036_v24  ;;  %v9171_v15 = vld [vmem:[#allocation62_spill] sm:$0xff]  ;;  %v427_v24 = vld [vmem:[#allocation2 + $0x450] sm:$0xff] }
 0x13c   : > { %1545 = vmatpush2.msra.mxu0 %v9144_v16  ;;  %1718 = vmatpush2.msra.mxu1 %v9145_v42  ;;  %v9173_v16 = vand.u32 4294901760, %v9172_v8  ;;  %v6732_v42 = vand.u32 4294901760, %v430_v3 }
 0x13d   : > { %1549 = vmatprep.subr.mxu0 %v9147_v17  ;;  %1720 = vmatprep.subr.mxu1 %v9148_v54  ;;  %v9174_v17 = vld [vmem:[#allocation64_spill] sm:$0xff]  ;;  %v9175_v54 = vld [vmem:[#allocation98_spill] sm:$0xff] }
 0x13e   : > { %1553 = vmatpush2.msra.mxu0 %v9150_v22  ;;  %1722 = vmatpush2.msra.mxu1 %v9151_v60  ;;  %v9176_v57 = vand.u32 4294901760, %v9175_v54  ;;  %v9177_v22 = vld [vmem:[#allocation66_spill] sm:$0xff]  ;;  %v9178_v60 = vld [vmem:[#allocation99_spill] sm:$0xff] }
 0x13f   : > { %1557 = vmatprep.subr.mxu0 %v9153_v6  ;;  %1724 = vmatprep.subr.mxu1 %v9154_v55  ;;  %v9179_v63 = vand.u32 4294901760, %v9178_v60  ;;  %v6741_v6 = vsub.f32 %v431_v25, %v6724_v9  ;;  %v9180_v55 = vld [vmem:[#allocation100_spill] sm:$0xff]  ;;  %v6757_v25 = vand.u32 4294901760, %v427_v24 }
 0x140   : > { %1561 = vmatpush2.msra.mxu0 %v9156_v26  ;;  %1726 = vmatpush2.msra.mxu1 %v9157_v34  ;;  %v9181_v58 = vand.u32 4294901760, %v9180_v55  ;;  %v6746_v26 = vand.u32 4294901760, %v428_v48  ;;  %v425_v34 = vld [vmem:[#allocation2 + $0x440] sm:$0xff] }
 0x141   : > { %1565 = vmatprep.subr.mxu0 %v9159_v23  ;;  %1728 = vmatprep.subr.mxu1 %v9160_v31  ;;  %v6752_v23 = vsub.f32 %v430_v3, %v6732_v42  ;;  %v424_v31 = vld [vmem:[#allocation2 + $0x438] sm:$0xff]  ;;  %v6762_v47 = vand.u32 4294901760, %v425_v34  ;;  %v8674_v45 = vand.u32 4294901760, %v6741_v6  ;;  %v6785_v8 = vsub.f32 %v427_v24, %v6757_v25 }
 0x142   : > { %1569 = vmatpush2.msra.mxu0 %v9162_v32  ;;  %1730 = vmatpush2.msra.mxu1 %v9163_v40  ;;  %v421_v32 = vld [vmem:[#allocation2 + $0x420] sm:$0xff]  ;;  %v9186_v3 = vld [vmem:[#allocation105_spill] sm:$0xff]  ;;  %v9199_v24 = vand.u32 4294901760, %v6403_v62 }
 0x143   : > { %1573 = vmatprep.subr.mxu0 %v9165_v59  ;;  %1732 = vmatprep.subr.mxu1 %v9166_v4  ;;  %v9184_v40 = vld [vmem:[#allocation74_spill] sm:$0xff]  ;;  %v418_v59 = vld [vmem:[#allocation2 + $0x408] sm:$0xff]  ;;  %v6770_v4 = vand.u32 4294901760, %v422_v61  ;;  %v6802_v54 = vsub.f32 %v425_v34, %v6762_v47  ;;  %v8675_v62 = vand.u32 4294901760, %v6785_v8 }
 0x144   : > { %1577 = vmatpush2.msra.mxu0 %v9168_v0  ;;  %1734 = vmatpush2.msra.mxu1 %v9169_v10  ;;  %v416_v0 = vld [vmem:[#allocation2 + $0x3f8] sm:$0xff]  ;;  %v6773_v10 = vsub.f32 %v428_v48, %v6746_v26  ;;  %v415_v48 = vld [vmem:[#allocation2 + $0x3f0] sm:$0xff] }
 0x145   : > { %1581 = vmatprep.subr.mxu0 %v9170_v11  ;;  %1736 = vmatprep.subr.mxu1 %v9171_v15  ;;  %9188 = vst [vmem:[#allocation70_spill] sm:$0xff] %v6770_v4  ;;  %v6778_v11 = vand.u32 4294901760, %v421_v32  ;;  %v9191_v15 = vand.u32 4294901760, %v6373_v1  ;;  %v6799_v1 = vand.u32 4294901760, %v416_v0  ;;  %v6812_v60 = vsub.f32 %v422_v61, %v6770_v4  ;;  %v412_v34 = vld [vmem:[#allocation2 + $0x3d8] sm:$0xff] }
 0x146   : > { %1585 = vmatpush2.msra.mxu0 %v9173_v16  ;;  %1738 = vmatpush2.msra.mxu1 %v9174_v17  ;;  %v6787_v16 = vand.u32 4294901760, %v418_v59  ;;  %v413_v17 = vld [vmem:[#allocation2 + $0x3e0] sm:$0xff] }
 0x147   : > { %1589 = vmatprep.subr.mxu0 %v9176_v57  ;;  %1740 = vmatprep.subr.mxu1 %v9177_v22  ;;  %9190 = vst [vmem:[#allocation72_spill] sm:$0xff] %v6778_v11  ;;  %9195 = vst [vmem:[#allocation80_spill] sm:$0xff] %v6799_v1  ;;  %v9196_v57 = vld [vmem:[#allocation84_spill] sm:$0xff]  ;;  %v8672_v22 = vand.u32 4294901760, %v6773_v10  ;;  %v6818_v55 = vsub.f32 %v421_v32, %v6778_v11  ;;  %v6833_v61 = vand.u32 4294901760, %v413_v17  ;;  %v9203_v32 = vld [vmem:[#allocation102_spill] sm:$0xff] }
 0x148   : > { %1593 = vmatpush2.msra.mxu0 %v9179_v63  ;;  %1742 = vmatpush2.msra.mxu1 %v9041_v2  ;;  %v9183_v2 = vand.u32 4294901760, %v6323_v20  ;;  %v6768_v20 = vand.u32 4294901760, %v424_v31  ;;  %9192 = vst [vmem:[#allocation76_spill] sm:$0xff] %v6787_v16  ;;  %v9198_v63 = vld [vmem:[#allocation86_spill] sm:$0xff] }
 0x149   : > { %1597 = vmatprep.subr.mxu0 %v9181_v58  ;;  %1744 = vmatprep.subr.mxu1 %v9042_v14  ;;  %v9185_v14 = vand.u32 4294901760, %v6336_v27  ;;  %v9189_v27 = vand.u32 4294901760, %v6356_v13  ;;  %v9193_v13 = vand.u32 4294901760, %v6382_v53  ;;  %v6825_v58 = vand.u32 4294901760, %v415_v48  ;;  %9202 = vst [vmem:[#allocation88_spill] sm:$0xff] %v6833_v61 }
 0x14a   : > { %1601 = vmatpush2.msra.mxu0 %v9182_v49  ;;  %1746 = vmatpush2.msra.mxu1 %v9044_v44  ;;  %v9187_v44 = vand.u32 4294901760, %v9186_v3  ;;  %v6808_v53 = vsub.f32 %v424_v31, %v6768_v20  ;;  %v9201_v49 = vld [vmem:[#allocation101_spill] sm:$0xff]  ;;  %v6830_v31 = vsub.f32 %v418_v59, %v6787_v16  ;;  %v8676_v3 = vand.u32 4294901760, %v6802_v54 }
 0x14b   : > { %1605 = vmatprep.subr.mxu0 %v9183_v2  ;;  %1748 = vmatprep.subr.mxu1 %v9184_v40  ;;  %9200 = vst [vmem:[#allocation82_spill] sm:$0xff] %v6825_v58  ;;  %v410_v2 = vld [vmem:[#allocation2 + $0x3c8] sm:$0xff]  ;;  %v9204_v40 = vld [vmem:[#allocation90_spill] sm:$0xff]  ;;  %v6850_v59 = vsub.f32 %v6773_v10, %v8672_v22 }
 0x14c   : > { %1609 = vmatpush2.msra.mxu0 %v9185_v14  ;;  %1750 = vmatpush2.msra.mxu1 %v9047_v41  ;;  %v8673_v41 = vand.u32 4294901760, %v6752_v23  ;;  %v8680_v22 = vand.u32 4294901760, %v6830_v31 }
 0x14d   : > { %1613 = vmatprep.subr.mxu0 %v9187_v44  ;;  %1752 = vmatprep.subr.mxu1 %v9048_v46  ;;  %v6792_v46 = vand.u32 4294901760, %v419_v5  ;;  %v409_v44 = vld [vmem:[#allocation2 + $0x3c0] sm:$0xff] }
 0x14e   : > { %1617 = vmatpush2.msra.mxu0 %v9189_v27  ;;  %1754 = vmatpush2.msra.mxu1 %v9049_v52  ;;  %v6797_v52 = vsub.f32 %v6741_v6, %v8674_v45 }
 0x14f   : > { %1621 = vmatprep.subr.mxu0 %v9191_v15  ;;  %1756 = vmatprep.subr.mxu1 %v9050_v28  ;;  %9194 = vst [vmem:[#allocation78_spill] sm:$0xff] %v6792_v46  ;;  %v9197_v28 = vand.u32 4294901760, %v6395_v33  ;;  %v6823_v33 = vsub.f32 %v6752_v23, %v8673_v41  ;;  %v6840_v27 = vsub.f32 %v419_v5, %v6792_v46  ;;  %v6852_v15 = vand.u32 4294901760, %v412_v34  ;;  %v407_v5 = vld [vmem:[#allocation2 + $0x3b0] sm:$0xff] }
 0x150   : > { %1625 = vmatpush2.msra.mxu0 %v9193_v13  ;;  %1758 = vmatpush2.msra.mxu1 %v9196_v57  ;;  %v8677_v13 = vand.u32 4294901760, %v6808_v53  ;;  %v8678_v57 = vand.u32 4294901760, %v6812_v60  ;;  %v6883_v41 = vsub.f32 %v6802_v54, %v8676_v3  ;;  %v6885_v45 = vand.u32 4294901760, %v407_v5 }
 0x151   : > { %1629 = vmatprep.subr.mxu0 %v9197_v28  ;;  %1760 = vmatprep.subr.mxu1 %v9198_v63  ;;  %9205 = vst [vmem:[#allocation93_spill] sm:$0xff] %v6852_v15  ;;  %v6862_v28 = vand.u32 4294901760, %v410_v2  ;;  %v8679_v63 = vand.u32 4294901760, %v6818_v55  ;;  %v9217_v56 = vand.u32 4294901760, %v6797_v52 }
 0x152   : > { %1633 = vmatpush2.msra.mxu0 %v9199_v24  ;;  %1635 = vmatprep.mubr.f32.mxu0 %v9201_v49  ;;  %v406_v24 = vld [vmem:[#allocation2 + $0x3a8] sm:$0xff]  ;;  %9208 = vst [vmem:[#allocation16_spill] sm:$0xff] %v6885_v45  ;;  %v6902_v3 = vsub.f32 %v6812_v60, %v8678_v57  ;;  %v6944_v19 = vsub.f32 %v407_v5, %v6885_v45 }
 0x153   : > { %1762 = vmatpush2.msra.mxu1 %v9053_v50  ;;  %1637 = vmatmul.mubr.f32.vlgmr.msra.gmra.mxu0 %v9203_v32  ;;  %v6843_v50 = vsub.f32 %v416_v0, %v6799_v1  ;;  %9206 = vst [vmem:[#allocation95_spill] sm:$0xff] %v6862_v28  ;;  %v6904_v14 = vand.u32 4294901760, %v406_v24  ;;  %v6916_v0 = vsub.f32 %v410_v2, %v6862_v28  ;;  %v1943_v2 = vand.u32 4294901760, %v6883_v41 }
 0x154   : > { %1764 = vmatprep.subr.mxu1 %v9204_v40  ;;  %1797 = vmatprep.subr.mxu0 %v6724_v9  ;;  %v6870_v40 = vsub.f32 %v6785_v8, %v8675_v62  ;;  %v8682_v62 = vand.u32 4294901760, %v6840_v27  ;;  %9213 = vst [vmem:[#allocation18_spill] sm:$0xff] %v6944_v19  ;;  %v1955_v41 = vand.u32 4294901760, %v6902_v3  ;;  %v400_v3 = vld [vmem:[#allocation2 + $0x378] sm:$0xff] }
 0x155   : > { %1766 = vmatpush2.msra.mxu1 %v6221_v37  ;;  %1799 = vmatpush1.msra.mxu0 %v6732_v42  ;;  %v6860_v37 = vsub.f32 %v415_v48, %v6825_v58  ;;  %v6876_v48 = vsub.f32 %v413_v17, %v6833_v61  ;;  %v6892_v17 = vsub.f32 %v412_v34, %v6852_v15 }
 0x156   : > { %1768 = vmatprep.subr.mxu1 %v9056_v30  ;;  %1801 = vmatprep.subr.mxu0 %v6746_v26  ;;  %v6872_v30 = vand.u32 4294901760, %v409_v44  ;;  %9209 = vst [vmem:[#allocation35_spill] sm:$0xff] %v6904_v14  ;;  %v6912_v34 = vsub.f32 %v6818_v55, %v8679_v63  ;;  %9210 = vst [vmem:[#allocation17_spill] sm:$0xff] %v6916_v0  ;;  %v1937_v57 = vand.u32 4294901760, %v6870_v40  ;;  %v404_v63 = vld [vmem:[#allocation2 + $0x398] sm:$0xff] }
 0x157   : > { %1643 = vmatprep.mubr.f32.mxu0 %v6490_v51  ;;  %1770 = vmatpush2.msra.mxu1 %v9059_v43  ;;  %v6897_v43 = vsub.f32 %v6808_v53, %v8677_v13  ;;  %v401_v13 = vld [vmem:[#allocation2 + $0x380] sm:$0xff]  ;;  %v9216_v35 = vand.u32 4294901760, %v6860_v37 }
 0x158   : > { %9207 = vst [vmem:[#allocation97_spill] sm:$0xff] %v6872_v30  ;;  %1803 = vmatpush1.msra.mxu0 %v6757_v25  ;;  %1772 = vmatprep.subr.mxu1 %v9060_v18  ;;  %v1931_v18 = vand.u32 4294901760, %v6850_v59  ;;  %v6927_v59 = vsub.f32 %v6830_v31, %v8680_v22  ;;  %v403_v22 = vld [vmem:[#allocation2 + $0x390] sm:$0xff]  ;;  %v1961_v5 = vand.u32 4294901760, %v6912_v34  ;;  %v9219_v34 = vand.u32 4294901760, %v6876_v48 }
 0x159   : > { %1645 = vmatmul.mubr.f32.gmra.mxu0 %v6496_v7  ;;  %1805 = vmatprep.subr.mxu0 %v6762_v47  ;;  %v6969_v12 = vand.u32 4294901760, %v403_v22  ;;  %v6982_v29 = vand.u32 4294901760, %v401_v13 }
 0x15a   : > { %1774 = vmatpush2.msra.mxu1 %v6276_v36  ;;  %1807 = vmatpush1.msra.mxu0 %v6768_v20  ;;  %v6922_v36 = vsub.f32 %v409_v44, %v6872_v30  ;;  %v9212_v44 = vand.u32 4294901760, %v6843_v50 }
 0x15b   : > { %1776 = vmatprep.subr.mxu1 %v6289_v39  ;;  %1809 = vmatprep.subr.mxu0 %v6770_v4  ;;  %v6936_v39 = vsub.f32 %v6840_v27, %v8682_v62  ;;  %v6951_v62 = vsub.f32 %v406_v24, %v6904_v14  ;;  %9218 = vst [vmem:[#allocation41_spill] sm:$0xff] %v6969_v12  ;;  %v9220_v24 = vand.u32 4294901760, %v6823_v33  ;;  %9221 = vst [vmem:[#allocation20_spill] sm:$0xff] %v6982_v29 }
 0x15c   : > { %9211 = vst [vmem:[#allocation37_spill] sm:$0xff] %v6922_v36  ;;  %1778 = vmatpush2.msra.mxu1 %v6307_v38  ;;  %v6941_v40 = vsub.f32 %v6843_v50, %v9212_v44  ;;  %1780 = vmatprep.mubr.f32.mxu1 %v9201_v49  ;;  %v1949_v38 = vand.u32 4294901760, %v6897_v43  ;;  %v6957_v44 = vand.u32 4294901760, %v404_v63  ;;  %v6962_v43 = vsub.f32 %v6860_v37, %v9216_v35  ;;  %v398_v35 = vld [vmem:[#allocation2 + $0x368] sm:$0xff] }
 0x15d   : > { %1811 = vmatpush1.msra.mxu0 %v6778_v11  ;;  %9214 = vst [vmem:[#allocation39_spill] sm:$0xff] %v6951_v62  ;;  %1782 = vmatmul.mubr.f32.vlgmr.msra.gmra.mxu1 %v9203_v32  ;;  %v6974_v32 = vsub.f32 %v6876_v48, %v9219_v34  ;;  %v6986_v34 = vand.u32 4294901760, %v400_v3  ;;  %v9223_v49 = vand.u32 4294901760, %v6892_v17  ;;  %v7012_v52 = vsub.f32 %v403_v22, %v6969_v12 }
 0x15e   : > { %1813 = vmatprep.subr.mxu0 %v6792_v46  ;;  %9215 = vst [vmem:[#allocation19_spill] sm:$0xff] %v6957_v44  ;;  %1920 = vmatprep.subr.mxu1 %v9217_v56  ;;  %v1967_v56 = vand.u32 4294901760, %v6936_v39  ;;  %v394_v46 = vld [vmem:[#allocation2 + $0x348] sm:$0xff]  ;;  %v395_v39 = vld [vmem:[#allocation2 + $0x350] sm:$0xff] }
 0x15f   : > { %1815 = vmatpush1.msra.mxu0 %v6787_v16  ;;  %1926 = vmatpush1.msra.mxu1 %v9220_v24  ;;  %9222 = vst [vmem:[#allocation43_spill] sm:$0xff] %v6986_v34  ;;  %v6991_v33 = vsub.f32 %v6892_v17, %v9223_v49  ;;  %v6993_v24 = vand.u32 4294901760, %v397_v21  ;;  %v6999_v16 = vand.u32 4294901760, %v398_v35  ;;  %v7007_v49 = vsub.f32 %v404_v63, %v6957_v44 }
 0x160   : > { %1817 = vmatprep.subr.mxu0 %v6799_v1  ;;  %1932 = vmatprep.subr.mxu1 %v1931_v18  ;;  %v285_v1 = vld [vmem:[%s5521_s22 + $0x10] sm:$0xff]  ;;  %v1985_v18 = vand.u32 4294901760, %v6962_v43  ;;  %v9227_v43 = vand.u32 4294901760, %v6922_v36  ;;  %v7020_v4 = vand.u32 4294901760, %v394_v46  ;;  %v7023_v63 = vand.u32 4294901760, %v395_v39 }
 0x161   : > { %1788 = vmatprep.mubr.f32.mxu1 %v6490_v51  ;;  %9224 = vst [vmem:[#allocation21_spill] sm:$0xff] %v6993_v24  ;;  %1819 = vmatpush1.msra.mxu0 %v6825_v58  ;;  %9225 = vst [vmem:[#allocation45_spill] sm:$0xff] %v6999_v16  ;;  %v9226_v51 = vand.u32 4294901760, %v6916_v0 }
 0x162   : > { %1938 = vmatpush1.msra.mxu1 %v1937_v57  ;;  %1821 = vmatprep.subr.mxu0 %v6833_v61  ;;  %v1991_v57 = vand.u32 4294901760, %v6974_v32  ;;  %v7018_v58 = vsub.f32 %v6922_v36, %v9227_v43  ;;  %v391_v61 = vld [vmem:[#allocation2 + $0x330] sm:$0xff]  ;;  %v7031_v32 = vsub.f32 %v401_v13, %v6982_v29  ;;  %v7033_v43 = vand.u32 4294901760, %v285_v1 }
 0x163   : > { %v7004_v11 = vsub.f32 %v6916_v0, %v9226_v51  ;;  %1790 = vmatmul.mubr.f32.gmra.mxu1 %v6496_v7  ;;  %v392_v51 = vld [vmem:[#allocation2 + $0x338] sm:$0xff]  ;;  %1944 = vmatprep.subr.mxu1 %v1943_v2  ;;  %v9228_v7 = vand.u32 4294901760, %v6944_v19  ;;  %v7037_v2 = vsub.f32 %v400_v3, %v6986_v34  ;;  %v7041_v36 = vsub.f32 %v397_v21, %v6993_v24  ;;  %v385_v0 = vld [vmem:[#allocation2 + $0x300] sm:$0xff] }
 0x164   : > { %1823 = vmatpush1.msra.mxu0 %v6852_v15  ;;  %9229 = vst [vmem:[#allocation22_spill] sm:$0xff] %v7033_v43  ;;  %1950 = vmatpush1.msra.mxu1 %v1949_v38  ;;  %v1997_v15 = vand.u32 4294901760, %v6991_v33  ;;  %v7050_v38 = vand.u32 4294901760, %v392_v51  ;;  %v7054_v33 = vsub.f32 %v398_v35, %v6999_v16  ;;  %v288_v21 = vld [vmem:[%s5521_s22 + $0x28] sm:$0xff] }
 0x165   : > { %v7028_v22 = vsub.f32 %v6944_v19, %v9228_v7  ;;  %1825 = vmatprep.subr.mxu0 %v6862_v28  ;;  %v9230_v7 = vand.u32 4294901760, %v6951_v62  ;;  %1956 = vmatprep.subr.mxu1 %v1955_v41  ;;  %v2003_v13 = vand.u32 4294901760, %v7004_v11  ;;  %v389_v28 = vld [vmem:[#allocation2 + $0x320] sm:$0xff]  ;;  %v7060_v41 = vsub.f32 %v394_v46, %v7020_v4 }
 0x166   : > { %1827 = vmatpush1.msra.mxu0 %v6872_v30  ;;  %1962 = vmatpush1.msra.mxu1 %v1961_v5  ;;  %v7062_v30 = vand.u32 4294901760, %v391_v61  ;;  %v386_v5 = vld [vmem:[#allocation2 + $0x308] sm:$0xff]  ;;  %v7072_v46 = vsub.f32 %v395_v39, %v7023_v63  ;;  %v7078_v11 = vand.u32 4294901760, %v389_v28  ;;  %v7081_v3 = vand.u32 4294901760, %v288_v21 }
 0x167   : > { %v7046_v19 = vsub.f32 %v6951_v62, %v9230_v7  ;;  %1829 = vmatprep.subr.mxu0 %v6885_v45  ;;  %v2009_v7 = vand.u32 4294901760, %v7018_v58  ;;  %9231 = vst [vmem:[#allocation47_spill] sm:$0xff] %v7060_v41  ;;  %v388_v62 = vld [vmem:[#allocation2 + $0x318] sm:$0xff]  ;;  %1968 = vmatprep.subr.mxu1 %v1967_v56  ;;  %v2015_v35 = vand.u32 4294901760, %v7028_v22  ;;  %v7069_v45 = vsub.f32 %v285_v1, %v7033_v43 }
 0x168   : > { %9232 = vst [vmem:[#allocation23_spill] sm:$0xff] %v7062_v30  ;;  %1831 = vmatpush1.msra.mxu0 %v6904_v14  ;;  %9234 = vst [vmem:[#allocation24_spill] sm:$0xff] %v7072_v46  ;;  %v9235_v58 = vand.u32 4294901760, %v6927_v59  ;;  %v9237_v14 = vand.u32 4294901760, %v6941_v40  ;;  %v9238_v1 = vand.u32 4294901760, %v7007_v49  ;;  %v7089_v39 = vand.u32 4294901760, %v388_v62 }
 0x169   : > { %9233 = vst [vmem:[#allocation49_spill] sm:$0xff] %v7069_v45  ;;  %1833 = vmatprep.subr.mxu0 %v6957_v44  ;;  %v2021_v56 = vand.u32 4294901760, %v7046_v19  ;;  %9236 = vst [vmem:[#allocation51_spill] sm:$0xff] %v7081_v3  ;;  %v7093_v19 = vsub.f32 %v392_v51, %v7050_v38  ;;  %v9240_v22 = vand.u32 4294901760, %v7012_v52  ;;  %v7099_v40 = vand.u32 4294901760, %v386_v5 }
 0x16a   : > { %1974 = vmatpush1.msra.mxu1 %v9235_v58  ;;  %1835 = vmatpush1.msra.mxu0 %v6969_v12  ;;  %v2026_v59 = vsub.f32 %v7007_v49, %v9238_v1  ;;  %v7101_v12 = vand.u32 4294901760, %v385_v0  ;;  %v7106_v58 = vsub.f32 %v391_v61, %v7062_v30  ;;  %v9243_v1 = vand.u32 4294901760, %v7037_v2 }
 0x16b   : > { %1980 = vmatprep.subr.mxu1 %v9237_v14  ;;  %9239 = vst [vmem:[#allocation25_spill] sm:$0xff] %v7093_v19  ;;  %1837 = vmatprep.subr.mxu0 %v6982_v29  ;;  %v2032_v14 = vsub.f32 %v7012_v52, %v9240_v22  ;;  %v7112_v29 = vand.u32 4294901760, %v7069_v45  ;;  %v7121_v61 = vsub.f32 %v288_v21, %v7081_v3  ;;  %v9245_v22 = vand.u32 4294901760, %v7054_v33 }
 0x16c   : > { %1986 = vmatpush1.msra.mxu1 %v1985_v18  ;;  %1839 = vmatpush1.msra.mxu0 %v6986_v34  ;;  %v9241_v18 = vand.u32 4294901760, %v7031_v32  ;;  %v8736_v34 = vand.u32 4294901760, %v7060_v41  ;;  %v7124_v44 = vsub.f32 %v389_v28, %v7078_v11  ;;  %v7136_v28 = vsub.f32 %v385_v0, %v7101_v12 }
 0x16d   : > { %1992 = vmatprep.subr.mxu1 %v1991_v57  ;;  %9242 = vst [vmem:[#allocation53_spill] sm:$0xff] %v7112_v29  ;;  %1841 = vmatprep.subr.mxu0 %v6999_v16  ;;  %v2044_v57 = vsub.f32 %v7037_v2, %v9243_v1  ;;  %9244 = vst [vmem:[#allocation26_spill] sm:$0xff] %v7121_v61  ;;  %v2050_v16 = vsub.f32 %v7054_v33, %v9245_v22  ;;  %v2033_v21 = vand.u32 4294901760, %v2032_v14 }
 0x16e   : > { %v2038_v51 = vsub.f32 %v7031_v32, %v9241_v18  ;;  %1998 = vmatpush1.msra.mxu1 %v1997_v15  ;;  %1843 = vmatpush1.msra.mxu0 %v6993_v24  ;;  %v2027_v18 = vand.u32 4294901760, %v2026_v59  ;;  %v7128_v15 = vsub.f32 %v388_v62, %v7089_v39  ;;  %9246 = vst [vmem:[#allocation55_spill] sm:$0xff] %v7136_v28  ;;  %v9248_v1 = vand.u32 4294901760, %v7072_v46 }
 0x16f   : > { %2004 = vmatprep.subr.mxu1 %v2003_v13  ;;  %1845 = vmatprep.subr.mxu0 %v7023_v63  ;;  %v9247_v13 = vand.u32 4294901760, %v7041_v36  ;;  %v7142_v62 = vsub.f32 %v386_v5, %v7099_v40  ;;  %v7156_v5 = vand.u32 4294901760, %v7121_v61 }
 0x170   : > { %2010 = vmatpush1.msra.mxu1 %v2009_v7  ;;  %1847 = vmatpush1.msra.mxu0 %v7020_v4  ;;  %v2039_v22 = vand.u32 4294901760, %v2038_v51  ;;  %v1896_v7 = vsub.f32 %v7069_v45, %v7112_v29  ;;  %v2062_v14 = vsub.f32 %v7072_v46, %v9248_v1  ;;  %v2051_v29 = vand.u32 4294901760, %v2050_v16 }
 0x171   : > { %v2056_v59 = vsub.f32 %v7041_v36, %v9247_v13  ;;  %2016 = vmatprep.subr.mxu1 %v2015_v35  ;;  %1849 = vmatprep.subr.mxu0 %v7050_v38  ;;  %v2045_v13 = vand.u32 4294901760, %v2044_v57  ;;  %v2068_v35 = vsub.f32 %v7060_v41, %v8736_v34  ;;  %9249 = vst [vmem:[#allocation27_spill] sm:$0xff] %v7156_v5  ;;  %v9250_v1 = vand.u32 4294901760, %v7093_v19 }
 0x172   : > { %2022 = vmatpush1.msra.mxu1 %v2021_v56  ;;  %1851 = vmatpush1.msra.mxu0 %v7062_v30  ;;  %v8739_v0 = vand.u32 4294901760, %v7128_v15  ;;  %v7167_v51 = vand.u32 4294901760, %v1896_v7  ;;  %v9252_v16 = vand.u32 4294901760, %v7106_v58 }
 0x173   : > { %2028 = vmatprep.subr.mxu1 %v2027_v18  ;;  %v2074_v56 = vsub.f32 %v7093_v19, %v9250_v1  ;;  %1853 = vmatprep.subr.mxu0 %v7078_v11  ;;  %v2057_v57 = vand.u32 4294901760, %v2056_v59  ;;  %v2063_v18 = vand.u32 4294901760, %v2062_v14  ;;  %v8740_v1 = vand.u32 4294901760, %v7136_v28 }
 0x174   : > { %2034 = vmatpush1.msra.mxu1 %v2033_v21  ;;  %1855 = vmatpush1.msra.mxu0 %v7089_v39  ;;  %9251 = vst [vmem:[#allocation57_spill] sm:$0xff] %v7167_v51  ;;  %v2080_v30 = vsub.f32 %v7106_v58, %v9252_v16  ;;  %v2069_v21 = vand.u32 4294901760, %v2068_v35  ;;  %v1907_v59 = vsub.f32 %v7121_v61, %v7156_v5  ;;  %v8741_v16 = vmov 0.0  }
 0x175   : > { %2040 = vmatprep.subr.mxu1 %v2039_v22  ;;  %1857 = vmatprep.subr.mxu0 %v7099_v40  ;;  %v9253_v22 = vand.u32 4294901760, %v7124_v44  ;;  %v2075_v7 = vand.u32 4294901760, %v2074_v56  ;;  %v2092_v14 = vsub.f32 %v7128_v15, %v8739_v0 }
 0x176   : > { %2046 = vmatpush1.msra.mxu1 %v2045_v13  ;;  %1859 = vmatpush1.msra.mxu0 %v7101_v12  ;;  %v9254_v13 = vand.u32 4294901760, %v7142_v62  ;;  %v7192_v56 = vand.u32 4294901760, %v1907_v59  ;;  %v9259_v59 = vld [vmem:[#allocation72_spill] sm:$0xff] }
 0x177   : > { %v2086_v34 = vsub.f32 %v7124_v44, %v9253_v22  ;;  %2052 = vmatprep.subr.mxu1 %v2051_v29  ;;  %1892 = vmatprep.mubr.f32.mxu0 %v8741_v16  ;;  %v2081_v22 = vand.u32 4294901760, %v2080_v30  ;;  %v2104_v29 = vsub.f32 %v7136_v28, %v8740_v1  ;;  %v9269_v1 = vld [vmem:[#allocation97_spill] sm:$0xff] }
 0x178   : > { %2058 = vmatpush1.msra.mxu1 %v2057_v57  ;;  %v2098_v35 = vsub.f32 %v7142_v62, %v9254_v13  ;;  %1898 = vmatmul.mubr.f32.vlgmr.msra.gmra.mxu0 %v7167_v51  ;;  %9255 = vst [vmem:[#allocation28_spill] sm:$0xff] %v7192_v56  ;;  %v2093_v57 = vand.u32 4294901760, %v2092_v14  ;;  %v9261_v14 = vld [vmem:[#allocation78_spill] sm:$0xff]  ;;  %v9262_v13 = vld [vmem:[#allocation39_spill] sm:$0xff] }
 0x179   : > { %2064 = vmatprep.subr.mxu1 %v2063_v18  ;;  %2156 = vmatprep.subr.mxu0 %v6741_v6  ;;  %v2087_v0 = vand.u32 4294901760, %v2086_v34  ;;  %v2105_v30 = vand.u32 4294901760, %v2104_v29  ;;  %v9256_v34 = vld [vmem:[#allocation17_spill] sm:$0xff]  ;;  %v9265_v29 = vld [vmem:[#allocation82_spill] sm:$0xff]  ;;  %v9272_v51 = vld [vmem:[#allocation19_spill] sm:$0xff] }
 0x17a   : > { %2070 = vmatpush1.msra.mxu1 %v2069_v21  ;;  %2159 = vmatpush1.msra.mxu0 %v6752_v23  ;;  %v2099_v18 = vand.u32 4294901760, %v2098_v35  ;;  %v9258_v21 = vld [vmem:[#allocation37_spill] sm:$0xff]  ;;  %v9263_v35 = vld [vmem:[#allocation76_spill] sm:$0xff] }
 0x17b   : > { %2076 = vmatprep.subr.mxu1 %v2075_v7  ;;  %2162 = vmatprep.subr.mxu0 %v6773_v10  ;;  %v9260_v7 = vld [vmem:[#allocation18_spill] sm:$0xff] }
 0x17c   : > { %1903 = vmatprep.mubr.f32.mxu0 %v8741_v16  ;;  %2082 = vmatpush1.msra.mxu1 %v2081_v22  ;;  %v9264_v22 = vld [vmem:[#allocation80_spill] sm:$0xff] }
 0x17d   : > { %2165 = vmatpush1.msra.mxu0 %v6785_v8  ;;  %2088 = vmatprep.subr.mxu1 %v2087_v0  ;;  %v9257_v0 = vld [vmem:[#allocation70_spill] sm:$0xff] }
 0x17e   : > { %1909 = vmatmul.mubr.f32.gmra.mxu0 %v7192_v56  ;;  %2168 = vmatprep.subr.mxu0 %v6802_v54  ;;  %v9271_v56 = vld [vmem:[#allocation35_spill] sm:$0xff] }
 0x17f   : > { %2094 = vmatpush1.msra.mxu1 %v2093_v57  ;;  %2171 = vmatpush1.msra.mxu0 %v6808_v53  ;;  %v9266_v57 = vld [vmem:[#allocation88_spill] sm:$0xff] }
 0x180   : > { %2100 = vmatprep.subr.mxu1 %v2099_v18  ;;  %2174 = vmatprep.subr.mxu0 %v6812_v60  ;;  %v9267_v18 = vld [vmem:[#allocation93_spill] sm:$0xff] }
 0x181   : > { %2106 = vmatpush1.msra.mxu1 %v2105_v30  ;;  %2139 = vmatprep.mubr.f32.mxu1 %v8741_v16  ;;  %v9268_v30 = vld [vmem:[#allocation95_spill] sm:$0xff] }
 0x182   : > { %2177 = vmatpush1.msra.mxu0 %v6818_v55  ;;  %2141 = vmatmul.mubr.f32.vlgmr.msra.gmra.mxu1 %v7033_v43  ;;  %v9274_v43 = vld [vmem:[#allocation20_spill] sm:$0xff] }
 0x183   : > { %2180 = vmatprep.subr.mxu0 %v6840_v27  ;;  %2300 = vmatprep.subr.mxu1 %v6724_v9 }
 0x184   : > { %2183 = vmatpush1.msra.mxu0 %v6830_v31  ;;  %2302 = vmatpush1.msra.mxu1 %v6732_v42 }
 0x185   : > { %2186 = vmatprep.subr.mxu0 %v6843_v50  ;;  %2304 = vmatprep.subr.mxu1 %v6746_v26 }
 0x186   : > { %2146 = vmatprep.mubr.f32.mxu1 %v8741_v16  ;;  %2189 = vmatpush1.msra.mxu0 %v6860_v37  ;;  %v9270_v16 = vld [vmem:[#allocation16_spill] sm:$0xff] }
 0x187   : > { %2306 = vmatpush1.msra.mxu1 %v6757_v25  ;;  %2192 = vmatprep.subr.mxu0 %v6876_v48 }
 0x188   : > { %2148 = vmatmul.mubr.f32.gmra.mxu1 %v7081_v3  ;;  %2308 = vmatprep.subr.mxu1 %v6762_v47  ;;  %v9273_v3 = vld [vmem:[#allocation41_spill] sm:$0xff] }
 0x189   : > { %2195 = vmatpush1.msra.mxu0 %v6892_v17  ;;  %2310 = vmatpush1.msra.mxu1 %v6768_v20 }
 0x18a   : > { %2198 = vmatprep.subr.mxu0 %v9256_v34  ;;  %2312 = vmatprep.subr.mxu1 %v9257_v0 }
 0x18b   : > { %2201 = vmatpush1.msra.mxu0 %v9258_v21  ;;  %2314 = vmatpush1.msra.mxu1 %v9259_v59 }
 0x18c   : > { %2204 = vmatprep.subr.mxu0 %v9260_v7  ;;  %2316 = vmatprep.subr.mxu1 %v9261_v14 }
 0x18d   : > { %2207 = vmatpush1.msra.mxu0 %v9262_v13  ;;  %2318 = vmatpush1.msra.mxu1 %v9263_v35 }
 0x18e   : > { %2210 = vmatprep.subr.mxu0 %v7007_v49  ;;  %2320 = vmatprep.subr.mxu1 %v9264_v22 }
 0x18f   : > { %2213 = vmatpush1.msra.mxu0 %v7012_v52  ;;  %2322 = vmatpush1.msra.mxu1 %v9265_v29 }
 0x190   : > { %2216 = vmatprep.subr.mxu0 %v7031_v32  ;;  %2324 = vmatprep.subr.mxu1 %v9266_v57 }
 0x191   : > { %2219 = vmatpush1.msra.mxu0 %v7037_v2  ;;  %2326 = vmatpush1.msra.mxu1 %v9267_v18 }
 0x192   : > { %2222 = vmatprep.subr.mxu0 %v7054_v33  ;;  %2328 = vmatprep.subr.mxu1 %v9268_v30 }
 0x193   : > { %2225 = vmatpush1.msra.mxu0 %v7041_v36  ;;  %2330 = vmatpush1.msra.mxu1 %v9269_v1 }
 0x194   : > { %2228 = vmatprep.subr.mxu0 %v7072_v46  ;;  %2332 = vmatprep.subr.mxu1 %v9270_v16  ;;  %v9275_v46 = vld [vmem:[#allocation43_spill] sm:$0xff] }
 0x195   : > { %2231 = vmatpush1.msra.mxu0 %v7060_v41  ;;  %2334 = vmatpush1.msra.mxu1 %v9271_v56  ;;  %v9276_v41 = vld [vmem:[#allocation45_spill] sm:$0xff] }
 0x196   : > { %2234 = vmatprep.subr.mxu0 %v7093_v19  ;;  %2336 = vmatprep.subr.mxu1 %v9272_v51  ;;  %v9277_v19 = vmov 0.0  }
 0x197   : > { %2237 = vmatpush1.msra.mxu0 %v7106_v58  ;;  %2338 = vmatpush1.msra.mxu1 %v9273_v3 }
 0x198   : > { %2240 = vmatprep.subr.mxu0 %v7124_v44  ;;  %2340 = vmatprep.subr.mxu1 %v9274_v43  ;;  %v9278_v43 = vand.u32 4294901760, %v6741_v6  ;;  %v9283_v6 = vand.u32 4294901760, %v6802_v54  ;;  %v9288_v54 = vand.u32 4294901760, %v6840_v27  ;;  %v384_v27 = vld [vmem:[#allocation2 + $0x2f8] sm:$0xff] }
 0x199   : > { %2243 = vmatpush1.msra.mxu0 %v7128_v15  ;;  %2342 = vmatpush1.msra.mxu1 %v9275_v46  ;;  %v9279_v46 = vand.u32 4294901760, %v6752_v23  ;;  %v9284_v23 = vand.u32 4294901760, %v6808_v53  ;;  %v9289_v53 = vand.u32 4294901760, %v6830_v31  ;;  %v9295_v31 = vand.u32 4294901760, %v9258_v21  ;;  %v9304_v21 = vld [vmem:[#allocation24_spill] sm:$0xff] }
 0x19a   : > { %2246 = vmatprep.subr.mxu0 %v7142_v62  ;;  %2344 = vmatprep.subr.mxu1 %v9276_v41 }
 0x19b   : > { %2249 = vmatpush1.msra.mxu0 %v7136_v28  ;;  %2282 = vmatprep.mubr.f32.mxu0 %v9277_v19  ;;  %v9280_v28 = vand.u32 4294901760, %v6773_v10  ;;  %v9285_v10 = vand.u32 4294901760, %v6812_v60  ;;  %v9290_v60 = vand.u32 4294901760, %v6843_v50  ;;  %v9299_v50 = vand.u32 4294901760, %v7012_v52 }
 0x19c   : > { %2346 = vmatpush1.msra.mxu1 %v6993_v24  ;;  %2285 = vmatmul.mubr.f32.vlgmr.msra.gmra.mxu0 %v7069_v45  ;;  %v9281_v24 = vld [vmem:[#allocation23_spill] sm:$0xff]  ;;  %v9282_v45 = vand.u32 4294901760, %v6785_v8  ;;  %v9287_v8 = vld [vmem:[#allocation53_spill] sm:$0xff]  ;;  %v9302_v52 = vand.u32 4294901760, %v7054_v33 }
 0x19d   : > { %2348 = vmatprep.subr.mxu1 %v7023_v63  ;;  %2417 = vmatprep.subr.mxu0 %v9278_v43  ;;  %v9301_v43 = vand.u32 4294901760, %v7037_v2  ;;  %v330_v2 = vld [vmem:[#allocation2 + $0x148] sm:$0xff]  ;;  %v375_v33 = vld [vmem:[#allocation2 + $0x2b0] sm:$0xff] }
 0x19e   : > { %2350 = vmatpush1.msra.mxu1 %v7020_v4  ;;  %2421 = vmatpush1.msra.mxu0 %v9279_v46  ;;  %v333_v46 = vld [vmem:[#allocation2 + $0x160] sm:$0xff] }
 0x19f   : > { %2352 = vmatprep.subr.mxu1 %v7050_v38  ;;  %2425 = vmatprep.subr.mxu0 %v9280_v28 }
 0x1a0   : > { %2290 = vmatprep.mubr.f32.mxu0 %v9277_v19  ;;  %2354 = vmatpush1.msra.mxu1 %v9281_v24 }
 0x1a1   : > { %2429 = vmatpush1.msra.mxu0 %v9282_v45  ;;  %2356 = vmatprep.subr.mxu1 %v7078_v11  ;;  %v9286_v45 = vand.u32 4294901760, %v6818_v55  ;;  %v9291_v55 = vand.u32 4294901760, %v6860_v37  ;;  %v336_v37 = vld [vmem:[#allocation2 + $0x178] sm:$0xff] }
 0x1a2   : > { %2293 = vmatmul.mubr.f32.gmra.mxu0 %v7121_v61  ;;  %2433 = vmatprep.subr.mxu0 %v9283_v6  ;;  %v7333_v28 = vand.u32 4294901760, %v336_v37  ;;  %v7364_v6 = vand.u32 4294901760, %v375_v33 }
 0x1a3   : > { %2358 = vmatpush1.msra.mxu1 %v7089_v39  ;;  %2437 = vmatpush1.msra.mxu0 %v9284_v23 }
 0x1a4   : > { %2360 = vmatprep.subr.mxu1 %v7099_v40  ;;  %2441 = vmatprep.subr.mxu0 %v9285_v10  ;;  %v372_v10 = vld [vmem:[#allocation2 + $0x298] sm:$0xff] }
 0x1a5   : > { %2362 = vmatpush1.msra.mxu1 %v7101_v12  ;;  %2395 = vmatprep.mubr.f32.mxu1 %v9277_v19 }
 0x1a6   : > { %2445 = vmatpush1.msra.mxu0 %v9286_v45  ;;  %2399 = vmatmul.mubr.f32.vlgmr.msra.gmra.mxu1 %v9287_v8  ;;  %v9312_v45 = vand.u32 4294901760, %v7124_v44  ;;  %v9317_v44 = vand.u32 4294901760, %v7142_v62 }
 0x1a7   : > { %2449 = vmatprep.subr.mxu0 %v9288_v54  ;;  %2590 = vmatprep.subr.mxu1 %v6724_v9  ;;  %v9292_v9 = vand.u32 4294901760, %v6876_v48  ;;  %v9300_v48 = vand.u32 4294901760, %v7031_v32  ;;  %v9303_v32 = vand.u32 4294901760, %v7041_v36 }
 0x1a8   : > { %2453 = vmatpush1.msra.mxu0 %v9289_v53  ;;  %2592 = vmatpush1.msra.mxu1 %v6732_v42  ;;  %v9293_v42 = vand.u32 4294901760, %v6892_v17  ;;  %v381_v17 = vld [vmem:[#allocation2 + $0x2e0] sm:$0xff]  ;;  %v9313_v53 = vld [vmem:[#allocation20_spill] sm:$0xff] }
 0x1a9   : > { %2457 = vmatprep.subr.mxu0 %v9290_v60  ;;  %2594 = vmatprep.subr.mxu1 %v6746_v26  ;;  %v9294_v26 = vand.u32 4294901760, %v9256_v34  ;;  %v378_v34 = vld [vmem:[#allocation2 + $0x2c8] sm:$0xff] }
 0x1aa   : > { %2404 = vmatprep.mubr.f32.mxu1 %v9277_v19  ;;  %2461 = vmatpush1.msra.mxu0 %v9291_v55 }
 0x1ab   : > { %2596 = vmatpush1.msra.mxu1 %v6757_v25  ;;  %2465 = vmatprep.subr.mxu0 %v9292_v9  ;;  %v9296_v25 = vand.u32 4294901760, %v9260_v7  ;;  %v7343_v7 = vand.u32 4294901760, %v333_v46  ;;  %v321_v9 = vld [vmem:[#allocation2 + $0x100] sm:$0xff] }
 0x1ac   : > { %2408 = vmatmul.mubr.f32.gmra.mxu1 %v7156_v5  ;;  %2598 = vmatprep.subr.mxu1 %v6762_v47  ;;  %v9297_v47 = vand.u32 4294901760, %v9262_v13  ;;  %v9306_v13 = vld [vmem:[#allocation47_spill] sm:$0xff]  ;;  %v303_v5 = vld [vmem:[#allocation2 + $0x70] sm:$0xff] }
 0x1ad   : > { %2469 = vmatpush1.msra.mxu0 %v9293_v42  ;;  %2600 = vmatpush1.msra.mxu1 %v6768_v20  ;;  %v9298_v20 = vand.u32 4294901760, %v7007_v49  ;;  %v7328_v49 = vand.u32 4294901760, %v384_v27  ;;  %v7375_v54 = vsub.f32 %v333_v46, %v7343_v7  ;;  %v9324_v46 = vld [vmem:[#allocation22_spill] sm:$0xff] }
 0x1ae   : > { %2473 = vmatprep.subr.mxu0 %v9294_v26  ;;  %2602 = vmatprep.subr.mxu1 %v9257_v0  ;;  %v7338_v0 = vand.u32 4294901760, %v381_v17 }
 0x1af   : > { %2477 = vmatpush1.msra.mxu0 %v9295_v31  ;;  %2604 = vmatpush1.msra.mxu1 %v9259_v59  ;;  %v9305_v59 = vand.u32 4294901760, %v9304_v21  ;;  %v7351_v36 = vsub.f32 %v384_v27, %v7328_v49  ;;  %v7392_v31 = vand.u32 4294901760, %v372_v10  ;;  %v363_v21 = vld [vmem:[#allocation2 + $0x250] sm:$0xff] }
 0x1b0   : > { %2481 = vmatprep.subr.mxu0 %v9296_v25  ;;  %2606 = vmatprep.subr.mxu1 %v9261_v14  ;;  %v327_v14 = vld [vmem:[#allocation2 + $0x130] sm:$0xff]  ;;  %v366_v25 = vld [vmem:[#allocation2 + $0x268] sm:$0xff] }
 0x1b1   : > { %2485 = vmatpush1.msra.mxu0 %v9297_v47  ;;  %2608 = vmatpush1.msra.mxu1 %v9263_v35  ;;  %v9307_v35 = vand.u32 4294901760, %v9306_v13  ;;  %v7366_v23 = vand.u32 4294901760, %v327_v14  ;;  %v8763_v60 = vand.u32 4294901760, %v7351_v36  ;;  %9318 = vst [vmem:[#allocation61_spill] sm:$0xff] %v7392_v31  ;;  %v9319_v47 = vld [vmem:[#allocation55_spill] sm:$0xff]  ;;  %v7436_v13 = vsub.f32 %v372_v10, %v7392_v31 }
 0x1b2   : > { %2489 = vmatprep.subr.mxu0 %v9298_v20  ;;  %2610 = vmatprep.subr.mxu1 %v9264_v22  ;;  %v7348_v22 = vand.u32 4294901760, %v378_v34  ;;  %v9320_v20 = vand.u32 4294901760, %v9319_v47  ;;  %v360_v47 = vld [vmem:[#allocation2 + $0x238] sm:$0xff] }
 0x1b3   : > { %2493 = vmatpush1.msra.mxu0 %v9299_v50  ;;  %2612 = vmatpush1.msra.mxu1 %v9265_v29  ;;  %9311 = vst [vmem:[#allocation59_spill] sm:$0xff] %v7366_v23  ;;  %v7399_v27 = vsub.f32 %v327_v14, %v7366_v23 }
 0x1b4   : > { %2497 = vmatprep.subr.mxu0 %v9300_v48  ;;  %2614 = vmatprep.subr.mxu1 %v9266_v57  ;;  %v7357_v57 = vsub.f32 %v336_v37, %v7333_v28  ;;  %v7384_v42 = vsub.f32 %v378_v34, %v7348_v22  ;;  %v318_v37 = vld [vmem:[#allocation2 + $0xe8] sm:$0xff]  ;;  %v7405_v48 = vsub.f32 %v375_v33, %v7364_v6 }
 0x1b5   : > { %2501 = vmatpush1.msra.mxu0 %v9301_v43  ;;  %2616 = vmatpush1.msra.mxu1 %v9267_v18  ;;  %v7359_v18 = vand.u32 4294901760, %v330_v2  ;;  %v7409_v43 = vand.u32 4294901760, %v321_v9  ;;  %v7432_v33 = vand.u32 4294901760, %v318_v37 }
 0x1b6   : > { %2505 = vmatprep.subr.mxu0 %v9302_v52  ;;  %2618 = vmatprep.subr.mxu1 %v9268_v30  ;;  %v324_v30 = vld [vmem:[#allocation2 + $0x118] sm:$0xff]  ;;  %v7417_v52 = vsub.f32 %v7351_v36, %v8763_v60 }
 0x1b7   : > { %2509 = vmatpush1.msra.mxu0 %v9303_v32  ;;  %2620 = vmatpush1.msra.mxu1 %v9269_v1  ;;  %v9308_v1 = vld [vmem:[#allocation25_spill] sm:$0xff]  ;;  %v7381_v55 = vand.u32 4294901760, %v324_v30  ;;  %v7390_v26 = vsub.f32 %v330_v2, %v7359_v18  ;;  %9323 = vst [vmem:[#allocation63_spill] sm:$0xff] %v7409_v43  ;;  %v7422_v32 = vand.u32 4294901760, %v366_v25  ;;  %v8758_v2 = vand.u32 4294901760, %v7384_v42  ;;  %9326 = vst [vmem:[#allocation65_spill] sm:$0xff] %v7432_v33 }
 0x1b8   : > { %2513 = vmatprep.subr.mxu0 %v9305_v59  ;;  %2622 = vmatprep.subr.mxu1 %v9270_v16  ;;  %v9309_v29 = vand.u32 4294901760, %v9308_v1  ;;  %v9310_v16 = vand.u32 4294901760, %v7106_v58  ;;  %v9314_v58 = vand.u32 4294901760, %v7128_v15  ;;  %v8762_v15 = vand.u32 4294901760, %v7357_v57  ;;  %v315_v59 = vld [vmem:[#allocation2 + $0xd0] sm:$0xff] }
 0x1b9   : > { %2517 = vmatpush1.msra.mxu0 %v9307_v35  ;;  %2624 = vmatpush1.msra.mxu1 %v9271_v56  ;;  %v7369_v56 = vsub.f32 %v381_v17, %v7338_v0  ;;  %9315 = vst [vmem:[#allocation29_spill] sm:$0xff] %v7381_v55  ;;  %v9322_v17 = vld [vmem:[#allocation21_spill] sm:$0xff]  ;;  %v7420_v34 = vsub.f32 %v324_v30, %v7381_v55  ;;  %9325 = vst [vmem:[#allocation31_spill] sm:$0xff] %v7422_v32  ;;  %v8756_v14 = vand.u32 4294901760, %v7390_v26 }
 0x1ba   : > { %2521 = vmatprep.subr.mxu0 %v9309_v29  ;;  %2626 = vmatprep.subr.mxu1 %v9272_v51  ;;  %v369_v51 = vld [vmem:[#allocation2 + $0x280] sm:$0xff]  ;;  %v8755_v35 = vand.u32 4294901760, %v7405_v48  ;;  %v8757_v1 = vand.u32 4294901760, %v7399_v27  ;;  %v7453_v30 = vsub.f32 %v321_v9, %v7409_v43  ;;  %v7462_v10 = vand.u32 4294901760, %v315_v59 }
 0x1bb   : > { %2525 = vmatpush1.msra.mxu0 %v9310_v16  ;;  %2628 = vmatpush1.msra.mxu1 %v9273_v3  ;;  %v9316_v3 = vld [vmem:[#allocation43_spill] sm:$0xff]  ;;  %v7401_v50 = vand.u32 4294901760, %v369_v51  ;;  %v8761_v62 = vand.u32 4294901760, %v7369_v56  ;;  %v7460_v16 = vand.u32 4294901760, %v363_v21 }
 0x1bc   : > { %2529 = vmatprep.subr.mxu0 %v9312_v45  ;;  %2630 = vmatprep.subr.mxu1 %v9313_v53  ;;  %9328 = vst [vmem:[#allocation67_spill] sm:$0xff] %v7462_v10  ;;  %v2944_v45 = vand.u32 4294901760, %v7417_v52  ;;  %v8760_v53 = vand.u32 4294901760, %v7420_v34  ;;  %v9329_v9 = vld [vmem:[#allocation51_spill] sm:$0xff] }
 0x1bd   : > { %2533 = vmatpush1.msra.mxu0 %v9314_v58  ;;  %2632 = vmatpush1.msra.mxu1 %v9316_v3  ;;  %9321 = vst [vmem:[#allocation30_spill] sm:$0xff] %v7401_v50  ;;  %v7448_v29 = vsub.f32 %v369_v51, %v7401_v50  ;;  %9327 = vst [vmem:[#allocation32_spill] sm:$0xff] %v7460_v16  ;;  %v7470_v51 = vsub.f32 %v7384_v42, %v8758_v2  ;;  %v7515_v2 = vand.u32 4294901760, %v360_v47 }
 0x1be   : > { %2537 = vmatprep.subr.mxu0 %v9317_v44  ;;  %2634 = vmatprep.subr.mxu1 %v9276_v41  ;;  %v8759_v41 = vand.u32 4294901760, %v7375_v54  ;;  %v7474_v58 = vsub.f32 %v366_v25, %v7422_v32  ;;  %v7480_v3 = vsub.f32 %v318_v37, %v7432_v33  ;;  %v7485_v44 = vsub.f32 %v7390_v26, %v8756_v14 }
 0x1bf   : > { %2541 = vmatpush1.msra.mxu0 %v9320_v20  ;;  %2574 = vmatprep.mubr.f32.mxu0 %v9277_v19  ;;  %v8764_v20 = vand.u32 4294901760, %v7436_v13  ;;  %v7499_v37 = vsub.f32 %v7399_v27, %v8757_v1  ;;  %v8766_v52 = vand.u32 4294901760, %v7448_v29  ;;  %v7510_v14 = vsub.f32 %v363_v21, %v7460_v16  ;;  %9331 = vst [vmem:[#allocation69_spill] sm:$0xff] %v7515_v2 }
 0x1c0   : > { %2636 = vmatpush1.msra.mxu1 %v9322_v17  ;;  %2576 = vmatmul.mubr.f32.vlgmr.msra.gmra.mxu0 %v9324_v46  ;;  %v312_v17 = vld [vmem:[#allocation2 + $0xb8] sm:$0xff]  ;;  %v2958_v1 = vand.u32 4294901760, %v7470_v51  ;;  %v2846_v21 = vand.u32 4294901760, %v7485_v44  ;;  %v9336_v61 = vand.u32 4294901760, %v7474_v58 }
 0x1c1   : > { %2638 = vmatprep.subr.mxu1 %v7023_v63  ;;  %4472 = vmatprep.subr.mxu0 %v7328_v49  ;;  %v7430_v63 = vsub.f32 %v7357_v57, %v8762_v15  ;;  %v7531_v51 = vand.u32 4294901760, %v312_v17  ;;  %v2853_v15 = vand.u32 4294901760, %v7499_v37  ;;  %v7543_v44 = vsub.f32 %v7448_v29, %v8766_v52 }
 0x1c2   : > { %2640 = vmatpush1.msra.mxu1 %v7020_v4  ;;  %4473 = vmatpush3.msra.mxu0 %v7333_v28  ;;  %v7443_v4 = vsub.f32 %v7369_v56, %v8761_v62 }
 0x1c3   : > { %2642 = vmatprep.subr.mxu1 %v7050_v38  ;;  %4474 = vmatprep.subr.mxu0 %v7338_v0  ;;  %v7458_v38 = vsub.f32 %v7375_v54, %v8759_v41  ;;  %9332 = vst [vmem:[#allocation36_spill] sm:$0xff] %v7531_v51  ;;  %v354_v41 = vld [vmem:[#allocation2 + $0x208] sm:$0xff] }
 0x1c4   : > { %2581 = vmatprep.mubr.f32.mxu0 %v9277_v19  ;;  %2644 = vmatpush1.msra.mxu1 %v9281_v24  ;;  %v2832_v24 = vand.u32 4294901760, %v7430_v63  ;;  %v2951_v25 = vand.u32 4294901760, %v7443_v4  ;;  %v7506_v63 = vsub.f32 %v315_v59, %v7462_v10  ;;  %v357_v4 = vld [vmem:[#allocation2 + $0x220] sm:$0xff]  ;;  %v7557_v52 = vand.u32 4294901760, %v354_v41 }
 0x1c5   : > { %4475 = vmatpush3.msra.mxu0 %v7343_v7  ;;  %2646 = vmatprep.subr.mxu1 %v7078_v11  ;;  %v7494_v11 = vsub.f32 %v7405_v48, %v8755_v35  ;;  %v8769_v35 = vand.u32 4294901760, %v7453_v30  ;;  %v309_v59 = vld [vmem:[#allocation2 + $0xa0] sm:$0xff]  ;;  %v7538_v60 = vand.u32 4294901760, %v357_v4 }
 0x1c6   : > { %2583 = vmatmul.mubr.f32.gmra.mxu0 %v9329_v9  ;;  %4476 = vmatprep.subr.mxu0 %v7348_v22  ;;  %9330 = vst [vmem:[#allocation34_spill] sm:$0xff] %v7506_v63  ;;  %9335 = vst [vmem:[#allocation73_spill] sm:$0xff] %v7557_v52 }
 0x1c7   : > { %2648 = vmatpush1.msra.mxu1 %v7089_v39  ;;  %4477 = vmatpush3.msra.mxu0 %v7359_v18  ;;  %v2839_v39 = vand.u32 4294901760, %v7458_v38  ;;  %v2965_v62 = vand.u32 4294901760, %v7494_v11  ;;  %9333 = vst [vmem:[#allocation71_spill] sm:$0xff] %v7538_v60  ;;  %v7551_v38 = vsub.f32 %v7453_v30, %v8769_v35  ;;  %v351_v11 = vld [vmem:[#allocation2 + $0x1f0] sm:$0xff]  ;;  %v7565_v35 = vsub.f32 %v360_v47, %v7515_v2 }
 0x1c8   : > { %2650 = vmatprep.subr.mxu1 %v7099_v40  ;;  %4478 = vmatprep.subr.mxu0 %v7364_v6  ;;  %v7520_v40 = vsub.f32 %v7420_v34, %v8760_v53  ;;  %v7546_v53 = vand.u32 4294901760, %v309_v59  ;;  %v2979_v47 = vand.u32 4294901760, %v7543_v44 }
 0x1c9   : > { %2652 = vmatpush1.msra.mxu1 %v7101_v12  ;;  %2685 = vmatprep.mubr.f32.mxu1 %v9277_v19  ;;  %v7529_v12 = vsub.f32 %v7436_v13, %v8764_v20  ;;  %v306_v20 = vld [vmem:[#allocation2 + $0x88] sm:$0xff] }
 0x1ca   : > { %4479 = vmatpush3.msra.mxu0 %v7366_v23  ;;  %2687 = vmatmul.mubr.f32.vlgmr.msra.gmra.mxu1 %v9324_v46  ;;  %9334 = vst [vmem:[#allocation38_spill] sm:$0xff] %v7546_v53  ;;  %v7562_v46 = vsub.f32 %v7474_v58, %v9336_v61  ;;  %v7572_v37 = vand.u32 4294901760, %v306_v20  ;;  %v348_v61 = vld [vmem:[#allocation2 + $0x1d8] sm:$0xff]  ;;  %v7610_v23 = vsub.f32 %v354_v41, %v7557_v52 }
 0x1cb   : > { %4480 = vmatprep.subr.mxu0 %v7392_v31  ;;  %4510 = vmatprep.subr.mxu1 %v2944_v45  ;;  %v2860_v45 = vand.u32 4294901760, %v7520_v40  ;;  %v2972_v8 = vand.u32 4294901760, %v7529_v12  ;;  %v9338_v40 = vand.u32 4294901760, %v7480_v3  ;;  %v300_v12 = vld [vmem:[#allocation2 + $0x58] sm:$0xff] }
 0x1cc   : > { %4481 = vmatpush3.msra.mxu0 %v7381_v55  ;;  %4511 = vmatpush3.msra.mxu1 %v2832_v24  ;;  %v7570_v24 = vsub.f32 %v312_v17, %v7531_v51  ;;  %9337 = vst [vmem:[#allocation40_spill] sm:$0xff] %v7572_v37  ;;  %v7586_v17 = vsub.f32 %v357_v4, %v7538_v60  ;;  %v9342_v55 = vand.u32 4294901760, %v7506_v63  ;;  %v345_v4 = vld [vmem:[#allocation2 + $0x1c0] sm:$0xff] }
 0x1cd   : > { %4482 = vmatprep.subr.mxu0 %v7401_v50  ;;  %4512 = vmatprep.subr.mxu1 %v2951_v25  ;;  %v7577_v50 = vsub.f32 %v7480_v3, %v9338_v40  ;;  %v7581_v25 = vand.u32 4294901760, %v351_v11  ;;  %v7591_v40 = vsub.f32 %v309_v59, %v7546_v53  ;;  %v7606_v59 = vand.u32 4294901760, %v348_v61 }
 0x1ce   : > { %2692 = vmatprep.mubr.f32.mxu1 %v9277_v19  ;;  %4483 = vmatpush3.msra.mxu0 %v7409_v43  ;;  %v7583_v19 = vand.u32 4294901760, %v303_v5  ;;  %v2867_v43 = vand.u32 4294901760, %v7551_v38  ;;  %v7602_v31 = vsub.f32 %v7506_v63, %v9342_v55  ;;  %v7614_v55 = vsub.f32 %v306_v20, %v7572_v37 }
 0x1cf   : > { %4513 = vmatpush3.msra.mxu1 %v2839_v39  ;;  %4484 = vmatprep.subr.mxu0 %v7422_v32  ;;  %9340 = vst [vmem:[#allocation42_spill] sm:$0xff] %v7591_v40  ;;  %v9341_v39 = vand.u32 4294901760, %v7510_v14  ;;  %v297_v32 = vld [vmem:[#allocation2 + $0x40] sm:$0xff]  ;;  %v7624_v41 = vand.u32 4294901760, %v345_v4  ;;  %v7628_v20 = vsub.f32 %v351_v11, %v7581_v25 }
 0x1d0   : > { %9339 = vst [vmem:[#allocation75_spill] sm:$0xff] %v7583_v19  ;;  %2694 = vmatmul.mubr.f32.gmra.mxu1 %v9329_v9  ;;  %4514 = vmatprep.subr.mxu1 %v2958_v1  ;;  %v2986_v9 = vand.u32 4294901760, %v7562_v46  ;;  %v2874_v1 = vand.u32 4294901760, %v7577_v50  ;;  %v7622_v38 = vsub.f32 %v303_v5, %v7583_v19  ;;  %v7633_v46 = vand.u32 4294901760, %v297_v32 }
 0x1d1   : > { %v7597_v44 = vsub.f32 %v7510_v14, %v9341_v39  ;;  %4485 = vmatpush3.msra.mxu0 %v7432_v33  ;;  %4515 = vmatpush3.msra.mxu1 %v2846_v21  ;;  %v7617_v39 = vand.u32 4294901760, %v300_v12  ;;  %v342_v33 = vld [vmem:[#allocation2 + $0x1a8] sm:$0xff]  ;;  %v9344_v21 = vand.u32 4294901760, %v7565_v35 }
 0x1d2   : > { %4486 = vmatprep.subr.mxu0 %v7460_v16  ;;  %4516 = vmatprep.subr.mxu1 %v2965_v62  ;;  %9343 = vst [vmem:[#allocation77_spill] sm:$0xff] %v7622_v38  ;;  %v294_v16 = vld [vmem:[#allocation2 + $0x28] sm:$0xff]  ;;  %v2881_v62 = vand.u32 4294901760, %v7602_v31  ;;  %v7640_v63 = vand.u32 4294901760, %v342_v33 }
 0x1d3   : > { %4487 = vmatpush3.msra.mxu0 %v7462_v10  ;;  %4517 = vmatpush3.msra.mxu1 %v2853_v15  ;;  %v2993_v50 = vand.u32 4294901760, %v7597_v44  ;;  %v339_v10 = vld [vmem:[#allocation2 + $0x190] sm:$0xff]  ;;  %v2999_v11 = vsub.f32 %v7565_v35, %v9344_v21  ;;  %v7644_v44 = vsub.f32 %v348_v61, %v7606_v59  ;;  %v7648_v31 = vsub.f32 %v300_v12, %v7617_v39 }
 0x1d4   : > { %4488 = vmatprep.subr.mxu0 %v7515_v2  ;;  %4518 = vmatprep.subr.mxu1 %v2972_v8  ;;  %v291_v2 = vld [vmem:[#allocation2 + $0x10] sm:$0xff]  ;;  %v9346_v8 = vand.u32 4294901760, %v7570_v24  ;;  %v9347_v61 = vand.u32 4294901760, %v7586_v17  ;;  %v7660_v15 = vand.u32 4294901760, %v339_v10 }
 0x1d5   : > { %4489 = vmatpush3.msra.mxu0 %v7531_v51  ;;  %9345 = vst [vmem:[#allocation44_spill] sm:$0xff] %v7644_v44  ;;  %4519 = vmatpush3.msra.mxu1 %v2860_v45  ;;  %v7653_v51 = vand.u32 4294901760, %v294_v16  ;;  %v3000_v12 = vand.u32 4294901760, %v2999_v11 }
 0x1d6   : > { %4490 = vmatprep.subr.mxu0 %v7538_v60  ;;  %v2887_v5 = vsub.f32 %v7570_v24, %v9346_v8  ;;  %4520 = vmatprep.subr.mxu1 %v2979_v47  ;;  %v3006_v45 = vsub.f32 %v7586_v17, %v9347_v61  ;;  %v7664_v60 = vsub.f32 %v345_v4, %v7624_v41  ;;  %v9348_v47 = vand.u32 4294901760, %v7591_v40  ;;  %v9361_v61 = vld [vmem:[#allocation108_spill] sm:$0xff] }
 0x1d7   : > { %4491 = vmatpush3.msra.mxu0 %v7546_v53  ;;  %4521 = vmatpush3.msra.mxu1 %v2867_v43  ;;  %v7668_v8 = vsub.f32 %v297_v32, %v7633_v46  ;;  %v7673_v53 = vand.u32 4294901760, %v291_v2  ;;  %v9349_v4 = vand.u32 4294901760, %v7610_v23  ;;  %v7682_v32 = vsub.f32 %v342_v33, %v7640_v63 }
 0x1d8   : > { %4492 = vmatprep.subr.mxu0 %v7557_v52  ;;  %v2894_v21 = vsub.f32 %v7591_v40, %v9348_v47  ;;  %4522 = vmatprep.subr.mxu1 %v2986_v9  ;;  %v2888_v47 = vand.u32 4294901760, %v2887_v5  ;;  %v7686_v40 = vsub.f32 %v294_v16, %v7653_v51  ;;  %v9350_v9 = vand.u32 4294901760, %v7614_v55 }
 0x1d9   : > { %4493 = vmatpush3.msra.mxu0 %v7572_v37  ;;  %v3013_v43 = vsub.f32 %v7610_v23, %v9349_v4  ;;  %4523 = vmatpush3.msra.mxu1 %v2874_v1  ;;  %v3007_v4 = vand.u32 4294901760, %v3006_v45  ;;  %v9351_v33 = vand.u32 4294901760, %v7628_v20  ;;  %v7698_v5 = vsub.f32 %v339_v10, %v7660_v15 }
 0x1da   : > { %4494 = vmatprep.subr.mxu0 %v7581_v25  ;;  %v2901_v11 = vsub.f32 %v7614_v55, %v9350_v9  ;;  %4524 = vmatprep.subr.mxu1 %v2993_v50  ;;  %v2895_v16 = vand.u32 4294901760, %v2894_v21  ;;  %v7702_v9 = vsub.f32 %v291_v2, %v7673_v53  ;;  %v9353_v50 = vand.u32 4294901760, %v7622_v38 }
 0x1db   : > { %4495 = vmatpush3.msra.mxu0 %v7583_v19  ;;  %v3020_v1 = vsub.f32 %v7628_v20, %v9351_v33  ;;  %9352 = vst [vmem:[#allocation79_spill] sm:$0xff] %v7698_v5  ;;  %4525 = vmatpush3.msra.mxu1 %v2881_v62  ;;  %v3014_v33 = vand.u32 4294901760, %v3013_v43  ;;  %v9354_v10 = vand.u32 4294901760, %v7644_v44  ;;  %v9355_v21 = vand.u32 4294901760, %v7648_v31 }
 0x1dc   : > { %4496 = vmatprep.subr.mxu0 %v7606_v59  ;;  %v2908_v45 = vsub.f32 %v7622_v38, %v9353_v50  ;;  %4526 = vmatprep.subr.mxu1 %v3000_v12  ;;  %v2902_v2 = vand.u32 4294901760, %v2901_v11  ;;  %v9356_v43 = vand.u32 4294901760, %v7664_v60  ;;  %v9357_v11 = vand.u32 4294901760, %v7668_v8 }
 0x1dd   : > { %4497 = vmatpush3.msra.mxu0 %v7617_v39  ;;  %v3027_v62 = vsub.f32 %v7644_v44, %v9354_v10  ;;  %4527 = vmatpush3.msra.mxu1 %v2888_v47  ;;  %v2915_v50 = vsub.f32 %v7648_v31, %v9355_v21  ;;  %v3021_v12 = vand.u32 4294901760, %v3020_v1  ;;  %v9358_v1 = vand.u32 4294901760, %v7682_v32 }
 0x1de   : > { %4498 = vmatprep.subr.mxu0 %v7624_v41  ;;  %4528 = vmatprep.subr.mxu1 %v3007_v4  ;;  %v3034_v10 = vsub.f32 %v7664_v60, %v9356_v43  ;;  %v2909_v47 = vand.u32 4294901760, %v2908_v45  ;;  %v2922_v21 = vsub.f32 %v7668_v8, %v9357_v11  ;;  %v9359_v45 = vand.u32 4294901760, %v7686_v40 }
 0x1df   : > { %4499 = vmatpush3.msra.mxu0 %v7633_v46  ;;  %4529 = vmatpush3.msra.mxu1 %v2895_v16  ;;  %v3028_v4 = vand.u32 4294901760, %v3027_v62  ;;  %v3041_v43 = vsub.f32 %v7682_v32, %v9358_v1  ;;  %v2916_v16 = vand.u32 4294901760, %v2915_v50 }
 0x1e0   : > { %4500 = vmatprep.subr.mxu0 %v7640_v63  ;;  %4530 = vmatprep.subr.mxu1 %v3014_v33  ;;  %v2929_v52 = vsub.f32 %v7686_v40, %v9359_v45  ;;  %v3035_v11 = vand.u32 4294901760, %v3034_v10  ;;  %v9360_v33 = vand.u32 4294901760, %v7698_v5  ;;  %v2923_v1 = vand.u32 4294901760, %v2922_v21  ;;  %v9366_v21 = vld [vmem:[#allocation34_spill] sm:$0xff] }
 0x1e1   : > { %4501 = vmatpush3.msra.mxu0 %v7653_v51  ;;  %4531 = vmatpush3.msra.mxu1 %v2902_v2  ;;  %v9362_v2 = vand.u32 4294901760, %v7702_v9  ;;  %v3042_v45 = vand.u32 4294901760, %v3041_v43  ;;  %v9368_v43 = vld [vmem:[#allocation61_spill] sm:$0xff] }
 0x1e2   : > { %4502 = vmatprep.subr.mxu0 %v7660_v15  ;;  %4532 = vmatprep.subr.mxu1 %v3021_v12  ;;  %v3048_v62 = vsub.f32 %v7698_v5, %v9360_v33  ;;  %v9363_v12 = vld [vmem:[#allocation109_spill] sm:$0xff]  ;;  %v2930_v10 = vand.u32 4294901760, %v2929_v52 }
 0x1e3   : > { %4503 = vmatpush3.msra.mxu0 %v7673_v53  ;;  %4533 = vmatpush3.msra.mxu1 %v2909_v47  ;;  %v2936_v50 = vsub.f32 %v7702_v9, %v9362_v2  ;;  %v9364_v52 = vld [vmem:[#allocation101_spill] sm:$0xff]  ;;  %v9365_v47 = vld [vmem:[#allocation102_spill] sm:$0xff]  ;;  %v9373_v2 = vld [vmem:[#allocation31_spill] sm:$0xff] }
 0x1e4   : > { %2801 = vmatprep.mubr.f32.mxu0 %v9361_v61  ;;  %4534 = vmatprep.subr.mxu1 %v3028_v4  ;;  %v3049_v33 = vand.u32 4294901760, %v3048_v62  ;;  %v9367_v4 = vld [vmem:[#allocation59_spill] sm:$0xff]  ;;  %v9371_v62 = vld [vmem:[#allocation42_spill] sm:$0xff] }
 0x1e5   : > { %4548 = vmatprep.subr.mxu0 %v7351_v36  ;;  %2807 = vmatmul.mubr.f32.vlgmr.msra.gmra.mxu0 %v9363_v12  ;;  %v2937_v61 = vand.u32 4294901760, %v2936_v50  ;;  %v9374_v50 = vld [vmem:[#allocation65_spill] sm:$0xff]  ;;  %v9376_v12 = vld [vmem:[#allocation67_spill] sm:$0xff] }
 0x1e6   : > { %4535 = vmatpush3.msra.mxu1 %v2916_v16  ;;  %4549 = vmatpush3.msra.mxu0 %v7357_v57  ;;  %v9369_v16 = vld [vmem:[#allocation29_spill] sm:$0xff] }
 0x1e7   : > { %4536 = vmatprep.subr.mxu1 %v3035_v11  ;;  %4550 = vmatprep.subr.mxu0 %v7369_v56  ;;  %v9370_v11 = vld [vmem:[#allocation30_spill] sm:$0xff] }
 0x1e8   : > { %4537 = vmatpush3.msra.mxu1 %v2923_v1  ;;  %4551 = vmatpush3.msra.mxu0 %v7375_v54  ;;  %v9372_v1 = vld [vmem:[#allocation63_spill] sm:$0xff] }
 0x1e9   : > { %4538 = vmatprep.subr.mxu1 %v3042_v45  ;;  %4552 = vmatprep.subr.mxu0 %v7384_v42  ;;  %v9375_v45 = vld [vmem:[#allocation32_spill] sm:$0xff] }
 0x1ea   : > { %4539 = vmatpush3.msra.mxu1 %v2930_v10  ;;  %4553 = vmatpush3.msra.mxu0 %v7390_v26  ;;  %v9377_v10 = vld [vmem:[#allocation69_spill] sm:$0xff] }
 0x1eb   : > { %4540 = vmatprep.subr.mxu1 %v3049_v33  ;;  %4554 = vmatprep.subr.mxu0 %v7405_v48  ;;  %v9378_v33 = vld [vmem:[#allocation36_spill] sm:$0xff] }
 0x1ec   : > { %4541 = vmatpush3.msra.mxu1 %v2937_v61  ;;  %3052 = vmatprep.mubr.f32.mxu1 %v9364_v52  ;;  %v9379_v61 = vld [vmem:[#allocation71_spill] sm:$0xff]  ;;  %v9381_v52 = vld [vmem:[#allocation38_spill] sm:$0xff] }
 0x1ed   : > { %4555 = vmatpush3.msra.mxu0 %v7399_v27  ;;  %3054 = vmatmul.mubr.f32.vlgmr.msra.gmra.mxu1 %v9365_v47  ;;  %v9380_v47 = vld [vmem:[#allocation94_spill] sm:$0xff] }
 0x1ee   : > { %4556 = vmatprep.subr.mxu0 %v7436_v13  ;;  %4586 = vmatprep.subr.mxu1 %v7328_v49 }
 0x1ef   : > { %4557 = vmatpush3.msra.mxu0 %v7420_v34  ;;  %4587 = vmatpush3.msra.mxu1 %v7333_v28 }
 0x1f0   : > { %4558 = vmatprep.subr.mxu0 %v7448_v29  ;;  %4588 = vmatprep.subr.mxu1 %v7338_v0 }
 0x1f1   : > { %4559 = vmatpush3.msra.mxu0 %v7453_v30  ;;  %4589 = vmatpush3.msra.mxu1 %v7343_v7 }
 0x1f2   : > { %4560 = vmatprep.subr.mxu0 %v7474_v58  ;;  %4590 = vmatprep.subr.mxu1 %v7348_v22 }
 0x1f3   : > { %4561 = vmatpush3.msra.mxu0 %v7480_v3  ;;  %4591 = vmatpush3.msra.mxu1 %v7359_v18 }
 0x1f4   : > { %4562 = vmatprep.subr.mxu0 %v7510_v14  ;;  %4592 = vmatprep.subr.mxu1 %v7364_v6 }
 0x1f5   : > { %4563 = vmatpush3.msra.mxu0 %v9366_v21  ;;  %4593 = vmatpush3.msra.mxu1 %v9367_v4 }
 0x1f6   : > { %4564 = vmatprep.subr.mxu0 %v7565_v35  ;;  %4594 = vmatprep.subr.mxu1 %v9368_v43 }
 0x1f7   : > { %4565 = vmatpush3.msra.mxu0 %v7570_v24  ;;  %4595 = vmatpush3.msra.mxu1 %v9369_v16 }
 0x1f8   : > { %4566 = vmatprep.subr.mxu0 %v7586_v17  ;;  %4596 = vmatprep.subr.mxu1 %v9370_v11 }
 0x1f9   : > { %4567 = vmatpush3.msra.mxu0 %v9371_v62  ;;  %4597 = vmatpush3.msra.mxu1 %v9372_v1 }
 0x1fa   : > { %4568 = vmatprep.subr.mxu0 %v7610_v23  ;;  %4598 = vmatprep.subr.mxu1 %v9373_v2 }
 0x1fb   : > { %4569 = vmatpush3.msra.mxu0 %v7614_v55  ;;  %4599 = vmatpush3.msra.mxu1 %v9374_v50 }
 0x1fc   : > { %4570 = vmatprep.subr.mxu0 %v7628_v20  ;;  %4600 = vmatprep.subr.mxu1 %v9375_v45 }
 0x1fd   : > { %4571 = vmatpush3.msra.mxu0 %v7622_v38  ;;  %4601 = vmatpush3.msra.mxu1 %v9376_v12  ;;  %v9382_v38 = vld [vmem:[#allocation68_spill] sm:$0xff] }
 0x1fe   : > { %4572 = vmatprep.subr.mxu0 %v7644_v44  ;;  %4602 = vmatprep.subr.mxu1 %v9377_v10  ;;  %v9383_v44 = vld [vmem:[#allocation73_spill] sm:$0xff] }
 0x1ff   : > { %4573 = vmatpush3.msra.mxu0 %v7648_v31  ;;  %4603 = vmatpush3.msra.mxu1 %v9378_v33 }
 0x200   : > { %4574 = vmatprep.subr.mxu0 %v7664_v60  ;;  %4604 = vmatprep.subr.mxu1 %v9379_v61 }
 0x201   : > { %2816 = vmatprep.mubr.f32.mxu0 %v9380_v47  ;;  %4575 = vmatpush3.msra.mxu0 %v7668_v8  ;;  %v9384_v47 = vld [vmem:[#allocation103_spill] sm:$0xff] }
 0x202   : > { %4605 = vmatpush3.msra.mxu1 %v9381_v52  ;;  %2822 = vmatmul.mubr.f32.gmra.mxu0 %v9382_v38  ;;  %v9385_v52 = vld [vmem:[#allocation104_spill] sm:$0xff]  ;;  %v9386_v38 = vand.u32 4294901760, %v7351_v36  ;;  %v9392_v36 = vld [vmem:[#allocation110_spill] sm:$0xff] }
 0x203   : > { %4576 = vmatprep.subr.mxu0 %v7682_v32  ;;  %4606 = vmatprep.subr.mxu1 %v9383_v44 }
 0x204   : > { %4577 = vmatpush3.msra.mxu0 %v7686_v40  ;;  %4607 = vmatpush3.msra.mxu1 %v7572_v37  ;;  %v9387_v37 = vand.u32 4294901760, %v7357_v57  ;;  %v9393_v57 = vand.u32 4294901760, %v7384_v42  ;;  %v9399_v42 = vld [vmem:[#allocation107_spill] sm:$0xff] }
 0x205   : > { %4578 = vmatprep.subr.mxu0 %v7698_v5  ;;  %4608 = vmatprep.subr.mxu1 %v7581_v25  ;;  %v9388_v5 = vld [vmem:[#allocation15_spill] sm:$0xff] }
 0x206   : > { %4579 = vmatpush3.msra.mxu0 %v7702_v9  ;;  %3196 = vmatprep.mubr.f32.mxu0 %v9384_v47  ;;  %v9389_v47 = vand.u32 4294901760, %v7369_v56  ;;  %v9395_v56 = vand.u32 4294901760, %v7390_v26  ;;  %v9401_v26 = vand.u32 4294901760, %v7420_v34  ;;  %v9409_v34 = vand.u32 4294901760, %v9366_v21 }
 0x207   : > { %4609 = vmatpush3.msra.mxu1 %v7583_v19  ;;  %3199 = vmatmul.mubr.f32.vlgmr.msra.gmra.mxu0 %v9385_v52  ;;  %v9390_v19 = vld [vmem:[#allocation33_spill] sm:$0xff]  ;;  %v9391_v52 = vand.u32 4294901760, %v7375_v54  ;;  %v9396_v54 = vand.u32 4294901760, %v7405_v48  ;;  %v9402_v48 = vand.u32 4294901760, %v7448_v29 }
 0x208   : > { %4610 = vmatprep.subr.mxu1 %v7606_v59  ;;  %4624 = vmatprep.subr.mxu0 %v9386_v38  ;;  %v9397_v38 = vld [vmem:[#allocation106_spill] sm:$0xff] }
 0x209   : > { %4611 = vmatpush3.msra.mxu1 %v7617_v39  ;;  %4625 = vmatpush3.msra.mxu0 %v9387_v37  ;;  %v9394_v37 = vld [vmem:[#allocation111_spill] sm:$0xff]  ;;  %v432_v29 = vld [vmem:[#allocation2 + $0x478] sm:$0xff] }
 0x20a   : > { %3059 = vmatprep.mubr.f32.mxu1 %v9388_v5  ;;  %4612 = vmatprep.subr.mxu1 %v7624_v41  ;;  %v7889_v21 = vand.u32 4294901760, %v432_v29 }
 0x20b   : > { %4626 = vmatprep.subr.mxu0 %v9389_v47  ;;  %3061 = vmatmul.mubr.f32.gmra.mxu1 %v9390_v19  ;;  %v9398_v47 = vand.u32 4294901760, %v7399_v27  ;;  %v9404_v27 = vand.u32 4294901760, %v7453_v30  ;;  %v9416_v30 = vand.u32 4294901760, %v7628_v20  ;;  %v9422_v20 = vand.u32 4294901760, %v7664_v60 }
 0x20c   : > { %4627 = vmatpush3.msra.mxu0 %v9391_v52  ;;  %4613 = vmatpush3.msra.mxu1 %v7633_v46  ;;  %v9400_v52 = vand.u32 4294901760, %v7436_v13  ;;  %v9405_v13 = vld [vmem:[#allocation113_spill] sm:$0xff]  ;;  %v9426_v60 = vand.u32 4294901760, %v7686_v40 }
 0x20d   : > { %3205 = vmatprep.mubr.f32.mxu0 %v9392_v36  ;;  %4614 = vmatprep.subr.mxu1 %v7640_v63  ;;  %v9403_v36 = vld [vmem:[#allocation112_spill] sm:$0xff]  ;;  %v9431_v40 = vld [vmem:[#allocation101_spill] sm:$0xff] }
 0x20e   : > { %4628 = vmatprep.subr.mxu0 %v9393_v57  ;;  %3208 = vmatmul.mubr.f32.gmra.mxu0 %v9394_v37  ;;  %v417_v57 = vld [vmem:[#allocation2 + $0x400] sm:$0xff] }
 0x20f   : > { %4615 = vmatpush3.msra.mxu1 %v7653_v51  ;;  %4629 = vmatpush3.msra.mxu0 %v9395_v56  ;;  %v9433_v37 = vld [vmem:[#allocation102_spill] sm:$0xff] }
 0x210   : > { %4616 = vmatprep.subr.mxu1 %v7660_v15  ;;  %4630 = vmatprep.subr.mxu0 %v9396_v54 }
 0x211   : > { %4617 = vmatpush3.msra.mxu1 %v7673_v53  ;;  %3312 = vmatprep.mubr.f32.mxu1 %v9397_v38  ;;  %v7943_v38 = vand.u32 4294901760, %v417_v57 }
 0x212   : > { %4631 = vmatpush3.msra.mxu0 %v9398_v47  ;;  %3316 = vmatmul.mubr.f32.vlgmr.msra.gmra.mxu1 %v9399_v42 }
 0x213   : > { %4632 = vmatprep.subr.mxu0 %v9400_v52  ;;  %4662 = vmatprep.subr.mxu1 %v7328_v49  ;;  %v9406_v49 = vand.u32 4294901760, %v7474_v58  ;;  %v9417_v58 = vld [vmem:[#allocation77_spill] sm:$0xff] }
 0x214   : > { %4633 = vmatpush3.msra.mxu0 %v9401_v26  ;;  %4663 = vmatpush3.msra.mxu1 %v7333_v28  ;;  %v9407_v28 = vand.u32 4294901760, %v7480_v3  ;;  %v9418_v3 = vand.u32 4294901760, %v9417_v58 }
 0x215   : > { %4634 = vmatprep.subr.mxu0 %v9402_v48  ;;  %4664 = vmatprep.subr.mxu1 %v7338_v0  ;;  %v9408_v0 = vand.u32 4294901760, %v7510_v14  ;;  %v9414_v14 = vand.u32 4294901760, %v7610_v23  ;;  %v9419_v23 = vld [vmem:[#allocation44_spill] sm:$0xff] }
 0x216   : > { %3323 = vmatprep.mubr.f32.mxu1 %v9403_v36  ;;  %4635 = vmatpush3.msra.mxu0 %v9404_v27  ;;  %v408_v36 = vld [vmem:[#allocation2 + $0x3b8] sm:$0xff]  ;;  %v7974_v27 = vsub.f32 %v417_v57, %v7943_v38  ;;  %v387_v57 = vld [vmem:[#allocation2 + $0x310] sm:$0xff] }
 0x217   : > { %4665 = vmatpush3.msra.mxu1 %v7343_v7  ;;  %4636 = vmatprep.subr.mxu0 %v9406_v49  ;;  %v9410_v7 = vand.u32 4294901760, %v7565_v35  ;;  %v9415_v35 = vand.u32 4294901760, %v7614_v55  ;;  %v9421_v55 = vand.u32 4294901760, %v7648_v31  ;;  %v423_v31 = vld [vmem:[#allocation2 + $0x430] sm:$0xff] }
 0x218   : > { %3327 = vmatmul.mubr.f32.gmra.mxu1 %v9405_v13  ;;  %4666 = vmatprep.subr.mxu1 %v7348_v22  ;;  %v9411_v22 = vand.u32 4294901760, %v7570_v24  ;;  %v429_v24 = vld [vmem:[#allocation2 + $0x460] sm:$0xff] }
 0x219   : > { %4637 = vmatpush3.msra.mxu0 %v9407_v28  ;;  %4667 = vmatpush3.msra.mxu1 %v7359_v18  ;;  %v9412_v18 = vand.u32 4294901760, %v7586_v17  ;;  %v9420_v17 = vand.u32 4294901760, %v9419_v23  ;;  %v405_v13 = vld [vmem:[#allocation2 + $0x3a0] sm:$0xff]  ;;  %v7985_v28 = vand.u32 4294901760, %v408_v36 }
 0x21a   : > { %4638 = vmatprep.subr.mxu0 %v9408_v0  ;;  %4668 = vmatprep.subr.mxu1 %v7364_v6  ;;  %v9413_v6 = vand.u32 4294901760, %v9371_v62  ;;  %v9425_v62 = vand.u32 4294901760, %v7682_v32 }
 0x21b   : > { %4639 = vmatpush3.msra.mxu0 %v9409_v34  ;;  %4669 = vmatpush3.msra.mxu1 %v9367_v4  ;;  %v7897_v4 = vand.u32 4294901760, %v429_v24  ;;  %v402_v34 = vld [vmem:[#allocation2 + $0x388] sm:$0xff]  ;;  %v8014_v58 = vsub.f32 %v408_v36, %v7985_v28 }
 0x21c   : > { %4640 = vmatprep.subr.mxu0 %v9410_v7  ;;  %4670 = vmatprep.subr.mxu1 %v9368_v43  ;;  %v426_v43 = vld [vmem:[#allocation2 + $0x448] sm:$0xff] }
 0x21d   : > { %4641 = vmatpush3.msra.mxu0 %v9411_v22  ;;  %4671 = vmatpush3.msra.mxu1 %v9369_v16  ;;  %v9423_v16 = vand.u32 4294901760, %v7668_v8  ;;  %v9428_v8 = vld [vmem:[#allocation79_spill] sm:$0xff]  ;;  %v7917_v32 = vsub.f32 %v429_v24, %v7897_v4  ;;  %v7999_v22 = vand.u32 4294901760, %v405_v13  ;;  %v396_v24 = vld [vmem:[#allocation2 + $0x358] sm:$0xff] }
 0x21e   : > { %4642 = vmatprep.subr.mxu0 %v9412_v18  ;;  %4672 = vmatprep.subr.mxu1 %v9370_v11  ;;  %v9424_v11 = vld [vmem:[#allocation38_spill] sm:$0xff]  ;;  %v8002_v18 = vand.u32 4294901760, %v7974_v27 }
 0x21f   : > { %4643 = vmatpush3.msra.mxu0 %v9413_v6  ;;  %4673 = vmatpush3.msra.mxu1 %v9372_v1  ;;  %v7906_v1 = vsub.f32 %v432_v29, %v7889_v21  ;;  %v7939_v54 = vand.u32 4294901760, %v7917_v32 }
 0x220   : > { %4644 = vmatprep.subr.mxu0 %v9414_v14  ;;  %4674 = vmatprep.subr.mxu1 %v9373_v2  ;;  %v7911_v2 = vand.u32 4294901760, %v426_v43  ;;  %v399_v14 = vld [vmem:[#allocation2 + $0x370] sm:$0xff] }
 0x221   : > { %4645 = vmatpush3.msra.mxu0 %v9415_v35  ;;  %4675 = vmatpush3.msra.mxu1 %v9374_v50  ;;  %v9427_v50 = vld [vmem:[#allocation40_spill] sm:$0xff]  ;;  %v3730_v26 = vsub.f32 %v7917_v32, %v7939_v54 }
 0x222   : > { %4646 = vmatprep.subr.mxu0 %v9416_v30  ;;  %4676 = vmatprep.subr.mxu1 %v9375_v45  ;;  %v9429_v45 = vand.u32 4294901760, %v9428_v8  ;;  %v8011_v30 = vand.u32 4294901760, %v402_v34 }
 0x223   : > { %4647 = vmatpush3.msra.mxu0 %v9418_v3  ;;  %4677 = vmatpush3.msra.mxu1 %v9376_v12  ;;  %v420_v12 = vld [vmem:[#allocation2 + $0x418] sm:$0xff] }
 0x224   : > { %4648 = vmatprep.subr.mxu0 %v9420_v17  ;;  %4678 = vmatprep.subr.mxu1 %v9377_v10  ;;  %v9430_v10 = vand.u32 4294901760, %v7702_v9  ;;  %v7931_v56 = vand.u32 4294901760, %v420_v12  ;;  %v7934_v9 = vsub.f32 %v426_v43, %v7911_v2  ;;  %9434 = vst [vmem:[#allocation46_spill] sm:$0xff] %v8011_v30  ;;  %v3758_v17 = vsub.f32 %v7974_v27, %v8002_v18  ;;  %v8028_v43 = vpop.f32.mrf.mxu0 }
 0x225   : > { %4649 = vmatpush3.msra.mxu0 %v9421_v55  ;;  %4679 = vmatpush3.msra.mxu1 %v9378_v33  ;;  %v9432_v33 = vld [vmem:[#allocation75_spill] sm:$0xff]  ;;  %v8023_v55 = vand.u32 4294901760, %v399_v14 }
 0x226   : > { %4650 = vmatprep.subr.mxu0 %v9422_v20  ;;  %4680 = vmatprep.subr.mxu1 %v9379_v61  ;;  %v7927_v61 = vand.u32 4294901760, %v7906_v1  ;;  %v7960_v52 = vsub.f32 %v420_v12, %v7931_v56  ;;  %v8026_v20 = vsub.f32 %v405_v13, %v7999_v22  ;;  %v3759_v8 = vand.u32 4294901760, %v3758_v17 }
 0x227   : > { %4651 = vmatpush3.msra.mxu0 %v9423_v16  ;;  %4681 = vmatpush3.msra.mxu1 %v9424_v11  ;;  %v393_v16 = vld [vmem:[#allocation2 + $0x340] sm:$0xff]  ;;  %v8075_v13 = vand.u32 4294901760, %v387_v57 }
 0x228   : > { %4652 = vmatprep.subr.mxu0 %v9425_v62  ;;  %4682 = vmatprep.subr.mxu1 %v9383_v44  ;;  %v7922_v44 = vand.u32 4294901760, %v423_v31  ;;  %v7988_v0 = vand.u32 4294901760, %v7960_v52  ;;  %v8035_v62 = vand.u32 4294901760, %v396_v24  ;;  %v8050_v12 = vand.u32 4294901760, %v8026_v20 }
 0x229   : > { %4653 = vmatpush3.msra.mxu0 %v9426_v60  ;;  %4683 = vmatpush3.msra.mxu1 %v9427_v50  ;;  %v8041_v60 = vsub.f32 %v402_v34, %v8011_v30  ;;  %v390_v50 = vld [vmem:[#allocation2 + $0x328] sm:$0xff]  ;;  %v8084_v34 = vpop.f32.mrf.mxu1 }
 0x22a   : > { %4654 = vmatprep.subr.mxu0 %v9429_v45  ;;  %4684 = vmatprep.subr.mxu1 %v7581_v25  ;;  %v414_v25 = vld [vmem:[#allocation2 + $0x3e8] sm:$0xff]  ;;  %v7946_v47 = vsub.f32 %v423_v31, %v7922_v44  ;;  %v3751_v29 = vsub.f32 %v7960_v52, %v7988_v0  ;;  %v8038_v31 = vand.u32 4294901760, %v8014_v58  ;;  %v8047_v45 = vand.u32 4294901760, %v393_v16 }
 0x22b   : > { %4655 = vmatpush3.msra.mxu0 %v9430_v10  ;;  %3493 = vmatprep.mubr.f32.mxu0 %v9431_v40  ;;  %v7952_v42 = vand.u32 4294901760, %v414_v25  ;;  %v8053_v10 = vsub.f32 %v399_v14, %v8023_v55 }
 0x22c   : > { %4685 = vmatpush3.msra.mxu1 %v9432_v33  ;;  %3495 = vmatmul.mubr.f32.vlgmr.msra.gmra.mxu0 %v9433_v37  ;;  %v3752_v11 = vand.u32 4294901760, %v3751_v29 }
 0x22d   : > { %4686 = vmatprep.subr.mxu1 %v7606_v59  ;;  %4808 = vmatprep.subr.mxu0 %v7889_v21  ;;  %v411_v59 = vld [vmem:[#allocation2 + $0x3d0] sm:$0xff]  ;;  %v7979_v49 = vsub.f32 %v414_v25, %v7952_v42  ;;  %v8061_v25 = vand.u32 4294901760, %v390_v50 }
 0x22e   : > { %4687 = vmatpush3.msra.mxu1 %v7617_v39  ;;  %4809 = vmatpush3.msra.mxu0 %v7889_v21  ;;  %v3723_v39 = vsub.f32 %v7906_v1, %v7927_v61  ;;  %v7966_v48 = vand.u32 4294901760, %v411_v59 }
 0x22f   : > { %4688 = vmatprep.subr.mxu1 %v7624_v41  ;;  %4810 = vmatprep.subr.mxu0 %v7897_v4  ;;  %v7957_v41 = vand.u32 4294901760, %v7934_v9  ;;  %v8006_v6 = vand.u32 4294901760, %v7979_v49  ;;  %v8093_v29 = vsub.f32 %v390_v50, %v8061_v25 }
 0x230   : > { %3500 = vmatprep.mubr.f32.mxu0 %v9388_v5  ;;  %4689 = vmatpush3.msra.mxu1 %v7633_v46  ;;  %v7971_v46 = vand.u32 4294901760, %v7946_v47  ;;  %v7993_v7 = vsub.f32 %v411_v59, %v7966_v48  ;;  %v8064_v59 = vand.u32 4294901760, %v8041_v60 }
 0x231   : > { %4811 = vmatpush3.msra.mxu0 %v7897_v4  ;;  %4690 = vmatprep.subr.mxu1 %v7640_v63  ;;  %v3724_v63 = vand.u32 4294901760, %v3723_v39  ;;  %v8067_v39 = vsub.f32 %v396_v24, %v8035_v62 }
 0x232   : > { %3502 = vmatmul.mubr.f32.gmra.mxu0 %v9390_v19  ;;  %4812 = vmatprep.subr.mxu0 %v7911_v2  ;;  %v8018_v3 = vand.u32 4294901760, %v7993_v7  ;;  %9435 = vst [vmem:[#allocation81_spill] sm:$0xff] %v8064_v59  ;;  %v3793_v14 = vsub.f32 %v8041_v60, %v8064_v59 }
 0x233   : > { %4691 = vmatpush3.msra.mxu1 %v7653_v51  ;;  %4813 = vmatpush3.msra.mxu0 %v7911_v2  ;;  %v3737_v51 = vsub.f32 %v7934_v9, %v7957_v41 }
 0x234   : > { %4692 = vmatprep.subr.mxu1 %v7660_v15  ;;  %4814 = vmatprep.subr.mxu0 %v7922_v44  ;;  %v3731_v15 = vand.u32 4294901760, %v3730_v26 }
 0x235   : > { %4693 = vmatpush3.msra.mxu1 %v7673_v53  ;;  %3604 = vmatprep.mubr.f32.mxu1 %v9431_v40  ;;  %v3744_v53 = vsub.f32 %v7946_v47, %v7971_v46  ;;  %v3738_v35 = vand.u32 4294901760, %v3737_v51  ;;  %v8055_v40 = vpop.f32.mrf.mxu0  ;;  %v8078_v51 = vand.u32 4294901760, %v8053_v10 }
 0x236   : > { %4815 = vmatpush3.msra.mxu0 %v7922_v44  ;;  %3606 = vmatmul.mubr.f32.vlgmr.msra.gmra.mxu1 %v9433_v37  ;;  %v3779_v37 = vsub.f32 %v8014_v58, %v8038_v31 }
 0x237   : > { %4816 = vmatprep.subr.mxu0 %v7931_v56  ;;  %4843 = vmatprep.subr.mxu1 %v3724_v63  ;;  %v3745_v23 = vand.u32 4294901760, %v3744_v53  ;;  %v8069_v26 = vpop.f32.mrf.mxu0  ;;  %9436 = vst [vmem:[#allocation48_spill] sm:$0xff] %v8078_v51  ;;  %v3800_v17 = vsub.f32 %v8053_v10, %v8078_v51  ;;  %v9441_v51 = vld [vmem:[#allocation57_spill] sm:$0xff] }
 0x238   : > { %4817 = vmatpush3.msra.mxu0 %v7931_v56  ;;  %4844 = vmatpush3.msra.mxu1 %v3724_v63  ;;  %v3786_v63 = vsub.f32 %v8026_v20, %v8050_v12  ;;  %v3780_v53 = vand.u32 4294901760, %v3779_v37 }
 0x239   : > { %4818 = vmatprep.subr.mxu0 %v7943_v38  ;;  %4845 = vmatprep.subr.mxu1 %v3731_v15  ;;  %v8095_v24 = vpop.f32.mrf.mxu0  ;;  %v3801_v37 = vand.u32 4294901760, %v3800_v17 }
 0x23a   : > { %3611 = vmatprep.mubr.f32.mxu1 %v9388_v5  ;;  %4819 = vmatpush3.msra.mxu0 %v7943_v38  ;;  %v3765_v5 = vsub.f32 %v7979_v49, %v8006_v6 }
 0x23b   : > { %4846 = vmatpush3.msra.mxu1 %v3731_v15  ;;  %4820 = vmatprep.subr.mxu0 %v7952_v42  ;;  %v8081_v15 = vsub.f32 %v393_v16, %v8047_v45  ;;  %v8105_v16 = vsub.f32 %v387_v57, %v8075_v13 }
 0x23c   : > { %3613 = vmatmul.mubr.f32.gmra.mxu1 %v9390_v19  ;;  %4847 = vmatprep.subr.mxu1 %v3738_v35  ;;  %v3772_v19 = vsub.f32 %v7993_v7, %v8018_v3  ;;  %v3766_v33 = vand.u32 4294901760, %v3765_v5 }
 0x23d   : > { %4821 = vmatpush3.msra.mxu0 %v7952_v42  ;;  %4848 = vmatpush3.msra.mxu1 %v3738_v35  ;;  %v8090_v35 = vand.u32 4294901760, %v8067_v39  ;;  %v8102_v5 = vand.u32 4294901760, %v8081_v15 }
 0x23e   : > { %4822 = vmatprep.subr.mxu0 %v7966_v48  ;;  %4849 = vmatprep.subr.mxu1 %v3745_v23  ;;  %v3773_v36 = vand.u32 4294901760, %v3772_v19  ;;  %v3794_v19 = vand.u32 4294901760, %v3793_v14 }
 0x23f   : > { %4823 = vmatpush3.msra.mxu0 %v7966_v48  ;;  %4850 = vmatpush3.msra.mxu1 %v3745_v23  ;;  %9437 = vst [vmem:[#allocation83_spill] sm:$0xff] %v8090_v35  ;;  %v3787_v23 = vand.u32 4294901760, %v3786_v63  ;;  %9438 = vst [vmem:[#allocation50_spill] sm:$0xff] %v8102_v5  ;;  %v3807_v50 = vsub.f32 %v8067_v39, %v8090_v35  ;;  %v8125_v63 = vand.u32 4294901760, %v8105_v16 }
 0x240   : > { %4824 = vmatprep.subr.mxu0 %v7985_v28  ;;  %4851 = vmatprep.subr.mxu1 %v3752_v11 }
 0x241   : > { %4825 = vmatpush3.msra.mxu0 %v7985_v28  ;;  %4852 = vmatpush3.msra.mxu1 %v3752_v11  ;;  %v8108_v11 = vpop.f32.mrf.mxu1  ;;  %9440 = vst [vmem:[#allocation52_spill] sm:$0xff] %v8125_v63 }
 0x242   : > { %4826 = vmatprep.subr.mxu0 %v7999_v22  ;;  %4853 = vmatprep.subr.mxu1 %v3759_v8 }
 0x243   : > { %4827 = vmatpush3.msra.mxu0 %v7999_v22  ;;  %4854 = vmatpush3.msra.mxu1 %v3759_v8  ;;  %v8114_v8 = vand.u32 4294901760, %v8093_v29  ;;  %v8119_v57 = vpop.f32.mrf.mxu1 }
 0x244   : > { %4828 = vmatprep.subr.mxu0 %v8011_v30  ;;  %4855 = vmatprep.subr.mxu1 %v3766_v33 }
 0x245   : > { %4829 = vmatpush3.msra.mxu0 %v8011_v30  ;;  %4856 = vmatpush3.msra.mxu1 %v3766_v33  ;;  %9439 = vst [vmem:[#allocation85_spill] sm:$0xff] %v8114_v8  ;;  %v8116_v33 = vpop.f32.mrf.mxu0  ;;  %v3821_v14 = vsub.f32 %v8093_v29, %v8114_v8  ;;  %v8134_v17 = vpop.f32.mrf.mxu1 }
 0x246   : > { %4830 = vmatprep.subr.mxu0 %v8023_v55  ;;  %4857 = vmatprep.subr.mxu1 %v3773_v36 }
 0x247   : > { %4831 = vmatpush3.msra.mxu0 %v8023_v55  ;;  %4858 = vmatpush3.msra.mxu1 %v3773_v36  ;;  %v3814_v36 = vsub.f32 %v8081_v15, %v8102_v5  ;;  %v8131_v35 = vpop.f32.mrf.mxu0  ;;  %v3828_v5 = vsub.f32 %v8105_v16, %v8125_v63  ;;  %v3822_v8 = vand.u32 4294901760, %v3821_v14 }
 0x248   : > { %4832 = vmatprep.subr.mxu0 %v8035_v62  ;;  %4859 = vmatprep.subr.mxu1 %v3780_v53 }
 0x249   : > { %4833 = vmatpush3.msra.mxu0 %v8035_v62  ;;  %4860 = vmatpush3.msra.mxu1 %v3780_v53  ;;  %v3808_v53 = vand.u32 4294901760, %v3807_v50  ;;  %v9442_v50 = vld [vmem:[#allocation28_spill] sm:$0xff]  ;;  %v8141_v59 = vpop.f32.mrf.mxu0 }
 0x24a   : > { %4834 = vmatprep.subr.mxu0 %v8047_v45  ;;  %4861 = vmatprep.subr.mxu1 %v3787_v23 }
 0x24b   : > { %4835 = vmatpush3.msra.mxu0 %v8047_v45  ;;  %4862 = vmatpush3.msra.mxu1 %v3787_v23  ;;  %v3815_v23 = vand.u32 4294901760, %v3814_v36  ;;  %v3829_v36 = vand.u32 4294901760, %v3828_v5 }
 0x24c   : > { %4836 = vmatprep.subr.mxu0 %v8061_v25  ;;  %4863 = vmatprep.subr.mxu1 %v3794_v19 }
 0x24d   : > { %4837 = vmatpush3.msra.mxu0 %v8061_v25  ;;  %4864 = vmatpush3.msra.mxu1 %v3794_v19  ;;  %v8144_v19 = vpop.f32.mrf.mxu1 }
 0x24e   : > { %4838 = vmatprep.subr.mxu0 %v8075_v13  ;;  %4865 = vmatprep.subr.mxu1 %v3801_v37 }
 0x24f   : > { %4839 = vmatpush3.msra.mxu0 %v8075_v13  ;;  %4840 = vmatprep.mubr.f32.mxu0 %v9441_v51  ;;  %v8149_v51 = vpop.f32.mrf.mxu0 }
 0x250   : > { %4866 = vmatpush3.msra.mxu1 %v3801_v37  ;;  %4841 = vmatmul.mubr.f32.vlgmr.msra.gmra.mxu0 %v9442_v50  ;;  %v8152_v37 = vpop.f32.mrf.mxu1  ;;  %v8221_v50 = vld [vmem:[#allocation5] sm:$0x7] }
 0x251   : > { %4867 = vmatprep.subr.mxu1 %v3808_v53  ;;  %4878 = vmatprep.subr.mxu0 %v7906_v1 }
 0x252   : > { %4868 = vmatpush3.msra.mxu1 %v3808_v53  ;;  %4879 = vmatpush3.msra.mxu0 %v7906_v1  ;;  %v8155_v53 = vpop.f32.mrf.mxu0  ;;  %v9443_v1 = vld [vmem:[#allocation22_spill] sm:$0xff]  ;;  %v8162_v5 = vpop.f32.mrf.mxu1 }
 0x253   : > { %4869 = vmatprep.subr.mxu1 %v3815_v23  ;;  %4880 = vmatprep.subr.mxu0 %v7917_v32 }
 0x254   : > { %4870 = vmatpush3.msra.mxu1 %v3815_v23  ;;  %4881 = vmatpush3.msra.mxu0 %v7917_v32  ;;  %v9444_v32 = vld [vmem:[#allocation51_spill] sm:$0xff] }
 0x255   : > { %4871 = vmatprep.subr.mxu1 %v3822_v8  ;;  %4882 = vmatprep.subr.mxu0 %v7934_v9 }
 0x256   : > { %4872 = vmatpush3.msra.mxu1 %v3822_v8  ;;  %4883 = vmatpush3.msra.mxu0 %v7934_v9  ;;  %v8166_v9 = vpop.f32.mrf.mxu0 }
 0x257   : > { %4873 = vmatprep.subr.mxu1 %v3829_v36  ;;  %4884 = vmatprep.subr.mxu0 %v7946_v47 }
 0x258   : > { %4874 = vmatpush3.msra.mxu1 %v3829_v36  ;;  %4875 = vmatprep.mubr.f32.mxu1 %v9443_v1  ;;  %v9446_v1 = vld [vmem:[#allocation49_spill] sm:$0xff] }
 0x259   : > { %4885 = vmatpush3.msra.mxu0 %v7946_v47  ;;  %4876 = vmatmul.mubr.f32.vlgmr.msra.gmra.mxu1 %v9444_v32  ;;  %v8174_v47 = vpop.f32.mrf.mxu1 }
 0x25a   : > { %4886 = vmatprep.subr.mxu0 %v7960_v52  ;;  %4913 = vmatprep.subr.mxu1 %v7889_v21 }
 0x25b   : > { %4887 = vmatpush3.msra.mxu0 %v7960_v52  ;;  %4914 = vmatpush3.msra.mxu1 %v7889_v21  ;;  %v8178_v52 = vpop.f32.mrf.mxu0  ;;  %v8182_v8 = vpop.f32.mrf.mxu1 }
 0x25c   : > { %4888 = vmatprep.subr.mxu0 %v7974_v27  ;;  %4915 = vmatprep.subr.mxu1 %v7897_v4 }
 0x25d   : > { %4889 = vmatpush3.msra.mxu0 %v7974_v27  ;;  %4916 = vmatpush3.msra.mxu1 %v7897_v4  ;;  %v435_v27 = vlaneseq  ;;  %v8194_v14 = vpop.f32.mrf.mxu1 }
 0x25e   : > { %4890 = vmatprep.subr.mxu0 %v7979_v49  ;;  %4917 = vmatprep.subr.mxu1 %v7911_v2 }
 0x25f   : > { %4891 = vmatpush3.msra.mxu0 %v7979_v49  ;;  %4918 = vmatpush3.msra.mxu1 %v7911_v2  ;;  %v8190_v49 = vpop.f32.mrf.mxu0  ;;  %v8208_v23 = vpop.f32.mrf.mxu1 }
 0x260   : > { %4892 = vmatprep.subr.mxu0 %v7993_v7  ;;  %4919 = vmatprep.subr.mxu1 %v7922_v44 }
 0x261   : > { %4893 = vmatpush3.msra.mxu0 %v7993_v7  ;;  %4920 = vmatpush3.msra.mxu1 %v7922_v44  ;;  %v8198_v7 = vpop.f32.mrf.mxu0  ;;  %v8223_v36 = vpop.f32.mrf.mxu1 }
 0x262   : > { %4894 = vmatprep.subr.mxu0 %v8014_v58  ;;  %4921 = vmatprep.subr.mxu1 %v7931_v56 }
 0x263   : > { %4895 = vmatpush3.msra.mxu0 %v8014_v58  ;;  %4922 = vmatpush3.msra.mxu1 %v7931_v56  ;;  %v8204_v58 = vshrl.u32 %v435_v27, 7 }
 0x264   : > { %4896 = vmatprep.subr.mxu0 %v8026_v20  ;;  %4923 = vmatprep.subr.mxu1 %v7943_v38 }
 0x265   : > { %4897 = vmatpush3.msra.mxu0 %v8026_v20  ;;  %4924 = vmatpush3.msra.mxu1 %v7943_v38  ;;  %9445 = vst [vmem:[#allocation87_spill] sm:$0xff] %v8204_v58  ;;  %v8212_v20 = vpop.f32.mrf.mxu0 }
 0x266   : > { %4898 = vmatprep.subr.mxu0 %v8041_v60  ;;  %4925 = vmatprep.subr.mxu1 %v7952_v42 }
 0x267   : > { %4899 = vmatpush3.msra.mxu0 %v8041_v60  ;;  %4926 = vmatpush3.msra.mxu1 %v7952_v42  ;;  %v437_v60 = vsub.s32 0, %v8204_v58  ;;  %v8228_v27 = vpop.f32.mrf.mxu0 }
 0x268   : > { %4900 = vmatprep.subr.mxu0 %v8053_v10  ;;  %4927 = vmatprep.subr.mxu1 %v7966_v48 }
 0x269   : > { %4901 = vmatpush3.msra.mxu0 %v8053_v10  ;;  %4928 = vmatpush3.msra.mxu1 %v7966_v48  ;;  %v441_v10 = vsub.s32 1, %v8204_v58  ;;  %v438_v32 = vrot.slane %v8221_v50, %v437_v60  ;;  %v8242_v58 = vpop.f32.mrf.mxu0 }
 0x26a   : > { %4902 = vmatprep.subr.mxu0 %v8067_v39  ;;  %4929 = vmatprep.subr.mxu1 %v7985_v28 }
 0x26b   : > { %4903 = vmatpush3.msra.mxu0 %v8067_v39  ;;  %4930 = vmatpush3.msra.mxu1 %v7985_v28  ;;  %v8232_v39 = vpop.f32.mrf.mxu1  ;;  %v591_v60 = vadd.f32 %v8028_v43, %v438_v32 }
 0x26c   : > { %4904 = vmatprep.subr.mxu0 %v8081_v15  ;;  %4931 = vmatprep.subr.mxu1 %v7999_v22 }
 0x26d   : > { %4905 = vmatpush3.msra.mxu0 %v8081_v15  ;;  %4932 = vmatpush3.msra.mxu1 %v7999_v22  ;;  %v442_v15 = vrot.slane %v8221_v50, %v441_v10  ;;  %v8246_v63 = vpop.f32.mrf.mxu1  ;;  %v1000_v43 = vadd.f32 %v8084_v34, %v591_v60 }
 0x26e   : > { %4906 = vmatprep.subr.mxu0 %v8093_v29  ;;  %4933 = vmatprep.subr.mxu1 %v8011_v30 }
 0x26f   : > { %4907 = vmatpush3.msra.mxu0 %v8093_v29  ;;  %4934 = vmatpush3.msra.mxu1 %v8011_v30  ;;  %v9447_v29 = vld [vmem:[#allocation26_spill] sm:$0xff]  ;;  %v8251_v30 = vpop.f32.mrf.mxu0  ;;  %v8261_v10 = vpop.f32.mrf.mxu1 }
 0x270   : > { %4908 = vmatprep.subr.mxu0 %v8105_v16  ;;  %4935 = vmatprep.subr.mxu1 %v8023_v55 }
 0x271   : > { %4909 = vmatpush3.msra.mxu0 %v8105_v16  ;;  %4910 = vmatprep.mubr.f32.mxu0 %v9446_v1  ;;  %v593_v16 = vadd.f32 %v8055_v40, %v442_v15  ;;  %v607_v1 = vadd.f32 %v8069_v26, %v438_v32  ;;  %v8278_v34 = vpop.f32.mrf.mxu1  ;;  %v9448_v32 = vld [vmem:[#allocation53_spill] sm:$0xff] }
 0x272   : > { %4936 = vmatpush3.msra.mxu1 %v8023_v55  ;;  %4911 = vmatmul.mubr.f32.vlgmr.msra.gmra.mxu0 %v9447_v29  ;;  %v8266_v29 = vpop.f32.mrf.mxu0 }
 0x273   : > { %4937 = vmatprep.subr.mxu1 %v8035_v62  ;;  %4948 = vmatprep.subr.mxu0 %v7927_v61  ;;  %v1002_v40 = vadd.f32 %v8108_v11, %v593_v16  ;;  %v1008_v26 = vadd.f32 %v8119_v57, %v607_v1  ;;  %v9449_v11 = vld [vmem:[#allocation27_spill] sm:$0xff]  ;;  %v2400_v60 = vpop.f32.mrf.mxu1 }
 0x274   : > { %4938 = vmatpush3.msra.mxu1 %v8035_v62  ;;  %4949 = vmatpush3.msra.mxu0 %v7927_v61  ;;  %v609_v61 = vadd.f32 %v8095_v24, %v442_v15  ;;  %v8284_v15 = vpop.f32.mrf.mxu0 }
 0x275   : > { %4939 = vmatprep.subr.mxu1 %v8047_v45  ;;  %4950 = vmatprep.subr.mxu0 %v7939_v54 }
 0x276   : > { %4940 = vmatpush3.msra.mxu1 %v8047_v45  ;;  %4951 = vmatpush3.msra.mxu0 %v7939_v54  ;;  %v1211_v54 = vadd.f32 %v8116_v33, %v1000_v43  ;;  %v1010_v33 = vadd.f32 %v8134_v17, %v609_v61  ;;  %v2296_v16 = vpop.f32.mrf.mxu0 }
 0x277   : > { %4941 = vmatprep.subr.mxu1 %v8061_v25  ;;  %4952 = vmatprep.subr.mxu0 %v7957_v41 }
 0x278   : > { %4942 = vmatpush3.msra.mxu1 %v8061_v25  ;;  %4953 = vmatpush3.msra.mxu0 %v7957_v41  ;;  %v1213_v41 = vadd.f32 %v8131_v35, %v1002_v40  ;;  %v1362_v24 = vadd.f32 %v8144_v19, %v1211_v54  ;;  %v1221_v35 = vadd.f32 %v8141_v59, %v1008_v26  ;;  %v4303_v40 = vld [vmem:[%s8344_s26 + $0x8] sm:$0xff] }
 0x279   : > { %4943 = vmatprep.subr.mxu1 %v8075_v13  ;;  %4954 = vmatprep.subr.mxu0 %v7971_v46  ;;  %v9453_v54 = vld [vmem:[#allocation50_spill] sm:$0xff] }
 0x27a   : > { %4944 = vmatpush3.msra.mxu1 %v8075_v13  ;;  %4945 = vmatprep.mubr.f32.mxu1 %v9448_v32  ;;  %v1364_v57 = vadd.f32 %v8152_v37, %v1213_v41  ;;  %v2402_v37 = vpop.f32.mrf.mxu1 }
 0x27b   : > { %4955 = vmatpush3.msra.mxu0 %v7971_v46  ;;  %4946 = vmatmul.mubr.f32.vlgmr.msra.gmra.mxu1 %v9449_v11  ;;  %v1639_v46 = vadd.f32 %v8155_v53, %v1362_v24  ;;  %v9454_v24 = vld [vmem:[#allocation85_spill] sm:$0xff] }
 0x27c   : > { %4956 = vmatprep.subr.mxu0 %v7988_v0  ;;  %4983 = vmatprep.subr.mxu1 %v7889_v21  ;;  %v1641_v17 = vadd.f32 %v8166_v9, %v1364_v57 }
 0x27d   : > { %4957 = vmatpush3.msra.mxu0 %v7988_v0  ;;  %4984 = vmatpush3.msra.mxu1 %v7889_v21  ;;  %v1784_v19 = vadd.f32 %v8182_v8, %v1639_v46  ;;  %v1223_v0 = vadd.f32 %v8149_v51, %v1010_v33  ;;  %v1374_v21 = vadd.f32 %v8162_v5, %v1221_v35  ;;  %v2409_v8 = vpop.f32.mrf.mxu1  ;;  %v4305_v33 = vld [vmem:[%s8344_s26 + $0x18] sm:$0xff] }
 0x27e   : > { %4958 = vmatprep.subr.mxu0 %v8002_v18  ;;  %4985 = vmatprep.subr.mxu1 %v7897_v4  ;;  %v9456_v35 = vld [vmem:[#allocation52_spill] sm:$0xff] }
 0x27f   : > { %4959 = vmatpush3.msra.mxu0 %v8002_v18  ;;  %4986 = vmatpush3.msra.mxu1 %v7897_v4  ;;  %v1786_v18 = vadd.f32 %v8194_v14, %v1641_v17  ;;  %v1900_v59 = vadd.f32 %v8198_v7, %v1784_v19  ;;  %v1376_v53 = vadd.f32 %v8174_v47, %v1223_v0  ;;  %v2411_v7 = vpop.f32.mrf.mxu1  ;;  %v4306_v19 = vld [vmem:[%s8344_s26 + $0x20] sm:$0xff] }
 0x280   : > { %4960 = vmatprep.subr.mxu0 %v8006_v6  ;;  %4987 = vmatprep.subr.mxu1 %v7911_v2  ;;  %v2577_v4 = vpop.f32.mrf.mxu0  ;;  %v1647_v51 = vadd.f32 %v8178_v52, %v1374_v21  ;;  %v9457_v21 = vld [vmem:[#allocation22_spill] sm:$0xff] }
 0x281   : > { %4961 = vmatpush3.msra.mxu0 %v8006_v6  ;;  %4988 = vmatpush3.msra.mxu1 %v7911_v2  ;;  %v1902_v5 = vadd.f32 %v8212_v20, %v1786_v18  ;;  %v2143_v6 = vadd.f32 %v8232_v39, %v1900_v59  ;;  %v1649_v2 = vadd.f32 %v8190_v49, %v1376_v53  ;;  %v4302_v39 = vld [vmem:[%s8344_s26] sm:$0xff] }
 0x282   : > { %4962 = vmatprep.subr.mxu0 %v8018_v3  ;;  %4989 = vmatprep.subr.mxu1 %v7922_v44  ;;  %v1792_v9 = vadd.f32 %v8208_v23, %v1647_v51 }
 0x283   : > { %4963 = vmatpush3.msra.mxu0 %v8018_v3  ;;  %4990 = vmatpush3.msra.mxu1 %v7922_v44  ;;  %v2145_v47 = vadd.f32 %v8246_v63, %v1902_v5  ;;  %v2287_v3 = vadd.f32 %v8251_v30, %v2143_v6  ;;  %v2579_v44 = vpop.f32.mrf.mxu0  ;;  %v1794_v52 = vadd.f32 %v8223_v36, %v1649_v2  ;;  %v9450_v63 = vld [vmem:[#allocation81_spill] sm:$0xff] }
 0x284   : > { %4964 = vmatprep.subr.mxu0 %v8038_v31  ;;  %4991 = vmatprep.subr.mxu1 %v7931_v56  ;;  %v1911_v49 = vadd.f32 %v8228_v27, %v1792_v9 }
 0x285   : > { %4965 = vmatpush3.msra.mxu0 %v8038_v31  ;;  %4992 = vmatpush3.msra.mxu1 %v7931_v56  ;;  %v2289_v14 = vadd.f32 %v8266_v29, %v2145_v47  ;;  %v2401_v31 = vadd.f32 %v2400_v60, %v2287_v3  ;;  %v1913_v56 = vadd.f32 %v8242_v58, %v1794_v52  ;;  %v9455_v60 = vld [vmem:[#allocation46_spill] sm:$0xff] }
 0x286   : > { %4966 = vmatprep.subr.mxu0 %v8050_v12  ;;  %4993 = vmatprep.subr.mxu1 %v7943_v38  ;;  %v2150_v30 = vadd.f32 %v8261_v10, %v1911_v49  ;;  %v2584_v36 = vpop.f32.mrf.mxu0 }
 0x287   : > { %4967 = vmatpush3.msra.mxu0 %v8050_v12  ;;  %4994 = vmatpush3.msra.mxu1 %v7943_v38  ;;  %v2403_v23 = vadd.f32 %v2402_v37, %v2289_v14  ;;  %v9451_v12 = vld [vmem:[#allocation48_spill] sm:$0xff]  ;;  %v2578_v20 = vadd.f32 %v2577_v4, %v2401_v31  ;;  %v2152_v38 = vadd.f32 %v8278_v34, %v1913_v56  ;;  %v9458_v37 = vld [vmem:[#allocation51_spill] sm:$0xff] }
 0x288   : > { %4968 = vmatprep.subr.mxu0 %v9450_v63  ;;  %4995 = vmatprep.subr.mxu1 %v7952_v42  ;;  %v2295_v27 = vadd.f32 %v8284_v15, %v2150_v30  ;;  %v2586_v26 = vpop.f32.mrf.mxu0 }
 0x289   : > { %4969 = vmatpush3.msra.mxu0 %v9450_v63  ;;  %4996 = vmatpush3.msra.mxu1 %v7952_v42  ;;  %v9452_v42 = vld [vmem:[#allocation83_spill] sm:$0xff]  ;;  %v2580_v1 = vadd.f32 %v2579_v44, %v2403_v23  ;;  %v2297_v43 = vadd.f32 %v2296_v16, %v2152_v38 }
 0x28a   : > { %4970 = vmatprep.subr.mxu0 %v9451_v12  ;;  %4997 = vmatprep.subr.mxu1 %v7966_v48  ;;  %v2688_v58 = vpop.f32.mrf.mxu1  ;;  %v2410_v29 = vadd.f32 %v2409_v8, %v2295_v27 }
 0x28b   : > { %4971 = vmatpush3.msra.mxu0 %v9451_v12  ;;  %4998 = vmatpush3.msra.mxu1 %v7966_v48  ;;  %v2689_v10 = vadd.f32 %v2688_v58, %v2578_v20  ;;  %v2412_v32 = vadd.f32 %v2411_v7, %v2297_v43 }
 0x28c   : > { %4972 = vmatprep.subr.mxu0 %v9452_v42  ;;  %4999 = vmatprep.subr.mxu1 %v7985_v28  ;;  %v2690_v61 = vpop.f32.mrf.mxu1  ;;  %v2585_v41 = vadd.f32 %v2584_v36, %v2410_v29 }
 0x28d   : > { %4973 = vmatpush3.msra.mxu0 %v9452_v42  ;;  %5000 = vmatpush3.msra.mxu1 %v7985_v28  ;;  %v4308_v34 = vadd.f32 %v4302_v39, %v2689_v10  ;;  %v2691_v48 = vadd.f32 %v2690_v61, %v2580_v1  ;;  %v2587_v57 = vadd.f32 %v2586_v26, %v2412_v32 }
 0x28e   : > { %4974 = vmatprep.subr.mxu0 %v9453_v54  ;;  %5001 = vmatprep.subr.mxu1 %v7999_v22 }
 0x28f   : > { %4975 = vmatpush3.msra.mxu0 %v9453_v54  ;;  %5002 = vmatpush3.msra.mxu1 %v7999_v22  ;;  %v4314_v15 = vmax.f32 %v4308_v34, 0.0  ;;  %v4309_v11 = vadd.f32 %v4303_v40, %v2691_v48 }
 0x290   : > { %4976 = vmatprep.subr.mxu0 %v9454_v24  ;;  %v2695_v28 = vpop.f32.mrf.mxu1  ;;  %5003 = vmatprep.subr.mxu1 %v9455_v60 }
 0x291   : > { %4977 = vmatpush3.msra.mxu0 %v9454_v24  ;;  %v2696_v46 = vadd.f32 %v2695_v28, %v2585_v41  ;;  %5004 = vmatpush3.msra.mxu1 %v9455_v60  ;;  %4320 = vst [vmem:[%s8364_s24] sm:$0xff] %v4314_v15  ;;  %v4315_v22 = vmax.f32 %v4309_v11, 0.0 }
 0x292   : > { %4978 = vmatprep.subr.mxu0 %v9456_v35  ;;  %v2697_v17 = vpop.f32.mrf.mxu1  ;;  %5005 = vmatprep.subr.mxu1 %v8023_v55 }
 0x293   : > { %4979 = vmatpush3.msra.mxu0 %v9456_v35  ;;  %v4311_v16 = vadd.f32 %v4305_v33, %v2696_v46  ;;  %v2698_v0 = vadd.f32 %v2697_v17, %v2587_v57  ;;  %4980 = vmatprep.mubr.f32.mxu0 %v9457_v21  ;;  %4321 = vst [vmem:[%s8364_s24 + $0x8] sm:$0xff] %v4315_v22 }
 0x294   : > { %5006 = vmatpush3.msra.mxu1 %v8023_v55  ;;  %4981 = vmatmul.mubr.f32.vlgmr.msra.gmra.mxu0 %v9458_v37 }
 0x295   : > { %5007 = vmatprep.subr.mxu1 %v8035_v62  ;;  %v4317_v18 = vmax.f32 %v4311_v16, 0.0  ;;  %v4312_v59 = vadd.f32 %v4306_v19, %v2698_v0  ;;  %5015 = vmatprep.mubr.f32.mxu1 %v9457_v21 }
 0x296   : > { %5008 = vmatpush3.msra.mxu1 %v8035_v62 }
 0x297   : > { %5009 = vmatprep.subr.mxu1 %v8047_v45  ;;  %4323 = vst [vmem:[%s8364_s24 + $0x18] sm:$0xff] %v4317_v18  ;;  %v4318_v4 = vmax.f32 %v4312_v59, 0.0 }
 0x298   : > { %5010 = vmatpush3.msra.mxu1 %v8047_v45 }
 0x299   : > { %5011 = vmatprep.subr.mxu1 %v8061_v25  ;;  %4324 = vst [vmem:[%s8364_s24 + $0x20] sm:$0xff] %v4318_v4 }
 0x29a   : > { %5012 = vmatpush3.msra.mxu1 %v8061_v25 }
 0x29b   : > { %5013 = vmatprep.subr.mxu1 %v8075_v13 }
 0x29c   : > { %5014 = vmatpush3.msra.mxu1 %v8075_v13  ;;  %v9459_v13 = vld [vmem:[#allocation87_spill] sm:$0xff] }
 0x29d   : > { %5016 = vmatmul.mubr.f32.vlgmr.msra.gmra.mxu1 %v9458_v37  ;;  %v445_v31 = vsub.s32 2, %v9459_v13 }
 0x29f   : > { %v446_v7 = vrot.slane %v8221_v50, %v445_v31 }
 0x2a5   : > { %v4504_v55 = vpop.f32.mrf.mxu0 }
 0x2a7   : > { %v4505_v53 = vpop.f32.mrf.mxu0 }
 0x2a8   : > { %v4506_v12 = vadd.f32 %v4505_v53, %v4504_v55 }
 0x2aa   : > { %v2809_v58 = vadd.f32 %v4506_v12, %v446_v7 }
 0x2ad   : > { %v4542_v62 = vpop.f32.mrf.mxu1 }
 0x2af   : > { %v4543_v51 = vpop.f32.mrf.mxu1 }
 0x2b0   : > { %v4544_v39 = vadd.f32 %v4543_v51, %v4542_v62 }
 0x2b2   : > { %v3056_v54 = vadd.f32 %v4544_v39, %v2809_v58 }
 0x2c2   : > { %v4507_v5 = vpop.f32.mrf.mxu0 }
 0x2c4   : > { %v4508_v2 = vpop.f32.mrf.mxu0 }
 0x2c5   : > { %v4509_v56 = vadd.f32 %v4508_v2, %v4507_v5 }
 0x2c7   : > { %v4580_v45 = vpop.f32.mrf.mxu0  ;;  %v2824_v20 = vadd.f32 %v4509_v56, %v446_v7 }
 0x2c9   : > { %v4581_v47 = vpop.f32.mrf.mxu0 }
 0x2ca   : > { %v4582_v43 = vadd.f32 %v4581_v47, %v4580_v45 }
 0x2cb   : > { %v4545_v6 = vpop.f32.mrf.mxu1 }
 0x2cc   : > { %v3201_v50 = vadd.f32 %v4582_v43, %v3056_v54 }
 0x2cd   : > { %v4546_v9 = vpop.f32.mrf.mxu1 }
 0x2ce   : > { %v4583_v44 = vpop.f32.mrf.mxu0  ;;  %v4547_v36 = vadd.f32 %v4546_v9, %v4545_v6  ;;  %v4307_v9 = vld [vmem:[%s8344_s26 + $0x28] sm:$0xff] }
 0x2d0   : > { %v4584_v52 = vpop.f32.mrf.mxu0  ;;  %v3063_v42 = vadd.f32 %v4547_v36, %v2824_v20 }
 0x2d1   : > { %v4585_v1 = vadd.f32 %v4584_v52, %v4583_v44 }
 0x2d2   : > { %v4618_v8 = vpop.f32.mrf.mxu1 }
 0x2d3   : > { %v3210_v26 = vadd.f32 %v4585_v1, %v3063_v42 }
 0x2d4   : > { %v4619_v3 = vpop.f32.mrf.mxu1 }
 0x2d5   : > { %v4620_v34 = vadd.f32 %v4619_v3, %v4618_v8  ;;  %v4304_v3 = vld [vmem:[%s8344_s26 + $0x10] sm:$0xff] }
 0x2d7   : > { %v3318_v28 = vadd.f32 %v4620_v34, %v3201_v50 }
 0x2d8   : > { %v4621_v25 = vpop.f32.mrf.mxu1 }
 0x2da   : > { %v4622_v49 = vpop.f32.mrf.mxu1 }
 0x2db   : > { %v4623_v29 = vadd.f32 %v4622_v49, %v4621_v25 }
 0x2dd   : > { %v3329_v32 = vadd.f32 %v4623_v29, %v3210_v26 }
 0x2ec   : > { %v4656_v14 = vpop.f32.mrf.mxu0 }
 0x2ee   : > { %v4657_v30 = vpop.f32.mrf.mxu0 }
 0x2ef   : > { %v4658_v41 = vadd.f32 %v4657_v30, %v4656_v14 }
 0x2f1   : > { %v3497_v46 = vadd.f32 %v4658_v41, %v3318_v28 }
 0x2f2   : > { %v4659_v38 = vpop.f32.mrf.mxu0 }
 0x2f4   : > { %v4660_v10 = vpop.f32.mrf.mxu0 }
 0x2f5   : > { %v4661_v48 = vadd.f32 %v4660_v10, %v4659_v38 }
 0x2f6   : > { %v4694_v63 = vpop.f32.mrf.mxu1 }
 0x2f7   : > { %v3504_v33 = vadd.f32 %v4661_v48, %v3329_v32 }
 0x2f8   : > { %v4695_v23 = vpop.f32.mrf.mxu1 }
 0x2f9   : > { %v4696_v60 = vadd.f32 %v4695_v23, %v4694_v63 }
 0x2fb   : > { %v3608_v19 = vadd.f32 %v4696_v60, %v3497_v46 }
 0x2fc   : > { %v4697_v27 = vpop.f32.mrf.mxu1 }
 0x2fe   : > { %v4698_v61 = vpop.f32.mrf.mxu1 }
 0x2ff   : > { %v4699_v24 = vadd.f32 %v4698_v61, %v4697_v27 }
 0x301   : > { %v3615_v35 = vadd.f32 %v4699_v24, %v3504_v33 }
 0x310   : > { %v4842_v40 = vpop.f32.mrf.mxu0 }
 0x311   : > { %v3716_v17 = vadd.f32 %v4842_v40, %v3615_v35 }
 0x312   : > { %v3705_v15 = vpop.f32.mrf.mxu0 }
 0x313   : > { %v3706_v21 = vadd.f32 %v3705_v15, %v3608_v19 }
 0x319   : > { %v4877_v11 = vpop.f32.mrf.mxu1 }
 0x31a   : > { %v3873_v37 = vadd.f32 %v4877_v11, %v3716_v17 }
 0x31b   : > { %v3866_v22 = vpop.f32.mrf.mxu1 }
 0x31c   : > { %v3867_v59 = vadd.f32 %v3866_v22, %v3706_v21 }
 0x332   : > { %v4912_v57 = vpop.f32.mrf.mxu0 }
 0x333   : > { %v3984_v4 = vadd.f32 %v4912_v57, %v3873_v37 }
 0x334   : > { %v3976_v16 = vpop.f32.mrf.mxu0 }
 0x335   : > { %v3977_v62 = vadd.f32 %v3976_v16, %v3867_v59 }
 0x33b   : > { %v4947_v0 = vpop.f32.mrf.mxu1 }
 0x33c   : > { %v4081_v53 = vadd.f32 %v4947_v0, %v3984_v4 }
 0x33d   : > { %v4072_v55 = vpop.f32.mrf.mxu1 }
 0x33e   : > { %v4073_v5 = vadd.f32 %v4072_v55, %v3977_v62 }
 0x354   : > { %v4982_v18 = vpop.f32.mrf.mxu0 }
 0x355   : > { %v4206_v6 = vadd.f32 %v4982_v18, %v4081_v53 }
 0x356   : > { %v4199_v51 = vpop.f32.mrf.mxu0 }
 0x357   : > { %v4200_v45 = vadd.f32 %v4199_v51, %v4073_v5 }
 0x35d   : > { %v5017_v2 = vpop.f32.mrf.mxu1 }
 0x35e   : > { %v4299_v8 = vadd.f32 %v5017_v2, %v4206_v6 }
 0x35f   : > { %v4292_v47 = vpop.f32.mrf.mxu1 }
 0x360   : > { %v4313_v44 = vadd.f32 %v4307_v9, %v4299_v8  ;;  %v4293_v25 = vadd.f32 %v4292_v47, %v4200_v45 }
 0x362   : > { %v4319_v52 = vmax.f32 %v4313_v44, 0.0  ;;  %v4310_v49 = vadd.f32 %v4304_v3, %v4293_v25 }
 0x364   : > { %4325 = vst [vmem:[%s8364_s24 + $0x28] sm:$0xff] %v4319_v52  ;;  %v4316_v14 = vmax.f32 %v4310_v49, 0.0 }
 0x366   : > { %4322 = vst [vmem:[%s8364_s24 + $0x10] sm:$0xff] %v4316_v14 }
 0x367   : > { %5222 = shalt.err (!%p5219_p12)
}
 0x368   : > { %s5223_s7 = scalar_lea.hbm %s8397_s8, 768  ;;  %s5227_s13 = scalar_lea.hbm %s8448_s4, 1536 }
 0x369   : > { %p5224_p11 = scmp.ne.s32.totalorder %s8397_s8, %s5223_s7  ;;  %p5228_p0 = scmp.lt.s32.totalorder %s8397_s8, %s8448_s4 }
 0x36a   : > { %p5229_p4 = scmp.lt.s32.totalorder %s5227_s13, %s5223_s7 }
 0x36b   : > { %p5225_p8 = pnand %p5224_p11, %p9460_p7 }
 0x36c   : > { %p5230_p6 = por %p5229_p4, %p5228_p0 }
 0x36d   : > { %p5226_p2 = pneg %p5225_p8 }
 0x36f   : > { %p5231_p13 = pnand %p5230_p6, %p5226_p2 }
 0x371   : > { %5234 = shalt.err (!%p5231_p13)
}
 0x372   : > { %s5291_s22 = smov 384   ;;  %s5292_s26 = smov 24  }
 0x373   : > { %5036 = dma.vmem_to_hbm [thread:$0]  (%p9460_p7), %s8392_s14, 768, %s8397_s8, %s8403_s25, %s5291_s22, %s5291_s22, %s5292_s26  }
 0x374 PF: > { %s4356_s24 = sand.u32 1, %s5269_s15   ;;  %p9461_p3 = scmp.ne.s32.totalorder %s8827_s28, 0 }
 0x375   : > { %p9462_p9 = scmp.ge.s32.totalorder %s5281_s18, 2  ;;  %s4357_s6 = scalar_lea.sflag [#allocation4], %s4356_s24 }
 0x377   : > { %p5053_p10 = pnand %p9462_p9, %p9461_p3 }
 0x379   : > { %p5054_p1 = pneg %p5053_p10 }
 0x37b   : > { %5264 = dma.done.wait (%p5054_p1), %s4357_s6, 768  }
 0x37c   : > { %5266 = vsyncadd (%p5054_p1), %s4357_s6, 4294966528  ;;  %s9463_s9 = sld [smem:[#allocation14_spill]]  ;;  %p16_p5 = scmp.ge.s32.totalorder %s5343_s21, 4  }
 0x37d   : > { %s9464_s15 = smov %s5273_s16  ;;  %s9465_s16 = smov %s5277_s17 }
 0x37e   : > { %s9467_s18 = smov %s5343_s21  ;;  %18 = sbr.rel (!%p16_p5) target bundleno = 5 (0x5), region = 99 }
 0x382   : > { %s9466_s17 = smov %s9463_s9 }
 0x383   :  { %4362 = vsyncpa [#allocation3], 1 }
 0x384   :  { %4364 = vsyncpa [#allocation3 + $0x1], 1 }
 0x385   :  { %4365 = vsyncpa [#allocation6], 1 }
 0x386   :  { %4366 = vsyncpa [#allocation4], 1 }
 0x387   :  { %4368 = vsyncpa [#allocation4 + $0x1], 1 }

</bundles_post_ra>
